<compile_context>
chip_gen: v7x
topology: tpu7x:2x2x1
jax: 0.10.0
libtpu: 0.0.40
codegen_flags: <defaults>
</compile_context>

<pallas_src>
import functools

import jax
import jax.numpy as jnp
from jax.experimental import pallas as pl
from jax.experimental.pallas import tpu as pltpu


_CHUNK = 512  # rows per inner sub-chunk (keeps intermediates register-sized)


def _round_up(n, m):
    return ((n + m - 1) // m) * m


# ----------------------------------------------------------------------------
# Kernel: whole MLP for one (TB, 3) batch tile, processed in row sub-chunks.
# Weights are transposed (in, out); biases are (1, out) rows. Layer-1 weight is
# f32 (VPU path); layers 2-4 weights are bf16 (MXU operands).
# ----------------------------------------------------------------------------
def _mlp_kernel(x_ref,
                w1_ref, b1_ref,
                w2_ref, b2_ref,
                w3_ref, b3_ref,
                w4_ref, b4_ref,
                o_ref, *, chunk, n_chunks):
    # Business-head column mask, computed once per grid step, reused per chunk.
    col = jax.lax.broadcasted_iota(jnp.int32, (chunk, 3), dimension=1)
    is_profit = col == 1

    w1 = w1_ref[...]            # (3, 128) f32, VMEM-resident across grid steps
    b1 = b1_ref[...]            # (1, 128) f32

    def body(ci, carry):
        r0 = pl.multiple_of(ci * chunk, chunk)
        xc = x_ref[pl.ds(r0, chunk), :]                         # (C, 3) f32

        # Layer 1 (in=3): K=3 would waste the MXU -> three VPU broadcast FMAs.
        h = (xc[:, 0:1] * w1[0:1, :]
             + xc[:, 1:2] * w1[1:2, :]
             + xc[:, 2:3] * w1[2:3, :]) + b1
        h = jnp.maximum(h, 0.0)                                  # (C, 128) f32

        # Layers 2-3: bf16 MXU operands, f32 accumulate, f32 bias + ReLU.
        h = jnp.maximum(
            jnp.dot(h.astype(jnp.bfloat16), w2_ref[...],
                    preferred_element_type=jnp.float32) + b2_ref[...], 0.0)
        h = jnp.maximum(
            jnp.dot(h.astype(jnp.bfloat16), w3_ref[...],
                    preferred_element_type=jnp.float32) + b3_ref[...], 0.0)

        # Output head Linear(32, 3).
        out = jnp.dot(h.astype(jnp.bfloat16), w4_ref[...],
                      preferred_element_type=jnp.float32) + b4_ref[...]  # (C,3)

        # modal = relu(col 0), profit = col 1 (pass-through), rugi = relu(col 2).
        o_ref[pl.ds(r0, chunk), :] = jnp.where(
            is_profit, out, jnp.maximum(out, 0.0))
        return carry

    jax.lax.fori_loop(0, n_chunks, body, 0, unroll=True)


# ----------------------------------------------------------------------------
# Wrapper: tile the batch on a 1-D grid; no transposes, no extra HBM passes.
# ----------------------------------------------------------------------------
def business_mlp_forward(x, kparams, *, block_b=8192):
    """x: (B, 3) float32; kparams: folded kernel operands from fold_params."""
    B, f_in = x.shape
    assert f_in == 3
    block_b = max(_CHUNK, _round_up(block_b, _CHUNK))

    if B <= _CHUNK:
        TB = _round_up(B, 8)          # single tile, single chunk
        chunk = TB
        Bp = TB
    else:
        Bp0 = _round_up(B, _CHUNK)
        n_steps = -(-Bp0 // block_b)  # ceil: >=2 grid steps once B > block_b
        TB = _round_up(-(-Bp0 // n_steps), _CHUNK)
        chunk = _CHUNK
        Bp = TB * n_steps

    if Bp != B:                        # only pads when B is not tile-aligned
        x = jnp.pad(x, ((0, Bp - B), (0, 0)))

    kernel = functools.partial(_mlp_kernel, chunk=chunk, n_chunks=TB // chunk)

    def const_spec(a):                 # full-array block, resident across grid
        return pl.BlockSpec(a.shape, lambda i: (0,) * a.ndim)

    in_specs = [pl.BlockSpec((TB, 3), lambda i: (i, 0))]
    in_specs += [const_spec(p) for p in kparams]
    out_spec = pl.BlockSpec((TB, 3), lambda i: (i, 0))

    out = pl.pallas_call(
        kernel,
        out_shape=jax.ShapeDtypeStruct((Bp, 3), jnp.float32),
        grid=(Bp // TB,),
        in_specs=in_specs,
        out_specs=out_spec,
        compiler_params=pltpu.CompilerParams(
            dimension_semantics=("parallel",),        # megacore batch sharding
            vmem_limit_bytes=32 * 1024 * 1024),       # safe on v5e/v6e/v7x
    )(x, *kparams)

    return out if Bp == B else out[:B]


# ----------------------------------------------------------------------------
# Deterministic parameter construction (PyTorch layout) + BN/bias folding.
# ----------------------------------------------------------------------------
def _xavier_uniform(key, fan_out, fan_in):
    bound = jnp.sqrt(6.0 / (fan_in + fan_out))
    return jax.random.uniform(key, (fan_out, fan_in), jnp.float32, -bound, bound)


def make_torch_params(key, input_size=3, hidden_sizes=(128, 64, 32), output_size=3):
    """PyTorch-layout params: Linear weight (out, in), bias (out,), plus
    eval-mode BatchNorm1d state (gamma, beta, running_mean, running_var).
    Non-trivial BN stats so the folding math is actually exercised."""
    sizes = [input_size] + list(hidden_sizes)
    keys = jax.random.split(key, 2 * len(hidden_sizes) + 1)
    hidden = []
    for i, (fi, fo) in enumerate(zip(sizes[:-1], sizes[1:])):
        w = _xavier_uniform(keys[2 * i], fo, fi)                 # xavier_uniform_
        b = jnp.zeros((fo,), jnp.float32)                        # constant_(bias, 0)
        kg, kb, km, kv = jax.random.split(keys[2 * i + 1], 4)
        gamma = jax.random.uniform(kg, (fo,), jnp.float32, 0.5, 1.5)
        beta = 0.1 * jax.random.normal(kb, (fo,), jnp.float32)
        rmean = 0.1 * jax.random.normal(km, (fo,), jnp.float32)
        rvar = jax.random.uniform(kv, (fo,), jnp.float32, 0.5, 1.5)
        hidden.append((w, b, gamma, beta, rmean, rvar))
    w_out = _xavier_uniform(keys[-1], output_size, sizes[-1])
    b_out = jnp.zeros((output_size,), jnp.float32)
    return {"hidden": hidden, "out": (w_out, b_out)}


def fold_params(tparams, eps=1e-5):
    """Fold eval-mode BN + Linear bias:  BN(Wx+b) = (scale*W)x + (scale*(b-mean)+beta).
    Weights are stored transposed (in, out) for the (batch, features) dataflow.
    Layer-1 weight stays f32 (VPU FMA path); layers 2-4 are pre-cast to bf16
    (MXU operands). Biases stay f32 as (1, out) rows."""
    folded = []
    for (w, b, gamma, beta, rmean, rvar) in tparams["hidden"]:
        scale = gamma / jnp.sqrt(rvar + eps)
        folded.append(((w * scale[:, None]).T,
                       ((b - rmean) * scale + beta).reshape(1, -1)))
    w_out, b_out = tparams["out"]
    folded.append((w_out.T, b_out.reshape(1, -1)))

    kparams = []
    for i, (w, b) in enumerate(folded):
        w = w.astype(jnp.float32 if i == 0 else jnp.bfloat16)
        kparams.extend([w, b.astype(jnp.float32)])
    return tuple(kparams)


# ----------------------------------------------------------------------------
# Pure-JAX f32 reference (unfolded) for correctness checking.
# ----------------------------------------------------------------------------
def reference_forward(x, tparams, eps=1e-5):
    h = x
    for (w, b, gamma, beta, rmean, rvar) in tparams["hidden"]:
        y = h @ w.T + b
        y = (y - rmean) / jnp.sqrt(rvar + eps) * gamma + beta
        h = jnp.maximum(y, 0.0)            # Dropout is identity in eval mode
    w_out, b_out = tparams["out"]
    out = h @ w_out.T + b_out
    modal = jnp.maximum(out[:, 0], 0.0)
    profit = out[:, 1]
    rugi = jnp.maximum(out[:, 2], 0.0)
    return jnp.stack([modal, profit, rugi], axis=1)


if __name__ == "__main__":
    key = jax.random.PRNGKey(0)
    k_x, k_p = jax.random.split(key)

    B, IN = 2048, 3
    x = jax.random.normal(k_x, (B, IN), jnp.float32)
    tparams = make_torch_params(k_p, input_size=IN,
                                hidden_sizes=(128, 64, 32), output_size=3)
    kparams = fold_params(tparams)

    # Small demo: block_b=1024 -> grid of 2 batch tiles, 2 row-chunks per tile
    # (production default block_b=8192 amortizes per-step overhead further).
    fwd = jax.jit(functools.partial(business_mlp_forward, kparams=kparams,
                                    block_b=1024))
    out = fwd(x)
    jax.block_until_ready(out)

    ref = reference_forward(x, tparams)
    assert out.shape == (B, 3)
    # bf16 MXU operands -> loosened tolerance vs. the strict f32 reference.
    assert jnp.allclose(out, ref, atol=5e-2, rtol=5e-2), "mismatch vs reference"

    print("KERNEL_OK")
</pallas_src>

<mosaic_0001>
module attributes {stable_mosaic.version = 11 : i64} {
  func.func @_mlp_kernel(%arg0: i32, %arg1: memref<1024x3xf32, #tpu.memory_space<vmem>>, %arg2: memref<3x128xf32, #tpu.memory_space<vmem>>, %arg3: memref<1x128xf32, #tpu.memory_space<vmem>>, %arg4: memref<128x64xbf16, #tpu.memory_space<vmem>>, %arg5: memref<1x64xf32, #tpu.memory_space<vmem>>, %arg6: memref<64x32xbf16, #tpu.memory_space<vmem>>, %arg7: memref<1x32xf32, #tpu.memory_space<vmem>>, %arg8: memref<32x3xbf16, #tpu.memory_space<vmem>>, %arg9: memref<1x3xf32, #tpu.memory_space<vmem>>, %arg10: memref<1024x3xf32, #tpu.memory_space<vmem>>) attributes {dimension_semantics = [#tpu.dimension_semantics<parallel>], iteration_bounds = array<i64: 2>, scalar_prefetch = 0 : i64, scratch_operands = 0 : i64, tpu.core_type = #tpu.core_type<tc>, window_params = [{transform_indices = @transform_0, window_bounds = array<i64: 1024, 3>}, {pipeline_mode = #tpu.pipeline_mode<synchronous>, transform_indices = @transform_1, window_bounds = array<i64: 3, 128>}, {pipeline_mode = #tpu.pipeline_mode<synchronous>, transform_indices = @transform_2, window_bounds = array<i64: 1, 128>}, {pipeline_mode = #tpu.pipeline_mode<synchronous>, transform_indices = @transform_3, window_bounds = array<i64: 128, 64>}, {pipeline_mode = #tpu.pipeline_mode<synchronous>, transform_indices = @transform_4, window_bounds = array<i64: 1, 64>}, {pipeline_mode = #tpu.pipeline_mode<synchronous>, transform_indices = @transform_5, window_bounds = array<i64: 64, 32>}, {pipeline_mode = #tpu.pipeline_mode<synchronous>, transform_indices = @transform_6, window_bounds = array<i64: 1, 32>}, {pipeline_mode = #tpu.pipeline_mode<synchronous>, transform_indices = @transform_7, window_bounds = array<i64: 32, 3>}, {pipeline_mode = #tpu.pipeline_mode<synchronous>, transform_indices = @transform_8, window_bounds = array<i64: 1, 3>}, {transform_indices = @transform_9, window_bounds = array<i64: 1024, 3>}]} {
    %0 = tpu.iota {dimensions = array<i32: 1>} : vector<512x3xi32>
    %c1_i32 = arith.constant 1 : i32
    %1 = vector.broadcast %c1_i32 : i32 to vector<512x3xi32>
    %2 = arith.cmpi eq, %0, %1 : vector<512x3xi32>
    %c0 = arith.constant 0 : index
    %c0_0 = arith.constant 0 : index
    %3 = vector.load %arg2[%c0, %c0_0] : memref<3x128xf32, #tpu.memory_space<vmem>>, vector<3x128xf32>
    %c0_1 = arith.constant 0 : index
    %c0_2 = arith.constant 0 : index
    %4 = vector.load %arg3[%c0_1, %c0_2] : memref<1x128xf32, #tpu.memory_space<vmem>>, vector<1x128xf32>
    %c0_i32 = arith.constant 0 : i32
    %c512_i32 = arith.constant 512 : i32
    %5 = arith.muli %c0_i32, %c512_i32 : i32
    %6 = tpu.assume_multiple %5, 512 : i32
    %7 = arith.index_cast %6 : i32 to index
    %c0_3 = arith.constant 0 : index
    %8 = vector.load %arg1[%7, %c0_3] : memref<1024x3xf32, #tpu.memory_space<vmem>>, vector<512x3xf32>
    %9 = vector.extract_strided_slice %8 {offsets = [0, 0], sizes = [512, 1], strides = [1, 1]} : vector<512x3xf32> to vector<512x1xf32>
    %10 = vector.extract_strided_slice %3 {offsets = [0, 0], sizes = [1, 128], strides = [1, 1]} : vector<3x128xf32> to vector<1x128xf32>
    %11 = vector.broadcast %9 : vector<512x1xf32> to vector<512x128xf32>
    %12 = vector.broadcast %10 : vector<1x128xf32> to vector<512x128xf32>
    %13 = arith.mulf %11, %12 : vector<512x128xf32>
    %14 = vector.extract_strided_slice %8 {offsets = [0, 1], sizes = [512, 1], strides = [1, 1]} : vector<512x3xf32> to vector<512x1xf32>
    %15 = vector.extract_strided_slice %3 {offsets = [1, 0], sizes = [1, 128], strides = [1, 1]} : vector<3x128xf32> to vector<1x128xf32>
    %16 = vector.broadcast %14 : vector<512x1xf32> to vector<512x128xf32>
    %17 = vector.broadcast %15 : vector<1x128xf32> to vector<512x128xf32>
    %18 = arith.mulf %16, %17 : vector<512x128xf32>
    %19 = arith.addf %13, %18 : vector<512x128xf32>
    %20 = vector.extract_strided_slice %8 {offsets = [0, 2], sizes = [512, 1], strides = [1, 1]} : vector<512x3xf32> to vector<512x1xf32>
    %21 = vector.extract_strided_slice %3 {offsets = [2, 0], sizes = [1, 128], strides = [1, 1]} : vector<3x128xf32> to vector<1x128xf32>
    %22 = vector.broadcast %20 : vector<512x1xf32> to vector<512x128xf32>
    %23 = vector.broadcast %21 : vector<1x128xf32> to vector<512x128xf32>
    %24 = arith.mulf %22, %23 : vector<512x128xf32>
    %25 = arith.addf %19, %24 : vector<512x128xf32>
    %26 = vector.broadcast %4 : vector<1x128xf32> to vector<512x128xf32>
    %27 = arith.addf %25, %26 : vector<512x128xf32>
    %cst = arith.constant 0.000000e+00 : f32
    %28 = vector.broadcast %cst : f32 to vector<512x128xf32>
    %29 = arith.maximumf %27, %28 : vector<512x128xf32>
    %30 = arith.truncf %29 : vector<512x128xf32> to vector<512x128xbf16>
    %c0_4 = arith.constant 0 : index
    %c0_5 = arith.constant 0 : index
    %31 = vector.load %arg4[%c0_4, %c0_5] : memref<128x64xbf16, #tpu.memory_space<vmem>>, vector<128x64xbf16>
    %cst_6 = arith.constant dense<0.000000e+00> : vector<512x64xf32>
    %32 = tpu.matmul %30, %31, %cst_6 {dimension_numbers = #tpu.dot_dimension_numbers<[1], [0], [0], [1], [0, 0, 1, 1], [], []>} : vector<512x128xbf16>, vector<128x64xbf16>, vector<512x64xf32> -> vector<512x64xf32>
    %c0_7 = arith.constant 0 : index
    %c0_8 = arith.constant 0 : index
    %33 = vector.load %arg5[%c0_7, %c0_8] : memref<1x64xf32, #tpu.memory_space<vmem>>, vector<1x64xf32>
    %34 = vector.broadcast %33 : vector<1x64xf32> to vector<512x64xf32>
    %35 = arith.addf %32, %34 : vector<512x64xf32>
    %cst_9 = arith.constant 0.000000e+00 : f32
    %36 = vector.broadcast %cst_9 : f32 to vector<512x64xf32>
    %37 = arith.maximumf %35, %36 : vector<512x64xf32>
    %38 = arith.truncf %37 : vector<512x64xf32> to vector<512x64xbf16>
    %c0_10 = arith.constant 0 : index
    %c0_11 = arith.constant 0 : index
    %39 = vector.load %arg6[%c0_10, %c0_11] : memref<64x32xbf16, #tpu.memory_space<vmem>>, vector<64x32xbf16>
    %cst_12 = arith.constant dense<0.000000e+00> : vector<512x32xf32>
    %40 = tpu.matmul %38, %39, %cst_12 {dimension_numbers = #tpu.dot_dimension_numbers<[1], [0], [0], [1], [0, 0, 1, 1], [], []>} : vector<512x64xbf16>, vector<64x32xbf16>, vector<512x32xf32> -> vector<512x32xf32>
    %c0_13 = arith.constant 0 : index
    %c0_14 = arith.constant 0 : index
    %41 = vector.load %arg7[%c0_13, %c0_14] : memref<1x32xf32, #tpu.memory_space<vmem>>, vector<1x32xf32>
    %42 = vector.broadcast %41 : vector<1x32xf32> to vector<512x32xf32>
    %43 = arith.addf %40, %42 : vector<512x32xf32>
    %cst_15 = arith.constant 0.000000e+00 : f32
    %44 = vector.broadcast %cst_15 : f32 to vector<512x32xf32>
    %45 = arith.maximumf %43, %44 : vector<512x32xf32>
    %46 = arith.truncf %45 : vector<512x32xf32> to vector<512x32xbf16>
    %c0_16 = arith.constant 0 : index
    %c0_17 = arith.constant 0 : index
    %47 = vector.load %arg8[%c0_16, %c0_17] : memref<32x3xbf16, #tpu.memory_space<vmem>>, vector<32x3xbf16>
    %cst_18 = arith.constant dense<0.000000e+00> : vector<512x3xf32>
    %48 = tpu.matmul %46, %47, %cst_18 {dimension_numbers = #tpu.dot_dimension_numbers<[1], [0], [0], [1], [0, 0, 1, 1], [], []>} : vector<512x32xbf16>, vector<32x3xbf16>, vector<512x3xf32> -> vector<512x3xf32>
    %c0_19 = arith.constant 0 : index
    %c0_20 = arith.constant 0 : index
    %49 = vector.load %arg9[%c0_19, %c0_20] : memref<1x3xf32, #tpu.memory_space<vmem>>, vector<1x3xf32>
    %50 = vector.broadcast %49 : vector<1x3xf32> to vector<512x3xf32>
    %51 = arith.addf %48, %50 : vector<512x3xf32>
    %cst_21 = arith.constant 0.000000e+00 : f32
    %52 = vector.broadcast %cst_21 : f32 to vector<512x3xf32>
    %53 = arith.maximumf %51, %52 : vector<512x3xf32>
    %54 = arith.select %2, %51, %53 : vector<512x3xi1>, vector<512x3xf32>
    %55 = arith.index_cast %6 : i32 to index
    %c0_22 = arith.constant 0 : index
    %56 = vector.load %arg10[%55, %c0_22] : memref<1024x3xf32, #tpu.memory_space<vmem>>, vector<512x3xf32>
    tpu.vector_store %arg10[%55, %c0_22], %54 {strides = array<i32>} : memref<1024x3xf32, #tpu.memory_space<vmem>>, vector<512x3xf32>,
    %c1_i32_23 = arith.constant 1 : i32
    %c512_i32_24 = arith.constant 512 : i32
    %57 = arith.muli %c1_i32_23, %c512_i32_24 : i32
    %58 = tpu.assume_multiple %57, 512 : i32
    %59 = arith.index_cast %58 : i32 to index
    %c0_25 = arith.constant 0 : index
    %60 = vector.load %arg1[%59, %c0_25] : memref<1024x3xf32, #tpu.memory_space<vmem>>, vector<512x3xf32>
    %61 = vector.extract_strided_slice %60 {offsets = [0, 0], sizes = [512, 1], strides = [1, 1]} : vector<512x3xf32> to vector<512x1xf32>
    %62 = vector.extract_strided_slice %3 {offsets = [0, 0], sizes = [1, 128], strides = [1, 1]} : vector<3x128xf32> to vector<1x128xf32>
    %63 = vector.broadcast %61 : vector<512x1xf32> to vector<512x128xf32>
    %64 = vector.broadcast %62 : vector<1x128xf32> to vector<512x128xf32>
    %65 = arith.mulf %63, %64 : vector<512x128xf32>
    %66 = vector.extract_strided_slice %60 {offsets = [0, 1], sizes = [512, 1], strides = [1, 1]} : vector<512x3xf32> to vector<512x1xf32>
    %67 = vector.extract_strided_slice %3 {offsets = [1, 0], sizes = [1, 128], strides = [1, 1]} : vector<3x128xf32> to vector<1x128xf32>
    %68 = vector.broadcast %66 : vector<512x1xf32> to vector<512x128xf32>
    %69 = vector.broadcast %67 : vector<1x128xf32> to vector<512x128xf32>
    %70 = arith.mulf %68, %69 : vector<512x128xf32>
    %71 = arith.addf %65, %70 : vector<512x128xf32>
    %72 = vector.extract_strided_slice %60 {offsets = [0, 2], sizes = [512, 1], strides = [1, 1]} : vector<512x3xf32> to vector<512x1xf32>
    %73 = vector.extract_strided_slice %3 {offsets = [2, 0], sizes = [1, 128], strides = [1, 1]} : vector<3x128xf32> to vector<1x128xf32>
    %74 = vector.broadcast %72 : vector<512x1xf32> to vector<512x128xf32>
    %75 = vector.broadcast %73 : vector<1x128xf32> to vector<512x128xf32>
    %76 = arith.mulf %74, %75 : vector<512x128xf32>
    %77 = arith.addf %71, %76 : vector<512x128xf32>
    %78 = vector.broadcast %4 : vector<1x128xf32> to vector<512x128xf32>
    %79 = arith.addf %77, %78 : vector<512x128xf32>
    %cst_26 = arith.constant 0.000000e+00 : f32
    %80 = vector.broadcast %cst_26 : f32 to vector<512x128xf32>
    %81 = arith.maximumf %79, %80 : vector<512x128xf32>
    %82 = arith.truncf %81 : vector<512x128xf32> to vector<512x128xbf16>
    %c0_27 = arith.constant 0 : index
    %c0_28 = arith.constant 0 : index
    %83 = vector.load %arg4[%c0_27, %c0_28] : memref<128x64xbf16, #tpu.memory_space<vmem>>, vector<128x64xbf16>
    %cst_29 = arith.constant dense<0.000000e+00> : vector<512x64xf32>
    %84 = tpu.matmul %82, %83, %cst_29 {dimension_numbers = #tpu.dot_dimension_numbers<[1], [0], [0], [1], [0, 0, 1, 1], [], []>} : vector<512x128xbf16>, vector<128x64xbf16>, vector<512x64xf32> -> vector<512x64xf32>
    %c0_30 = arith.constant 0 : index
    %c0_31 = arith.constant 0 : index
    %85 = vector.load %arg5[%c0_30, %c0_31] : memref<1x64xf32, #tpu.memory_space<vmem>>, vector<1x64xf32>
    %86 = vector.broadcast %85 : vector<1x64xf32> to vector<512x64xf32>
    %87 = arith.addf %84, %86 : vector<512x64xf32>
    %cst_32 = arith.constant 0.000000e+00 : f32
    %88 = vector.broadcast %cst_32 : f32 to vector<512x64xf32>
    %89 = arith.maximumf %87, %88 : vector<512x64xf32>
    %90 = arith.truncf %89 : vector<512x64xf32> to vector<512x64xbf16>
    %c0_33 = arith.constant 0 : index
    %c0_34 = arith.constant 0 : index
    %91 = vector.load %arg6[%c0_33, %c0_34] : memref<64x32xbf16, #tpu.memory_space<vmem>>, vector<64x32xbf16>
    %cst_35 = arith.constant dense<0.000000e+00> : vector<512x32xf32>
    %92 = tpu.matmul %90, %91, %cst_35 {dimension_numbers = #tpu.dot_dimension_numbers<[1], [0], [0], [1], [0, 0, 1, 1], [], []>} : vector<512x64xbf16>, vector<64x32xbf16>, vector<512x32xf32> -> vector<512x32xf32>
    %c0_36 = arith.constant 0 : index
    %c0_37 = arith.constant 0 : index
    %93 = vector.load %arg7[%c0_36, %c0_37] : memref<1x32xf32, #tpu.memory_space<vmem>>, vector<1x32xf32>
    %94 = vector.broadcast %93 : vector<1x32xf32> to vector<512x32xf32>
    %95 = arith.addf %92, %94 : vector<512x32xf32>
    %cst_38 = arith.constant 0.000000e+00 : f32
    %96 = vector.broadcast %cst_38 : f32 to vector<512x32xf32>
    %97 = arith.maximumf %95, %96 : vector<512x32xf32>
    %98 = arith.truncf %97 : vector<512x32xf32> to vector<512x32xbf16>
    %c0_39 = arith.constant 0 : index
    %c0_40 = arith.constant 0 : index
    %99 = vector.load %arg8[%c0_39, %c0_40] : memref<32x3xbf16, #tpu.memory_space<vmem>>, vector<32x3xbf16>
    %cst_41 = arith.constant dense<0.000000e+00> : vector<512x3xf32>
    %100 = tpu.matmul %98, %99, %cst_41 {dimension_numbers = #tpu.dot_dimension_numbers<[1], [0], [0], [1], [0, 0, 1, 1], [], []>} : vector<512x32xbf16>, vector<32x3xbf16>, vector<512x3xf32> -> vector<512x3xf32>
    %c0_42 = arith.constant 0 : index
    %c0_43 = arith.constant 0 : index
    %101 = vector.load %arg9[%c0_42, %c0_43] : memref<1x3xf32, #tpu.memory_space<vmem>>, vector<1x3xf32>
    %102 = vector.broadcast %101 : vector<1x3xf32> to vector<512x3xf32>
    %103 = arith.addf %100, %102 : vector<512x3xf32>
    %cst_44 = arith.constant 0.000000e+00 : f32
    %104 = vector.broadcast %cst_44 : f32 to vector<512x3xf32>
    %105 = arith.maximumf %103, %104 : vector<512x3xf32>
    %106 = arith.select %2, %103, %105 : vector<512x3xi1>, vector<512x3xf32>
    %107 = arith.index_cast %58 : i32 to index
    %c0_45 = arith.constant 0 : index
    %108 = vector.load %arg10[%107, %c0_45] : memref<1024x3xf32, #tpu.memory_space<vmem>>, vector<512x3xf32>
    tpu.vector_store %arg10[%107, %c0_45], %106 {strides = array<i32>} : memref<1024x3xf32, #tpu.memory_space<vmem>>, vector<512x3xf32>,
    %c2_i32 = arith.constant 2 : i32
    return
  }
  func.func @transform_0(%arg0: i32) -> (i32, i32) {
    %c0_i32 = arith.constant 0 : i32
    %c0_i32_0 = arith.constant 0 : i32
    return %arg0, %c0_i32 : i32, i32
  }
  func.func @transform_1(%arg0: i32) -> (i32, i32) {
    %c0_i32 = arith.constant 0 : i32
    %c0_i32_0 = arith.constant 0 : i32
    %c0_i32_1 = arith.constant 0 : i32
    return %c0_i32, %c0_i32_0 : i32, i32
  }
  func.func @transform_2(%arg0: i32) -> (i32, i32) {
    %c0_i32 = arith.constant 0 : i32
    %c0_i32_0 = arith.constant 0 : i32
    %c0_i32_1 = arith.constant 0 : i32
    return %c0_i32, %c0_i32_0 : i32, i32
  }
  func.func @transform_3(%arg0: i32) -> (i32, i32) {
    %c0_i32 = arith.constant 0 : i32
    %c0_i32_0 = arith.constant 0 : i32
    %c0_i32_1 = arith.constant 0 : i32
    return %c0_i32, %c0_i32_0 : i32, i32
  }
  func.func @transform_4(%arg0: i32) -> (i32, i32) {
    %c0_i32 = arith.constant 0 : i32
    %c0_i32_0 = arith.constant 0 : i32
    %c0_i32_1 = arith.constant 0 : i32
    return %c0_i32, %c0_i32_0 : i32, i32
  }
  func.func @transform_5(%arg0: i32) -> (i32, i32) {
    %c0_i32 = arith.constant 0 : i32
    %c0_i32_0 = arith.constant 0 : i32
    %c0_i32_1 = arith.constant 0 : i32
    return %c0_i32, %c0_i32_0 : i32, i32
  }
  func.func @transform_6(%arg0: i32) -> (i32, i32) {
    %c0_i32 = arith.constant 0 : i32
    %c0_i32_0 = arith.constant 0 : i32
    %c0_i32_1 = arith.constant 0 : i32
    return %c0_i32, %c0_i32_0 : i32, i32
  }
  func.func @transform_7(%arg0: i32) -> (i32, i32) {
    %c0_i32 = arith.constant 0 : i32
    %c0_i32_0 = arith.constant 0 : i32
    %c0_i32_1 = arith.constant 0 : i32
    return %c0_i32, %c0_i32_0 : i32, i32
  }
  func.func @transform_8(%arg0: i32) -> (i32, i32) {
    %c0_i32 = arith.constant 0 : i32
    %c0_i32_0 = arith.constant 0 : i32
    %c0_i32_1 = arith.constant 0 : i32
    return %c0_i32, %c0_i32_0 : i32, i32
  }
  func.func @transform_9(%arg0: i32) -> (i32, i32) {
    %c0_i32 = arith.constant 0 : i32
    %c0_i32_0 = arith.constant 0 : i32
    return %arg0, %c0_i32 : i32, i32
  }
}

</mosaic_0001>

<bundles_post_ra>
// kernel: business_mlp_forward.1
= control target key start
LH: loop header
LB: loop body
LE: loop exit
PB: predicated region body
PF: predicated region fallthrough
CT: control target
= control target key end

     0   :  { %s7576_s30 = smov 0   ;;  %s10727_s0 = inlined_call_operand.vmem [shape: f32[2048,3], index: 0, kind: input, shape index: {}]   ;;  %s10728_s1 = inlined_call_operand.vmem [shape: f32[3,128], index: 1, kind: input, shape index: {}]   ;;  %s10729_s2 = inlined_call_operand.vmem [shape: f32[1,128], index: 2, kind: input, shape index: {}]   ;;  %s10730_s3 = inlined_call_operand.vmem [shape: bf16[128,64], index: 3, kind: input, shape index: {}]   ;;  %s10731_s4 = inlined_call_operand.vmem [shape: f32[1,64], index: 4, kind: input, shape index: {}]   ;;  %s10732_s5 = inlined_call_operand.vmem [shape: bf16[64,32], index: 5, kind: input, shape index: {}]   ;;  %s10733_s6 = inlined_call_operand.vmem [shape: f32[1,32], index: 6, kind: input, shape index: {}]   ;;  %s10734_s7 = inlined_call_operand.vmem [shape: bf16[32,3], index: 7, kind: input, shape index: {}]   ;;  %s10735_s8 = inlined_call_operand.vmem [shape: f32[1,3], index: 8, kind: input, shape index: {}]   ;;  %s10736_s9 = inlined_call_operand.vmem [shape: f32[2048,3], index: 9, kind: output, shape index: {}]  }
   0x1 LB: > { %s6325_s10 = sadd.s32 4294967295, %s7521_s30   ;;  %p6329_p0 = scmp.ge.s32.totalorder %s7521_s30, 1  ;;  %s7521_s30 = sphi %s7576_s30, %s19_s30  }
   0x2   : > { %p288_p1 = scmp.lt.s32.totalorder %s7521_s30, 3 }
   0x4   : > { %p289_p2 = pnand %p6329_p0, %p288_p1 }
   0x6   : > { %292 = sbr.rel (%p289_p2) target bundleno = 1841 (0x731), region = 56 }
   0xd   : > { %s6330_s11 = sshll.u32 %s6325_s10, 7  ;;  %v10737_v0 = vmov 0   ;;  %vm2231_vm0 = vcmask 523264   ;;  %vm2736_vm1 = vcmask 261120   ;;  %vm3250_vm3 = vcmask 23552  }
   0xe   : > { %7303 = vset.pattern.permute.xlu1 %v10737_v0  ;;  %7302 = vset.pattern.permute.xlu0 %v10737_v0  ;;  %p325_p3 = scmp.lt.s32.totalorder %s6330_s11, 255 }
  0x10   : > { %s10891_s11 = smov (!%p325_p3, %s6330_s11), 255 }
  0x11   : > { %s6331_s12 = sshll.u32 %s10891_s11, 3 }
  0x12   : > { %s7594_s15 = scalar_lea.vmem %s10727_s0, %s6331_s12  ;;  %s9785_s25 = scalar_lea.vmem %s10736_s9, %s6331_s12 }
  0x13   : > { %v7597_v1 = vld [vmem:[%s7594_s15 + $0x10] sm:$0xff]  ;;  %v7600_v2 = vld [vmem:[%s7594_s15] sm:$0xff]  ;;  %v7605_v3 = vld [vmem:[%s7594_s15 + $0x18] sm:$0xff] }
  0x14   : > { %418 = vperm.xlu1 %7303, %v7597_v1   ;;  %408 = vperm.xlu0 %7302, %v7600_v2   ;;  %v7608_v4 = vld [vmem:[%s7594_s15 + $0x8] sm:$0xff]  ;;  %v7616_v6 = vld [vmem:[%s7594_s15 + $0x20] sm:$0xff]  ;;  %v7621_v7 = vld [vmem:[%s7594_s15 + $0x38] sm:$0xff] }
  0x15   : > { %v7613_v5 = vld [vmem:[%s7594_s15 + $0x28] sm:$0xff]  ;;  %v7624_v8 = vld [vmem:[%s7594_s15 + $0x30] sm:$0xff]  ;;  %v7632_v10 = vld [vmem:[%s7594_s15 + $0x40] sm:$0xff] }
  0x16   : > { %v7629_v9 = vld [vmem:[%s7594_s15 + $0x48] sm:$0xff]  ;;  %v7637_v11 = vld [vmem:[%s7594_s15 + $0x58] sm:$0xff]  ;;  %v7640_v12 = vld [vmem:[%s7594_s15 + $0x50] sm:$0xff] }
  0x17   : > { %v7643_v13 = vld [vmem:[%s7594_s15 + $0x68] sm:$0xff]  ;;  %v7648_v14 = vld [vmem:[%s7594_s15 + $0x60] sm:$0xff]  ;;  %v7651_v15 = vld [vmem:[%s7594_s15 + $0x78] sm:$0xff] }
  0x18   : > { %423 = vperm.xlu1 %7303, %v7605_v3   ;;  %413 = vperm.xlu0 %7302, %v7608_v4   ;;  %v7654_v16 = vld [vmem:[%s7594_s15 + $0x70] sm:$0xff]  ;;  %v7659_v17 = vld [vmem:[%s7594_s15 + $0x88] sm:$0xff]  ;;  %v7662_v18 = vld [vmem:[%s7594_s15 + $0x80] sm:$0xff] }
  0x19   : > { %v7667_v19 = vld [vmem:[%s7594_s15 + $0x98] sm:$0xff]  ;;  %v7670_v20 = vld [vmem:[%s7594_s15 + $0x90] sm:$0xff]  ;;  %v7677_v21 = vld [vmem:[%s7594_s15 + $0xa8] sm:$0xff] }
  0x1a   : > { %v7680_v22 = vld [vmem:[%s7594_s15 + $0xa0] sm:$0xff]  ;;  %v7685_v23 = vld [vmem:[%s7594_s15 + $0xb8] sm:$0xff]  ;;  %v7688_v24 = vld [vmem:[%s7594_s15 + $0xb0] sm:$0xff] }
  0x1b   : > { %v7693_v25 = vld [vmem:[%s7594_s15 + $0xc8] sm:$0xff]  ;;  %v7696_v26 = vld [vmem:[%s7594_s15 + $0xc0] sm:$0xff]  ;;  %v7701_v27 = vld [vmem:[%s7594_s15 + $0xd8] sm:$0xff] }
  0x1c   : > { %433 = vperm.xlu1 %7303, %v7613_v5   ;;  %428 = vperm.xlu0 %7302, %v7616_v6   ;;  %v7704_v28 = vld [vmem:[%s7594_s15 + $0xd0] sm:$0xff]  ;;  %v7709_v29 = vld [vmem:[%s7594_s15 + $0xe8] sm:$0xff]  ;;  %v7712_v30 = vld [vmem:[%s7594_s15 + $0xe0] sm:$0xff] }
  0x1d   : > { %v7717_v31 = vld [vmem:[%s7594_s15 + $0xf8] sm:$0xff]  ;;  %v7720_v32 = vld [vmem:[%s7594_s15 + $0xf0] sm:$0xff]  ;;  %v7725_v33 = vld [vmem:[%s7594_s15 + $0x108] sm:$0xff] }
  0x1e   : > { %v7728_v34 = vld [vmem:[%s7594_s15 + $0x100] sm:$0xff]  ;;  %v7733_v35 = vld [vmem:[%s7594_s15 + $0x118] sm:$0xff]  ;;  %v7736_v36 = vld [vmem:[%s7594_s15 + $0x110] sm:$0xff] }
  0x1f   : > { %v7741_v37 = vld [vmem:[%s7594_s15 + $0x128] sm:$0xff]  ;;  %v7744_v38 = vld [vmem:[%s7594_s15 + $0x120] sm:$0xff]  ;;  %v7749_v39 = vld [vmem:[%s7594_s15 + $0x138] sm:$0xff] }
  0x20   : > { %443 = vperm.xlu1 %7303, %v7621_v7   ;;  %438 = vperm.xlu0 %7302, %v7624_v8   ;;  %v7752_v40 = vld [vmem:[%s7594_s15 + $0x130] sm:$0xff]  ;;  %v7757_v41 = vld [vmem:[%s7594_s15 + $0x148] sm:$0xff]  ;;  %v7760_v42 = vld [vmem:[%s7594_s15 + $0x140] sm:$0xff] }
  0x21   : > { %v7765_v43 = vld [vmem:[%s7594_s15 + $0x158] sm:$0xff]  ;;  %v7768_v44 = vld [vmem:[%s7594_s15 + $0x150] sm:$0xff]  ;;  %v7773_v45 = vld [vmem:[%s7594_s15 + $0x168] sm:$0xff] }
  0x22   : > { %10749 = vst [vmem:[#allocation2_spill] sm:$0xff] %v7768_v44  ;;  %v7776_v46 = vld [vmem:[%s7594_s15 + $0x160] sm:$0xff]  ;;  %v7781_v47 = vld [vmem:[%s7594_s15 + $0x178] sm:$0xff]  ;;  %v7784_v48 = vld [vmem:[%s7594_s15 + $0x170] sm:$0xff] }
  0x23   : > { %10750 = vst [vmem:[#allocation3_spill] sm:$0xff] %v7784_v48  ;;  %v7789_v49 = vld [vmem:[%s7594_s15 + $0x188] sm:$0xff]  ;;  %v7792_v50 = vld [vmem:[%s7594_s15 + $0x180] sm:$0xff]  ;;  %v7797_v51 = vld [vmem:[%s7594_s15 + $0x198] sm:$0xff] }
  0x24   : > { %453 = vperm.xlu1 %7303, %v7629_v9   ;;  %448 = vperm.xlu0 %7302, %v7632_v10   ;;  %v392_v52 = vld [vmem:[%s7594_s15 + $0x190] sm:$0xff]  ;;  %v7802_v53 = vld [vmem:[%s7594_s15 + $0x1a8] sm:$0xff]  ;;  %v7805_v54 = vld [vmem:[%s7594_s15 + $0x1a0] sm:$0xff] }
  0x25   : > { %v7810_v55 = vld [vmem:[%s7594_s15 + $0x1b8] sm:$0xff]  ;;  %v396_v56 = vld [vmem:[%s7594_s15 + $0x1b0] sm:$0xff]  ;;  %v7815_v57 = vld [vmem:[%s7594_s15 + $0x1c8] sm:$0xff] }
  0x26   : > { %v7818_v58 = vld [vmem:[%s7594_s15 + $0x1c0] sm:$0xff]  ;;  %v7823_v59 = vld [vmem:[%s7594_s15 + $0x1d8] sm:$0xff]  ;;  %v400_v60 = vld [vmem:[%s7594_s15 + $0x1d0] sm:$0xff] }
  0x27   : > { %v7828_v61 = vld [vmem:[%s7594_s15 + $0x1e8] sm:$0xff]  ;;  %v7831_v62 = vld [vmem:[%s7594_s15 + $0x1e0] sm:$0xff]  ;;  %v7836_v63 = vld [vmem:[%s7594_s15 + $0x1f8] sm:$0xff] }
  0x28   : > { %463 = vperm.xlu1 %7303, %v7637_v11   ;;  %458 = vperm.xlu0 %7302, %v7640_v12   ;;  %10751 = vst [vmem:[#allocation4_spill] sm:$0xff] %v7828_v61 }
  0x2c   : > { %473 = vperm.xlu1 %7303, %v7643_v13   ;;  %468 = vperm.xlu0 %7302, %v7648_v14  }
  0x30   : > { %483 = vperm.xlu1 %7303, %v7651_v15   ;;  %478 = vperm.xlu0 %7302, %v7654_v16  }
  0x34   : > { %493 = vperm.xlu1 %7303, %v7659_v17   ;;  %488 = vperm.xlu0 %7302, %v7662_v18  }
  0x38   : > { %503 = vperm.xlu1 %7303, %v7667_v19   ;;  %498 = vperm.xlu0 %7302, %v7670_v20  }
  0x3c   : > { %513 = vperm.xlu1 %7303, %v7677_v21   ;;  %508 = vperm.xlu0 %7302, %v7680_v22  }
  0x40   : > { %523 = vperm.xlu1 %7303, %v7685_v23   ;;  %518 = vperm.xlu0 %7302, %v7688_v24  }
  0x44   : > { %533 = vperm.xlu1 %7303, %v7693_v25   ;;  %528 = vperm.xlu0 %7302, %v7696_v26  }
  0x48   : > { %543 = vperm.xlu1 %7303, %v7701_v27   ;;  %538 = vperm.xlu0 %7302, %v7704_v28  }
  0x4c   : > { %553 = vperm.xlu1 %7303, %v7709_v29   ;;  %548 = vperm.xlu0 %7302, %v7712_v30  }
  0x50   : > { %563 = vperm.xlu1 %7303, %v7717_v31   ;;  %558 = vperm.xlu0 %7302, %v7720_v32  }
  0x54   : > { %573 = vperm.xlu1 %7303, %v7725_v33   ;;  %568 = vperm.xlu0 %7302, %v7728_v34  }
  0x58   : > { %583 = vperm.xlu1 %7303, %v7733_v35   ;;  %578 = vperm.xlu0 %7302, %v7736_v36  }
  0x5c   : > { %593 = vperm.xlu1 %7303, %v7741_v37   ;;  %588 = vperm.xlu0 %7302, %v7744_v38  }
  0x60   : > { %603 = vperm.xlu1 %7303, %v7749_v39   ;;  %598 = vperm.xlu0 %7302, %v7752_v40  }
  0x64   : > { %613 = vperm.xlu1 %7303, %v7757_v41   ;;  %608 = vperm.xlu0 %7302, %v7760_v42  }
  0x68   : > { %623 = vperm.xlu1 %7303, %v7765_v43   ;;  %618 = vperm.xlu0 %7302, %v7768_v44  }
  0x6c   : > { %633 = vperm.xlu1 %7303, %v7773_v45   ;;  %628 = vperm.xlu0 %7302, %v7776_v46  }
  0x70   : > { %643 = vperm.xlu1 %7303, %v7781_v47   ;;  %638 = vperm.xlu0 %7302, %v7784_v48   ;;  %v10744_v48 = vmov 1  }
  0x74   : > { %653 = vperm.xlu1 %7303, %v7789_v49   ;;  %648 = vperm.xlu0 %7302, %v7792_v50  }
  0x78   : > { %663 = vperm.xlu1 %7303, %v7797_v51   ;;  %658 = vperm.xlu0 %7302, %v392_v52   ;;  %v404_v52 = vld [vmem:[%s7594_s15 + $0x1f0] sm:$0xff] }
  0x7c   : > { %673 = vperm.xlu1 %7303, %v7802_v53   ;;  %668 = vperm.xlu0 %7302, %v7805_v54  }
  0x80   : > { %683 = vperm.xlu1 %7303, %v7810_v55   ;;  %678 = vperm.xlu0 %7302, %v396_v56  }
  0x84   : > { %693 = vperm.xlu1 %7303, %v7815_v57   ;;  %688 = vperm.xlu0 %7302, %v7818_v58  }
  0x88   : > { %703 = vperm.xlu1 %7303, %v7823_v59   ;;  %698 = vperm.xlu0 %7302, %v400_v60   ;;  %v10746_v60 = vmov 2  }
  0x8c   : > { %713 = vperm.xlu1 %7303, %v7828_v61   ;;  %708 = vperm.xlu0 %7302, %v7831_v62  }
  0x90   : > { %723 = vperm.xlu1 %7303, %v7836_v63   ;;  %718 = vperm.xlu0 %7302, %v404_v52  }
  0x93   : > { %v7840_v56 = vpop.permute.xlu1 %418  ;;  %v7842_v0 = vpop.permute.xlu0 %408 }
  0x94   : > { %10752 = vst [vmem:[#allocation5_spill] sm:$0xff] %v7840_v56  ;;  %7304 = vset.pattern.permute.xlu1 %v10744_v48  ;;  %7306 = vset.pattern.permute.xlu0 %v10746_v60 }
  0x95   : > { %799 = vperm.xlu1 %7304, %v7608_v4   ;;  %1187 = vperm.xlu0 %7306, %v7608_v4  }
  0x97   : > { %v7848_v44 = vpop.permute.xlu1 %423  ;;  %v7850_v61 = vpop.permute.xlu0 %413 }
  0x98   : > { %10753 = vst [vmem:[#allocation6_spill] sm:$0xff] %v7848_v44 }
  0x99   : > { %803 = vperm.xlu1 %7304, %v7597_v1   ;;  %1199 = vperm.xlu0 %7306, %v7616_v6  }
  0x9b   : > { %v7854_v52 = vpop.permute.xlu1 %433  ;;  %v7856_v56 = vpop.permute.xlu0 %428 }
  0x9c   : > { %10754 = vst [vmem:[#allocation7_spill] sm:$0xff] %v7854_v52 }
  0x9d   : > { %811 = vperm.xlu1 %7304, %v7616_v6   ;;  %1207 = vperm.xlu0 %7306, %v7624_v8  }
  0x9f   : > { %v7860_v48 = vpop.permute.xlu1 %443  ;;  %v7862_v60 = vpop.permute.xlu0 %438 }
  0xa0   : > { %10755 = vst [vmem:[#allocation8_spill] sm:$0xff] %v7860_v48 }
  0xa1   : > { %819 = vperm.xlu1 %7304, %v7624_v8   ;;  %1215 = vperm.xlu0 %7306, %v7632_v10  }
  0xa3   : > { %v7866_v4 = vpop.permute.xlu1 %453  ;;  %v7868_v44 = vpop.permute.xlu0 %448 }
  0xa4   : > { %10756 = vst [vmem:[#allocation9_spill] sm:$0xff] %v7866_v4 }
  0xa5   : > { %827 = vperm.xlu1 %7304, %v7632_v10   ;;  %1223 = vperm.xlu0 %7306, %v7640_v12  }
  0xa7   : > { %v7872_v52 = vpop.permute.xlu1 %463  ;;  %v7874_v6 = vpop.permute.xlu0 %458 }
  0xa8   : > { %10757 = vst [vmem:[#allocation10_spill] sm:$0xff] %v7872_v52 }
  0xa9   : > { %835 = vperm.xlu1 %7304, %v7640_v12   ;;  %1231 = vperm.xlu0 %7306, %v7648_v14  }
  0xab   : > { %v7878_v48 = vpop.permute.xlu1 %473  ;;  %v7880_v8 = vpop.permute.xlu0 %468 }
  0xac   : > { %10758 = vst [vmem:[#allocation11_spill] sm:$0xff] %v7878_v48  ;;  %10759 = vst [vmem:[#allocation12_spill] sm:$0xff] %v7880_v8  ;;  %v10765_v8 = vmov 2  }
  0xad   : > { %843 = vperm.xlu1 %7304, %v7648_v14   ;;  %1239 = vperm.xlu0 %7306, %v7654_v16  }
  0xaf   : > { %v7884_v4 = vpop.permute.xlu1 %483  ;;  %v7886_v10 = vpop.permute.xlu0 %478 }
  0xb0   : > { %10760 = vst [vmem:[#allocation13_spill] sm:$0xff] %v7884_v4 }
  0xb1   : > { %851 = vperm.xlu1 %7304, %v7654_v16   ;;  %1251 = vperm.xlu0 %7306, %v7659_v17  }
  0xb3   : > { %v7890_v52 = vpop.permute.xlu1 %493  ;;  %v7892_v12 = vpop.permute.xlu0 %488 }
  0xb4   : > { %10761 = vst [vmem:[#allocation14_spill] sm:$0xff] %v7890_v52  ;;  %10762 = vst [vmem:[#allocation15_spill] sm:$0xff] %v7892_v12 }
  0xb5   : > { %859 = vperm.xlu1 %7304, %v7662_v18   ;;  %1267 = vperm.xlu0 %7306, %v7677_v21  }
  0xb7   : > { %v7896_v48 = vpop.permute.xlu1 %503  ;;  %v7898_v14 = vpop.permute.xlu0 %498 }
  0xb8   : > { %10763 = vst [vmem:[#allocation16_spill] sm:$0xff] %v7896_v48  ;;  %10764 = vst [vmem:[#allocation17_spill] sm:$0xff] %v7898_v14 }
  0xb9   : > { %7305 = vset.pattern.permute.xlu1 %v10765_v8  ;;  %1283 = vperm.xlu0 %7306, %v7693_v25  }
  0xba   : > { %1183 = vperm.xlu1 %7305, %v7600_v2  }
  0xbb   : > { %v7903_v16 = vpop.permute.xlu1 %513  ;;  %v7905_v4 = vpop.permute.xlu0 %508 }
  0xbc   : > { %10766 = vst [vmem:[#allocation18_spill] sm:$0xff] %v7903_v16  ;;  %10767 = vst [vmem:[#allocation19_spill] sm:$0xff] %v7905_v4 }
  0xbd   : > { %1299 = vperm.xlu0 %7306, %v7709_v29  }
  0xbe   : > { %1191 = vperm.xlu1 %7305, %v7597_v1  }
  0xbf   : > { %v7909_v52 = vpop.permute.xlu1 %523  ;;  %v7911_v12 = vpop.permute.xlu0 %518 }
  0xc0   : > { %10768 = vst [vmem:[#allocation20_spill] sm:$0xff] %v7909_v52 }
  0xc1   : > { %1315 = vperm.xlu0 %7306, %v7725_v33  }
  0xc2   : > { %1195 = vperm.xlu1 %7305, %v7605_v3  }
  0xc3   : > { %v7915_v14 = vpop.permute.xlu1 %533  ;;  %v7917_v48 = vpop.permute.xlu0 %528 }
  0xc4   : > { %10769 = vst [vmem:[#allocation21_spill] sm:$0xff] %v7915_v14  ;;  %10770 = vst [vmem:[#allocation22_spill] sm:$0xff] %v7917_v48  ;;  %v7419_v48 = vld [vmem:[%s10730_s3] sm:$0xff]  }
  0xc5   : > { %1331 = vperm.xlu0 %7306, %v7741_v37   ;;  %6847 = vmatprep.subr.bf16.mxu0 %v7419_v48 }
  0xc6   : > { %1203 = vperm.xlu1 %7305, %v7613_v5   ;;  %6848 = vmatpush3.bf16.msra.mxu0 %v7419_v48 }
  0xc7   : > { %v7921_v4 = vpop.permute.xlu1 %543  ;;  %v7923_v16 = vpop.permute.xlu0 %538 }
  0xc8   : > { %10771 = vst [vmem:[#allocation23_spill] sm:$0xff] %v7921_v4  ;;  %10772 = vst [vmem:[#allocation24_spill] sm:$0xff] %v7923_v16 }
  0xc9   : > { %1347 = vperm.xlu0 %7306, %v7757_v41  }
  0xca   : > { %1211 = vperm.xlu1 %7305, %v7621_v7  }
  0xcb   : > { %v7927_v1 = vpop.permute.xlu1 %553  ;;  %v7929_v52 = vpop.permute.xlu0 %548 }
  0xcc   : > { %10773 = vst [vmem:[#allocation25_spill] sm:$0xff] %v7927_v1  ;;  %10774 = vst [vmem:[#allocation26_spill] sm:$0xff] %v7929_v52  ;;  %v7420_v1 = vld [vmem:[%s10730_s3 + $0x8] sm:$0xff]  }
  0xcd   : > { %1363 = vperm.xlu0 %7306, %v7773_v45   ;;  %6849 = vmatprep.subr.bf16.mxu0 %v7420_v1 }
  0xce   : > { %1219 = vperm.xlu1 %7305, %v7629_v9   ;;  %6850 = vmatpush3.bf16.msra.mxu0 %v7420_v1 }
  0xcf   : > { %v7936_v4 = vpop.permute.xlu1 %563  ;;  %v7938_v16 = vpop.permute.xlu0 %558 }
  0xd0   : > { %10775 = vst [vmem:[#allocation27_spill] sm:$0xff] %v7936_v4  ;;  %v7421_v4 = vld [vmem:[%s10730_s3 + $0x10] sm:$0xff]  }
  0xd1   : > { %1379 = vperm.xlu0 %7306, %v7789_v49   ;;  %6851 = vmatprep.subr.bf16.mxu0 %v7421_v4 }
  0xd2   : > { %1227 = vperm.xlu1 %7305, %v7637_v11   ;;  %6852 = vmatpush3.bf16.msra.mxu0 %v7421_v4 }
  0xd3   : > { %v7945_v52 = vpop.permute.xlu1 %573  ;;  %v7947_v14 = vpop.permute.xlu0 %568 }
  0xd4   : > { %10776 = vst [vmem:[#allocation28_spill] sm:$0xff] %v7945_v52  ;;  %v7422_v52 = vld [vmem:[%s10730_s3 + $0x18] sm:$0xff]  }
  0xd5   : > { %1395 = vperm.xlu0 %7306, %v7802_v53   ;;  %6853 = vmatprep.subr.bf16.mxu0 %v7422_v52 }
  0xd6   : > { %1235 = vperm.xlu1 %7305, %v7643_v13   ;;  %6854 = vmatpush3.bf16.msra.mxu0 %v7422_v52  ;;  %v7424_v52 = vld [vmem:[%s10730_s3 + $0x28] sm:$0xff]  }
  0xd7   : > { %v7954_v48 = vpop.permute.xlu1 %583  ;;  %v7956_v49 = vpop.permute.xlu0 %578 }
  0xd8   : > { %10777 = vst [vmem:[#allocation29_spill] sm:$0xff] %v7954_v48  ;;  %10778 = vst [vmem:[#allocation30_spill] sm:$0xff] %v7956_v49  ;;  %v7423_v48 = vld [vmem:[%s10730_s3 + $0x20] sm:$0xff]   ;;  %v10781_v49 = vmov 1  }
  0xd9   : > { %1411 = vperm.xlu0 %7306, %v7815_v57   ;;  %6855 = vmatprep.subr.bf16.mxu0 %v7423_v48 }
  0xda   : > { %1243 = vperm.xlu1 %7305, %v7651_v15   ;;  %6856 = vmatpush3.bf16.msra.mxu0 %v7423_v48  ;;  %v7425_v48 = vld [vmem:[%s10730_s3 + $0x30] sm:$0xff]  }
  0xdb   : > { %v7963_v1 = vpop.permute.xlu1 %593  ;;  %v7965_v53 = vpop.permute.xlu0 %588  ;;  %6857 = vmatprep.subr.bf16.mxu0 %v7424_v52 }
  0xdc   : > { %10779 = vst [vmem:[#allocation31_spill] sm:$0xff] %v7963_v1  ;;  %10780 = vst [vmem:[#allocation32_spill] sm:$0xff] %v7965_v53 }
  0xdd   : > { %7329 = vset.pattern.permute.xlu0 %v10781_v49 }
  0xde   : > { %7307 = vset.pattern.permute.xlu1 %v10781_v49  ;;  %795 = vperm.xlu0 %7329, %v7600_v2  }
  0xdf   : > { %v7973_v4 = vpop.permute.xlu1 %603  ;;  %871 = vperm.xlu1 %7307, %v7667_v19   ;;  %v7976_v57 = vpop.permute.xlu0 %598  ;;  %6858 = vmatpush3.bf16.msra.mxu0 %v7424_v52 }
  0xe0   : > { %10782 = vst [vmem:[#allocation33_spill] sm:$0xff] %v7973_v4  ;;  %10783 = vst [vmem:[#allocation34_spill] sm:$0xff] %v7976_v57  ;;  %6859 = vmatprep.subr.bf16.mxu0 %v7425_v48 }
  0xe2   : > { %807 = vperm.xlu0 %7329, %v7605_v3  }
  0xe3   : > { %v7982_v53 = vpop.permute.xlu1 %613  ;;  %7308 = vset.pattern.permute.xlu1 %v10765_v8  ;;  %v7985_v2 = vpop.permute.xlu0 %608  ;;  %6860 = vmatpush3.bf16.msra.mxu0 %v7425_v48 }
  0xe4   : > { %10784 = vst [vmem:[#allocation35_spill] sm:$0xff] %v7982_v53  ;;  %10785 = vst [vmem:[#allocation36_spill] sm:$0xff] %v7985_v2  ;;  %1247 = vperm.xlu1 %7308, %v7662_v18   ;;  %v7426_v2 = vld [vmem:[%s10730_s3 + $0x38] sm:$0xff]  }
  0xe5   : > { %6861 = vmatprep.subr.bf16.mxu0 %v7426_v2 }
  0xe6   : > { %815 = vperm.xlu0 %7329, %v7613_v5  }
  0xe7   : > { %v7992_v4 = vpop.permute.xlu1 %623  ;;  %v7994_v3 = vpop.permute.xlu0 %618  ;;  %6862 = vmatpush3.bf16.msra.mxu0 %v7426_v2 }
  0xe8   : > { %10786 = vst [vmem:[#allocation37_spill] sm:$0xff] %v7992_v4  ;;  %10787 = vst [vmem:[#allocation38_spill] sm:$0xff] %v7994_v3  ;;  %1255 = vperm.xlu1 %7308, %v7670_v20  }
  0xea   : > { %823 = vperm.xlu0 %7329, %v7621_v7  }
  0xeb   : > { %v8001_v18 = vpop.permute.xlu1 %633  ;;  %v8003_v52 = vpop.permute.xlu0 %628 }
  0xec   : > { %10788 = vst [vmem:[#allocation39_spill] sm:$0xff] %v8001_v18  ;;  %10789 = vst [vmem:[#allocation40_spill] sm:$0xff] %v8003_v52  ;;  %1259 = vperm.xlu1 %7308, %v7667_v19  }
  0xee   : > { %831 = vperm.xlu0 %7329, %v7629_v9  }
  0xef   : > { %v8007_v5 = vpop.permute.xlu1 %643  ;;  %v8009_v4 = vpop.permute.xlu0 %638 }
  0xf0   : > { %10790 = vst [vmem:[#allocation41_spill] sm:$0xff] %v8007_v5  ;;  %10791 = vst [vmem:[#allocation42_spill] sm:$0xff] %v8009_v4  ;;  %7309 = vset.pattern.permute.xlu1 %v10781_v49 }
  0xf1   : > { %879 = vperm.xlu1 %7309, %v7677_v21  }
  0xf2   : > { %839 = vperm.xlu0 %7329, %v7637_v11  }
  0xf3   : > { %v8014_v7 = vpop.permute.xlu1 %653  ;;  %v8016_v48 = vpop.permute.xlu0 %648 }
  0xf4   : > { %10792 = vst [vmem:[#allocation43_spill] sm:$0xff] %v8014_v7  ;;  %10793 = vst [vmem:[#allocation44_spill] sm:$0xff] %v8016_v48 }
  0xf5   : > { %883 = vperm.xlu1 %7309, %v7688_v24  }
  0xf6   : > { %847 = vperm.xlu0 %7329, %v7643_v13  }
  0xf7   : > { %v8020_v19 = vpop.permute.xlu1 %663  ;;  %v8022_v9 = vpop.permute.xlu0 %658 }
  0xf8   : > { %10794 = vst [vmem:[#allocation45_spill] sm:$0xff] %v8020_v19  ;;  %10795 = vst [vmem:[#allocation46_spill] sm:$0xff] %v8022_v9 }
  0xf9   : > { %7310 = vset.pattern.permute.xlu1 %v10765_v8 }
  0xfa   : > { %1263 = vperm.xlu1 %7310, %v7680_v22   ;;  %855 = vperm.xlu0 %7329, %v7651_v15  }
  0xfb   : > { %v8027_v21 = vpop.permute.xlu1 %673  ;;  %v8029_v11 = vpop.permute.xlu0 %668 }
  0xfc   : > { %10796 = vst [vmem:[#allocation47_spill] sm:$0xff] %v8027_v21  ;;  %10797 = vst [vmem:[#allocation48_spill] sm:$0xff] %v8029_v11 }
  0xfe   : > { %1271 = vperm.xlu1 %7310, %v7688_v24   ;;  %863 = vperm.xlu0 %7329, %v7659_v17  }
  0xff   : > { %v8033_v2 = vpop.permute.xlu1 %683  ;;  %v8035_v13 = vpop.permute.xlu0 %678 }
 0x100   : > { %10798 = vst [vmem:[#allocation49_spill] sm:$0xff] %v8033_v2  ;;  %10799 = vst [vmem:[#allocation50_spill] sm:$0xff] %v8035_v13 }
 0x102   : > { %1275 = vperm.xlu1 %7310, %v7685_v23   ;;  %867 = vperm.xlu0 %7329, %v7670_v20  }
 0x103   : > { %v8039_v19 = vpop.permute.xlu1 %693  ;;  %v8041_v9 = vpop.permute.xlu0 %688 }
 0x104   : > { %10800 = vst [vmem:[#allocation51_spill] sm:$0xff] %v8039_v19  ;;  %10801 = vst [vmem:[#allocation52_spill] sm:$0xff] %v8041_v9 }
 0x106   : > { %7311 = vset.pattern.permute.xlu1 %v10781_v49  ;;  %875 = vperm.xlu0 %7329, %v7680_v22  }
 0x107   : > { %v8045_v15 = vpop.permute.xlu1 %703  ;;  %895 = vperm.xlu1 %7311, %v7693_v25   ;;  %v8048_v17 = vpop.permute.xlu0 %698 }
 0x108   : > { %10802 = vst [vmem:[#allocation53_spill] sm:$0xff] %v8045_v15  ;;  %10803 = vst [vmem:[#allocation54_spill] sm:$0xff] %v8048_v17 }
 0x10a   : > { %887 = vperm.xlu0 %7329, %v7685_v23  }
 0x10b   : > { %v8051_v24 = vpop.permute.xlu1 %713  ;;  %899 = vperm.xlu1 %7311, %v7704_v28   ;;  %v8054_v20 = vpop.permute.xlu0 %708 }
 0x10c   : > { %10804 = vst [vmem:[#allocation55_spill] sm:$0xff] %v8051_v24  ;;  %10805 = vst [vmem:[#allocation56_spill] sm:$0xff] %v8054_v20 }
 0x10e   : > { %891 = vperm.xlu0 %7329, %v7696_v26  }
 0x10f   : > { %v8057_v9 = vpop.permute.xlu1 %723  ;;  %7312 = vset.pattern.permute.xlu1 %v10765_v8  ;;  %v8060_v22 = vpop.permute.xlu0 %718 }
 0x110   : > { %10806 = vst [vmem:[#allocation57_spill] sm:$0xff] %v8057_v9  ;;  %10807 = vst [vmem:[#allocation58_spill] sm:$0xff] %v8060_v22  ;;  %1279 = vperm.xlu1 %7312, %v7696_v26  }
 0x112   : > { %903 = vperm.xlu0 %7329, %v7701_v27  }
 0x114   : > { %v8064_v25 = vpop.permute.xlu1 %799  ;;  %1287 = vperm.xlu1 %7312, %v7704_v28   ;;  %v8067_v23 = vpop.permute.xlu0 %1187 }
 0x116   : > { %907 = vperm.xlu0 %7329, %v7712_v30  }
 0x118   : > { %v8070_v20 = vpop.permute.xlu1 %803  ;;  %1291 = vperm.xlu1 %7312, %v7701_v27   ;;  %v8073_v9 = vpop.permute.xlu0 %1199 }
 0x11a   : > { %919 = vperm.xlu0 %7329, %v7717_v31  }
 0x11c   : > { %v8076_v22 = vpop.permute.xlu1 %811  ;;  %7313 = vset.pattern.permute.xlu1 %v10781_v49  ;;  %v8079_v26 = vpop.permute.xlu0 %1207 }
 0x11d   : > { %911 = vperm.xlu1 %7313, %v7709_v29  }
 0x11e   : > { %923 = vperm.xlu0 %7329, %v7728_v34  }
 0x120   : > { %v8083_v28 = vpop.permute.xlu1 %819  ;;  %v8085_v24 = vpop.permute.xlu0 %1215 }
 0x121   : > { %915 = vperm.xlu1 %7313, %v7720_v32  }
 0x122   : > { %935 = vperm.xlu0 %7329, %v7733_v35  }
 0x124   : > { %v8089_v27 = vpop.permute.xlu1 %827  ;;  %v8091_v15 = vpop.permute.xlu0 %1223 }
 0x125   : > { %7314 = vset.pattern.permute.xlu1 %v10765_v8 }
 0x126   : > { %1295 = vperm.xlu1 %7314, %v7712_v30   ;;  %939 = vperm.xlu0 %7329, %v7744_v38  }
 0x128   : > { %v8096_v29 = vpop.permute.xlu1 %835  ;;  %v8098_v17 = vpop.permute.xlu0 %1231 }
 0x12a   : > { %1303 = vperm.xlu1 %7314, %v7720_v32   ;;  %951 = vperm.xlu0 %7329, %v7749_v39  }
 0x12c   : > { %v8102_v19 = vpop.permute.xlu1 %843  ;;  %v8104_v2 = vpop.permute.xlu0 %1239 }
 0x12e   : > { %1307 = vperm.xlu1 %7314, %v7717_v31   ;;  %955 = vperm.xlu0 %7329, %v7760_v42  }
 0x130   : > { %v8108_v13 = vpop.permute.xlu1 %851  ;;  %v8110_v30 = vpop.permute.xlu0 %1251 }
 0x132   : > { %7315 = vset.pattern.permute.xlu1 %v10781_v49  ;;  %967 = vperm.xlu0 %7329, %v7765_v43  }
 0x133   : > { %927 = vperm.xlu1 %7315, %v7725_v33  }
 0x134   : > { %v8115_v32 = vpop.permute.xlu1 %859  ;;  %v8117_v11 = vpop.permute.xlu0 %1267 }
 0x136   : > { %971 = vperm.xlu0 %7329, %v7776_v46  }
 0x137   : > { %931 = vperm.xlu1 %7315, %v7736_v36  }
 0x138   : > { %v8121_v31 = vpop.permute.xlu0 %1283 }
 0x139   : > { %v8123_v21 = vpop.permute.xlu1 %1183 }
 0x13a   : > { %983 = vperm.xlu0 %7329, %v7781_v47  }
 0x13b   : > { %7316 = vset.pattern.permute.xlu1 %v10765_v8 }
 0x13c   : > { %1311 = vperm.xlu1 %7316, %v7728_v34   ;;  %v8128_v48 = vpop.permute.xlu0 %1299  ;;  %v10748_v34 = vlaneseq }
 0x13d   : > { %v1192_v33 = vpop.permute.xlu1 %1191 }
 0x13e   : > { %987 = vperm.xlu0 %7329, %v7792_v50  }
 0x140   : > { %1319 = vperm.xlu1 %7316, %v7736_v36   ;;  %v8132_v7 = vpop.permute.xlu0 %1315 }
 0x141   : > { %v8134_v5 = vpop.permute.xlu1 %1195 }
 0x142   : > { %999 = vperm.xlu0 %7329, %v7797_v51   ;;  %v727_v51 = vshrl.u32 %v10748_v34, 7 }
 0x144   : > { %1323 = vperm.xlu1 %7316, %v7733_v35   ;;  %v8138_v4 = vpop.permute.xlu0 %1331  ;;  %v1052_v18 = vsub.s32 1, %v727_v51 }
 0x145   : > { %10808 = vst [vmem:[#allocation59_spill] sm:$0xff] %v8138_v4  ;;  %v8140_v52 = vpop.permute.xlu1 %1203  ;;  %v8224_v4 = vld [vmem:[%s7594_s15 + $0x200] sm:$0xff] }
 0x146   : > { %1003 = vperm.xlu0 %7329, %v7805_v54   ;;  %v728_v54 = vsub.s32 0, %v727_v51 }
 0x148   : > { %7317 = vset.pattern.permute.xlu1 %v10781_v49  ;;  %v8144_v50 = vpop.permute.xlu0 %1347 }
 0x149   : > { %10809 = vst [vmem:[#allocation60_spill] sm:$0xff] %v8144_v50  ;;  %943 = vperm.xlu1 %7317, %v7741_v37   ;;  %v8147_v36 = vpop.permute.xlu1 %1211  ;;  %v340_v37 = vld [vmem:[%s10728_s1] sm:$0x7] }
 0x14a   : > { %1015 = vperm.xlu0 %7329, %v7810_v55   ;;  %v8162_v53 = vrot.slane %v340_v37, %v1052_v18  ;;  %v1440_v55 = vsub.s32 2, %v727_v51 }
 0x14c   : > { %v8151_v35 = vpop.permute.xlu0 %1363  ;;  %v1055_v18 = vmul.f32 %v8162_v53, %v8064_v25 }
 0x14d   : > { %10810 = vst [vmem:[#allocation61_spill] sm:$0xff] %v8151_v35  ;;  %947 = vperm.xlu1 %7317, %v7752_v40   ;;  %v8154_v3 = vpop.permute.xlu1 %1219  ;;  %v8169_v35 = vrot.slane %v340_v37, %v728_v54 }
 0x14e   : > { %1019 = vperm.xlu0 %7329, %v7818_v58  }
 0x14f   : > { %v731_v57 = vmul.f32 %v8169_v35, %v7850_v61  ;;  %v730_v61 = vmul.f32 %v8169_v35, %v7842_v0 }
 0x150   : > { %v8160_v50 = vpop.permute.xlu0 %1379 }
 0x151   : > { %10811 = vst [vmem:[#allocation62_spill] sm:$0xff] %v8160_v50  ;;  %7318 = vset.pattern.permute.xlu1 %v10765_v8  ;;  %v8165_v34 = vpop.permute.xlu1 %1227  ;;  %v8177_v50 = vrot.slane %v340_v37, %v1440_v55  ;;  %v10815_v37 = vld [vmem:[#allocation4_spill] sm:$0xff] }
 0x152   : > { %1327 = vperm.xlu1 %7318, %v7744_v38   ;;  %1031 = vperm.xlu0 %7329, %v7823_v59   ;;  %v1119_v59 = vadd.f32 %v1055_v18, %v731_v57  ;;  %v1056_v57 = vmul.f32 %v8162_v53, %v8070_v20 }
 0x153   : > { %v1443_v54 = vmul.f32 %v8177_v50, %v8067_v23  ;;  %v1444_v20 = vmul.f32 %v8177_v50, %v1192_v33  ;;  %v1446_v55 = vmul.f32 %v8177_v50, %v8073_v9 }
 0x154   : > { %v8171_v58 = vpop.permute.xlu0 %1395 }
 0x155   : > { %10812 = vst [vmem:[#allocation63_spill] sm:$0xff] %v8171_v58  ;;  %v8179_v51 = vpop.permute.xlu1 %1235  ;;  %v1507_v25 = vadd.f32 %v1443_v54, %v1119_v59  ;;  %v1442_v59 = vmul.f32 %v8177_v50, %v8123_v21  ;;  %v10817_v21 = vld [vmem:[#allocation7_spill] sm:$0xff] }
 0x156   : > { %1335 = vperm.xlu1 %7318, %v7752_v40   ;;  %1035 = vperm.xlu0 %7329, %v7831_v62   ;;  %v734_v40 = vmul.f32 %v8169_v35, %v7856_v56  ;;  %v1058_v62 = vmul.f32 %v8162_v53, %v8076_v22  ;;  %v10814_v56 = vld [vmem:[#allocation5_spill] sm:$0xff] }
 0x157   : > { %v732_v22 = vmul.f32 %v8169_v35, %v10814_v56  ;;  %v1060_v56 = vmul.f32 %v8162_v53, %v8083_v28  ;;  %v10819_v28 = vmov 0  }
 0x158   : > { %v8183_v38 = vpop.permute.xlu0 %1411  ;;  %v1122_v18 = vadd.f32 %v1058_v62, %v734_v40 }
 0x159   : > { %10813 = vst [vmem:[#allocation64_spill] sm:$0xff] %v8183_v38  ;;  %v8187_v58 = vpop.permute.xlu1 %1243  ;;  %v1120_v38 = vadd.f32 %v1056_v57, %v732_v22  ;;  %v1445_v22 = vmul.f32 %v8177_v50, %v8134_v5 }
 0x15a   : > { %1339 = vperm.xlu1 %7318, %v7749_v39   ;;  %1047 = vperm.xlu0 %7329, %v7836_v63   ;;  %v8202_v39 = vld [vmem:[%s10729_s2] ss:$0 sm:$0xff] }
 0x15d   : > { %v796_v23 = vpop.permute.xlu0 %795 }
 0x15e   : > { %v1054_v63 = vmul.f32 %v8162_v53, %v796_v23  ;;  %7319 = vset.pattern.permute.xlu1 %v10781_v49  ;;  %v8206_v0 = vpop.permute.xlu1 %871  ;;  %7332 = vset.pattern.permute.xlu0 %v10765_v8  ;;  %v736_v23 = vmul.f32 %v8169_v35, %v7862_v60  ;;  %v10818_v60 = vld [vmem:[#allocation2_spill] sm:$0xff] }
 0x15f   : > { %959 = vperm.xlu1 %7319, %v7757_v41   ;;  %1427 = vperm.xlu0 %7332, %v10815_v37   ;;  %v1577_v41 = vadd.f32 %v8202_v39, %v1507_v25  ;;  %v10816_v37 = vld [vmem:[#allocation6_spill] sm:$0xff]  ;;  %v1510_v25 = vadd.f32 %v1446_v55, %v1122_v18  ;;  %v1062_v55 = vmul.f32 %v8162_v53, %v8089_v27 }
 0x160   : > { %v1118_v54 = vadd.f32 %v1054_v63, %v730_v61  ;;  %v733_v9 = vmul.f32 %v8169_v35, %v10816_v37  ;;  %v735_v61 = vmul.f32 %v8169_v35, %v10817_v21  ;;  %v1508_v63 = vadd.f32 %v1444_v20, %v1120_v38 }
 0x161   : > { %v808_v33 = vpop.permute.xlu0 %807  ;;  %v1448_v38 = vmul.f32 %v8177_v50, %v8079_v26  ;;  %v1124_v20 = vadd.f32 %v1060_v56, %v736_v23 }
 0x162   : > { %v1057_v40 = vmul.f32 %v8162_v53, %v808_v33  ;;  %v1506_v62 = vadd.f32 %v1442_v59, %v1118_v54  ;;  %v738_v59 = vmul.f32 %v8169_v35, %v7868_v44  ;;  %v1641_v33 = vmax.f32 %v1577_v41, 0.0 }
 0x163   : > { %963 = vperm.xlu1 %7319, %v10818_v60   ;;  %v8232_v57 = vpop.permute.xlu1 %1247  ;;  %7333 = vset.pattern.permute.xlu0 %v10819_v28  ;;  %v10821_v28 = vld [vmem:[#allocation9_spill] sm:$0xff]  ;;  %v1578_v26 = vadd.f32 %v8202_v39, %v1508_v63  ;;  %v1580_v41 = vadd.f32 %v8202_v39, %v1510_v25  ;;  %v1064_v63 = vmul.f32 %v8162_v53, %v8096_v29  ;;  %v8271_v25 = vld [vmem:[%s7594_s15 + $0x230] sm:$0xff] }
 0x164   : > { %v1121_v1 = vadd.f32 %v1057_v40, %v733_v9  ;;  %v1576_v37 = vadd.f32 %v8202_v39, %v1506_v62  ;;  %3382 = vperm.xlu0 %7333, %v8224_v4   ;;  %v8247_v40 = vld [vmem:[%s7594_s15 + $0x228] sm:$0xff]  ;;  %v10820_v62 = vld [vmem:[#allocation8_spill] sm:$0xff]  ;;  %v739_v44 = vmul.f32 %v8169_v35, %v10821_v28  ;;  %v1512_v28 = vadd.f32 %v1448_v38, %v1124_v20 }
 0x165   : > { %v816_v54 = vpop.permute.xlu0 %815  ;;  %v737_v21 = vmul.f32 %v8169_v35, %v10820_v62  ;;  %v1452_v29 = vmul.f32 %v8177_v50, %v8091_v15 }
 0x166   : > { %v1509_v18 = vadd.f32 %v1445_v22, %v1121_v1  ;;  %v1059_v5 = vmul.f32 %v8162_v53, %v816_v54  ;;  %v1640_v9 = vmax.f32 %v1576_v37, 0.0  ;;  %v1447_v1 = vmul.f32 %v8177_v50, %v8140_v52 }
 0x167   : > { %7320 = vset.pattern.permute.xlu1 %v10765_v8  ;;  %v8255_v23 = vpop.permute.xlu1 %1255  ;;  %v740_v22 = vmul.f32 %v8169_v35, %v7874_v6  ;;  %v1450_v52 = vmul.f32 %v8177_v50, %v8085_v24  ;;  %v10822_v6 = vld [vmem:[#allocation12_spill] sm:$0xff]  ;;  %v1449_v24 = vmul.f32 %v8177_v50, %v8147_v36 }
 0x168   : > { %v1123_v27 = vadd.f32 %v1059_v5, %v735_v61  ;;  %1343 = vperm.xlu1 %7320, %v7760_v42   ;;  %v1704_v56 = vpack.c.bf16 %v1641_v33, %v1640_v9  ;;  %v1579_v54 = vadd.f32 %v8202_v39, %v1509_v18  ;;  %3407 = vperm.xlu0 %7333, %v8247_v40   ;;  %v1642_v18 = vmax.f32 %v1578_v26, 0.0 }
 0x169   : > { %v824_v37 = vpop.permute.xlu0 %823  ;;  %v1126_v61 = vadd.f32 %v1062_v55, %v738_v59  ;;  %v742_v38 = vmul.f32 %v8169_v35, %v10822_v6  ;;  %v1644_v9 = vmax.f32 %v1580_v41, 0.0  ;;  %v1128_v62 = vadd.f32 %v1064_v63, %v740_v22  ;;  %v8291_v41 = vld [vmem:[%s7594_s15 + $0x208] sm:$0xff] }
 0x16a   : > { %v1511_v42 = vadd.f32 %v1447_v1, %v1123_v27  ;;  %v1061_v33 = vmul.f32 %v8162_v53, %v824_v37  ;;  %6863 = vmatprep.mubr.bf16.mxu0 %v1704_v56  ;;  %v1643_v5 = vmax.f32 %v1579_v54, 0.0  ;;  %v1066_v1 = vmul.f32 %v8162_v53, %v8102_v19  ;;  %v10823_v54 = vld [vmem:[#allocation10_spill] sm:$0xff] }
 0x16b   : > { %v8277_v20 = vpop.permute.xlu1 %1259  ;;  %v1582_v56 = vadd.f32 %v8202_v39, %v1512_v28  ;;  %v1514_v26 = vadd.f32 %v1450_v52, %v1126_v61  ;;  %v1451_v19 = vmul.f32 %v8177_v50, %v8154_v3  ;;  %v1516_v61 = vadd.f32 %v1452_v29, %v1128_v62 }
 0x16c   : > { %v1125_v59 = vadd.f32 %v1061_v33, %v737_v21  ;;  %1351 = vperm.xlu1 %7320, %v10818_v60   ;;  %v1581_v55 = vadd.f32 %v8202_v39, %v1511_v42  ;;  %v1705_v15 = vpack.c.bf16 %v1643_v5, %v1642_v18  ;;  %3412 = vperm.xlu0 %7333, %v8271_v25  }
 0x16d   : > { %v832_v27 = vpop.permute.xlu0 %831  ;;  %v741_v60 = vmul.f32 %v8169_v35, %v10823_v54  ;;  %v1454_v42 = vmul.f32 %v8177_v50, %v8098_v17  ;;  %v1130_v33 = vadd.f32 %v1066_v1, %v742_v38  ;;  %v1646_v18 = vmax.f32 %v1582_v56, 0.0  ;;  %v8310_v38 = vld [vmem:[%s7594_s15 + $0x210] sm:$0xff]  ;;  %v10824_v1 = vld [vmem:[#allocation11_spill] sm:$0xff] }
 0x16e   : > { %v1513_v37 = vadd.f32 %v1449_v24, %v1125_v59  ;;  %v1063_v36 = vmul.f32 %v8162_v53, %v832_v27  ;;  %v1645_v21 = vmax.f32 %v1581_v55, 0.0  ;;  %6864 = vmatmul.mubr.bf16.vlgmr.msra.gmra.mrb[0].mxu0 %v1705_v15  ;;  %v744_v29 = vmul.f32 %v8169_v35, %v7886_v10 }
 0x16f   : > { %v1068_v17 = vmul.f32 %v8162_v53, %v8108_v13  ;;  %v1453_v24 = vmul.f32 %v8177_v50, %v8165_v34  ;;  %v743_v27 = vmul.f32 %v8169_v35, %v10824_v1  ;;  %v1518_v10 = vadd.f32 %v1454_v42, %v1130_v33  ;;  %v10827_v33 = vld [vmem:[#allocation14_spill] sm:$0xff]  ;;  %v6425_v1 = vld [vmem:[%s7594_s15 + $0x248] sm:$0xff] }
 0x170   : > { %v1127_v22 = vadd.f32 %v1063_v36, %v739_v44  ;;  %1355 = vperm.xlu1 %7320, %v7765_v43   ;;  %v8296_v28 = vpop.permute.xlu1 %879  ;;  %v1706_v63 = vpack.c.bf16 %v1645_v21, %v1644_v9  ;;  %v1583_v52 = vadd.f32 %v8202_v39, %v1513_v37  ;;  %7341 = vset.pattern.permute.xlu0 %v10781_v49  ;;  %v10825_v36 = vld [vmem:[#allocation15_spill] sm:$0xff] }
 0x171   : > { %v840_v6 = vpop.permute.xlu0 %839  ;;  %v1584_v44 = vadd.f32 %v8202_v39, %v1514_v26  ;;  %3769 = vperm.xlu0 %7341, %v8291_v41   ;;  %v1586_v15 = vadd.f32 %v8202_v39, %v1516_v61  ;;  %v746_v21 = vmul.f32 %v8169_v35, %v10825_v36  ;;  %v1456_v54 = vmul.f32 %v8177_v50, %v8104_v2  ;;  %v10826_v61 = vld [vmem:[#allocation13_spill] sm:$0xff] }
 0x172   : > { %v1515_v5 = vadd.f32 %v1451_v19, %v1127_v22  ;;  %v1065_v3 = vmul.f32 %v8162_v53, %v840_v6  ;;  %6867 = vmatprep.mubr.bf16.mxu0 %v1706_v63  ;;  %v1647_v43 = vmax.f32 %v1583_v52, 0.0  ;;  %v1455_v19 = vmul.f32 %v8177_v50, %v8179_v51 }
 0x173   : > { %v1648_v26 = vmax.f32 %v1584_v44, 0.0  ;;  %v745_v42 = vmul.f32 %v8169_v35, %v10826_v61  ;;  %v747_v6 = vmul.f32 %v8169_v35, %v10827_v33  ;;  %v1458_v51 = vmul.f32 %v8177_v50, %v8232_v57 }
 0x174   : > { %v1129_v59 = vadd.f32 %v1065_v3, %v741_v60  ;;  %7321 = vset.pattern.permute.xlu1 %v10781_v49  ;;  %v8315_v55 = vpop.permute.xlu1 %883  ;;  %v1707_v9 = vpack.c.bf16 %v1647_v43, %v1646_v18  ;;  %v1585_v62 = vadd.f32 %v8202_v39, %v1515_v5  ;;  %v1132_v60 = vadd.f32 %v1068_v17, %v744_v29  ;;  %v10828_v18 = vld [vmem:[#allocation3_spill] sm:$0xff]  ;;  %v10829_v17 = vld [vmem:[#allocation16_spill] sm:$0xff] }
 0x175   : > { %975 = vperm.xlu1 %7321, %v7773_v45   ;;  %v848_v13 = vpop.permute.xlu0 %847  ;;  %3773 = vperm.xlu0 %7341, %v8310_v38   ;;  %v1070_v45 = vmul.f32 %v8162_v53, %v8115_v32  ;;  %v1650_v5 = vmax.f32 %v1586_v15, 0.0  ;;  %v1588_v3 = vadd.f32 %v8202_v39, %v1518_v10  ;;  %v1459_v15 = vmul.f32 %v8177_v50, %v8110_v30  ;;  %v10830_v30 = vld [vmem:[#allocation18_spill] sm:$0xff] }
 0x176   : > { %v1517_v56 = vadd.f32 %v1453_v24, %v1129_v59  ;;  %v1067_v34 = vmul.f32 %v8162_v53, %v848_v13  ;;  %v1649_v37 = vmax.f32 %v1585_v62, 0.0  ;;  %6868 = vmatmul.mubr.bf16.gmra.mrb[4].mxu0 %v1707_v9  ;;  %v749_v24 = vmul.f32 %v8169_v35, %v10829_v17 }
 0x177   : > { %v1520_v59 = vadd.f32 %v1456_v54, %v1132_v60  ;;  %v1134_v9 = vadd.f32 %v1070_v45, %v746_v21  ;;  %v1073_v62 = vmul.f32 %v8162_v53, %v8206_v0  ;;  %v10831_v60 = vld [vmem:[#allocation17_spill] sm:$0xff] }
 0x178   : > { %v1131_v22 = vadd.f32 %v1067_v34, %v743_v27  ;;  %v1708_v63 = vpack.c.bf16 %v1649_v37, %v1648_v26  ;;  %v1587_v52 = vadd.f32 %v8202_v39, %v1517_v56  ;;  %v1457_v27 = vmul.f32 %v8177_v50, %v8187_v58 }
 0x179   : > { %979 = vperm.xlu1 %7321, %v10828_v18   ;;  %v8338_v2 = vpop.permute.xlu1 %1263  ;;  %v856_v32 = vpop.permute.xlu0 %855  ;;  %3789 = vperm.xlu0 %7341, %v8271_v25   ;;  %v1461_v25 = vmul.f32 %v8177_v50, %v8277_v20  ;;  %v1075_v56 = vmul.f32 %v8162_v53, %v8296_v28  ;;  %v1652_v26 = vmax.f32 %v1588_v3, 0.0  ;;  %v1522_v58 = vadd.f32 %v1458_v51, %v1134_v9 }
 0x17a   : > { %v1519_v43 = vadd.f32 %v1455_v19, %v1131_v22  ;;  %v1069_v44 = vmul.f32 %v8162_v53, %v856_v32  ;;  %6871 = vmatprep.mubr.bf16.mxu0 %v1708_v63  ;;  %v1651_v29 = vmax.f32 %v1587_v52, 0.0  ;;  %v751_v20 = vmul.f32 %v8169_v35, %v10830_v30  ;;  %v6426_v52 = vld [vmem:[%s7594_s15 + $0x250] sm:$0xff] }
 0x17b   : > { %v1137_v54 = vadd.f32 %v1073_v62, %v749_v24  ;;  %v1590_v28 = vadd.f32 %v8202_v39, %v1520_v59  ;;  %v748_v45 = vmul.f32 %v8169_v35, %v10831_v60  ;;  %v1592_v51 = vadd.f32 %v8202_v39, %v1522_v58  ;;  %v10833_v24 = vld [vmem:[#allocation20_spill] sm:$0xff] }
 0x17c   : > { %v1133_v57 = vadd.f32 %v1069_v44, %v745_v42  ;;  %v1709_v10 = vpack.c.bf16 %v1651_v29, %v1650_v5  ;;  %v1589_v13 = vadd.f32 %v8202_v39, %v1519_v43  ;;  %v1139_v42 = vadd.f32 %v1075_v56, %v751_v20  ;;  %v10832_v5 = vld [vmem:[#allocation19_spill] sm:$0xff] }
 0x17d   : > { %7322 = vset.pattern.permute.xlu1 %v10765_v8  ;;  %v1272_v0 = vpop.permute.xlu1 %1271  ;;  %v864_v34 = vpop.permute.xlu0 %863  ;;  %3801 = vperm.xlu0 %7341, %v6425_v1   ;;  %v1525_v61 = vadd.f32 %v1461_v25, %v1137_v54  ;;  %v750_v3 = vmul.f32 %v8169_v35, %v10832_v5  ;;  %v752_v44 = vmul.f32 %v8169_v35, %v7911_v12  ;;  %v1654_v29 = vmax.f32 %v1590_v28, 0.0 }
 0x17e   : > { %v1521_v37 = vadd.f32 %v1457_v27, %v1133_v57  ;;  %v1071_v36 = vmul.f32 %v8162_v53, %v864_v34  ;;  %1359 = vperm.xlu1 %7322, %v7776_v46   ;;  %v1653_v21 = vmax.f32 %v1589_v13, 0.0  ;;  %6872 = vmatmul.mubr.bf16.gmra.mrb[8].mxu0 %v1709_v10  ;;  %v1463_v46 = vmul.f32 %v8177_v50, %v8117_v11  ;;  %v10834_v34 = vld [vmem:[#allocation21_spill] sm:$0xff] }
 0x17f   : > { %v1076_v11 = vmul.f32 %v8162_v53, %v8315_v55  ;;  %v753_v59 = vmul.f32 %v8169_v35, %v10833_v24  ;;  %v1460_v9 = vmul.f32 %v8177_v50, %v8255_v23  ;;  %v1595_v27 = vadd.f32 %v8202_v39, %v1525_v61 }
 0x180   : > { %v1135_v19 = vadd.f32 %v1071_v36, %v747_v6  ;;  %v1710_v22 = vpack.c.bf16 %v1653_v21, %v1652_v26  ;;  %v1591_v63 = vadd.f32 %v8202_v39, %v1521_v37  ;;  %v1527_v12 = vadd.f32 %v1463_v46, %v1139_v42  ;;  %v10835_v46 = vld [vmem:[#allocation22_spill] sm:$0xff]  ;;  %v7447_v42 = vld [vmem:[%s7594_s15 + $0x188] sm:$0xff] }
 0x181   : > { %v1276_v33 = vpop.permute.xlu1 %1275  ;;  %v868_v32 = vpop.permute.xlu0 %867  ;;  %3805 = vperm.xlu0 %7341, %v6426_v52   ;;  %v1464_v57 = vmul.f32 %v8177_v50, %v1272_v0  ;;  %v1656_v56 = vmax.f32 %v1592_v51, 0.0  ;;  %v755_v26 = vmul.f32 %v8169_v35, %v10834_v34  ;;  %v1140_v58 = vadd.f32 %v1076_v11, %v752_v44  ;;  %v6434_v44 = vld [vmem:[%s7594_s15 + $0x290] sm:$0xff] }
 0x182   : > { %v1523_v43 = vadd.f32 %v1459_v15, %v1135_v19  ;;  %v1072_v6 = vmul.f32 %v8162_v53, %v868_v32  ;;  %1367 = vperm.xlu1 %7322, %v10828_v18   ;;  %6875 = vmatprep.mubr.bf16.mxu0 %v1710_v22  ;;  %v1655_v17 = vmax.f32 %v1591_v63, 0.0  ;;  %v6430_v18 = vld [vmem:[%s7594_s15 + $0x270] sm:$0xff]  ;;  %v1462_v0 = vmul.f32 %v8177_v50, %v8338_v2 }
 0x183   : > { %v1467_v20 = vmul.f32 %v8177_v50, %v8121_v31  ;;  %v1528_v54 = vadd.f32 %v1464_v57, %v1140_v58  ;;  %v1659_v60 = vmax.f32 %v1595_v27, 0.0  ;;  %v754_v61 = vmul.f32 %v8169_v35, %v10835_v46 }
 0x184   : > { %v1136_v62 = vadd.f32 %v1072_v6, %v748_v45  ;;  %v1593_v1 = vadd.f32 %v8202_v39, %v1523_v43  ;;  %v1711_v10 = vpack.c.bf16 %v1655_v17, %v1654_v29  ;;  %v1597_v45 = vadd.f32 %v8202_v39, %v1527_v12 }
 0x185   : > { %v876_v55 = vpop.permute.xlu0 %875  ;;  %3821 = vperm.xlu0 %7341, %v6430_v18   ;;  %v1465_v31 = vmul.f32 %v8177_v50, %v1276_v33  ;;  %v1598_v51 = vadd.f32 %v8202_v39, %v1528_v54  ;;  %v7448_v33 = vld [vmem:[%s7594_s15 + $0x190] sm:$0xff] }
 0x186   : > { %v1524_v13 = vadd.f32 %v1460_v9, %v1136_v62  ;;  %v1074_v15 = vmul.f32 %v8162_v53, %v876_v55  ;;  %1371 = vperm.xlu1 %7322, %v7781_v47   ;;  %v896_v25 = vpop.permute.xlu1 %895  ;;  %v1657_v23 = vmax.f32 %v1593_v1, 0.0  ;;  %6876 = vmatmul.mubr.bf16.gmra.mrb[12].mxu0 %v1711_v10  ;;  %v6433_v47 = vld [vmem:[%s7594_s15 + $0x288] sm:$0xff]  ;;  %v1661_v6 = vmax.f32 %v1597_v45, 0.0  ;;  %v10836_v9 = vld [vmem:[#allocation24_spill] sm:$0xff] }
 0x187   : > { %v1079_v37 = vmul.f32 %v8162_v53, %v896_v25  ;;  %v756_v62 = vmul.f32 %v8169_v35, %v10836_v9 }
 0x188   : > { %v1138_v36 = vadd.f32 %v1074_v15, %v750_v3  ;;  %v1712_v21 = vpack.c.bf16 %v1657_v23, %v1656_v56  ;;  %v1594_v30 = vadd.f32 %v8202_v39, %v1524_v13  ;;  %v1662_v13 = vmax.f32 %v1598_v51, 0.0  ;;  %v8418_v56 = vld [vmem:[%s7594_s15 + $0x2b0] sm:$0xff]  ;;  %v10838_v51 = vld [vmem:[#allocation25_spill] sm:$0xff] }
 0x189   : > { %v888_v28 = vpop.permute.xlu0 %887  ;;  %v1143_v22 = vadd.f32 %v1079_v37, %v755_v26  ;;  %3833 = vperm.xlu0 %7341, %v6433_v47  }
 0x18a   : > { %v1526_v19 = vadd.f32 %v1462_v0, %v1138_v36  ;;  %v1077_v63 = vmul.f32 %v8162_v53, %v888_v28  ;;  %7323 = vset.pattern.permute.xlu1 %v10781_v49  ;;  %v900_v2 = vpop.permute.xlu1 %899  ;;  %6879 = vmatprep.mubr.bf16.mxu0 %v1712_v21  ;;  %v1658_v52 = vmax.f32 %v1594_v30, 0.0  ;;  %v7449_v0 = vld [vmem:[%s7594_s15 + $0x180] sm:$0xff]  ;;  %v10837_v30 = vld [vmem:[#allocation23_spill] sm:$0xff] }
 0x18b   : > { %991 = vperm.xlu1 %7323, %v7447_v42   ;;  %v1531_v11 = vadd.f32 %v1467_v20, %v1143_v22  ;;  %v1080_v1 = vmul.f32 %v8162_v53, %v900_v2  ;;  %v757_v47 = vmul.f32 %v8169_v35, %v10837_v30  ;;  %v7453_v30 = vld [vmem:[%s7594_s15 + $0x1a0] sm:$0xff] }
 0x18c   : > { %v1141_v32 = vadd.f32 %v1077_v63, %v753_v59  ;;  %v1713_v5 = vpack.c.bf16 %v1659_v60, %v1658_v52  ;;  %v1596_v3 = vadd.f32 %v8202_v39, %v1526_v19  ;;  %v6441_v60 = vld [vmem:[%s7594_s15 + $0x2c8] sm:$0xff] }
 0x18d   : > { %v892_v43 = vpop.permute.xlu0 %891  ;;  %3837 = vperm.xlu0 %7341, %v6434_v44   ;;  %v1601_v25 = vadd.f32 %v8202_v39, %v1531_v11  ;;  %v1144_v23 = vadd.f32 %v1080_v1, %v756_v62  ;;  %v8440_v11 = vld [vmem:[%s7594_s15 + $0x2f0] sm:$0xff] }
 0x18e   : > { %v1529_v29 = vadd.f32 %v1465_v31, %v1141_v32  ;;  %v1078_v17 = vmul.f32 %v8162_v53, %v892_v43  ;;  %v1660_v24 = vmax.f32 %v1596_v3, 0.0  ;;  %6880 = vmatmul.mubr.bf16.gmra.mrb[16].mxu0 %v1713_v5  ;;  %v7450_v31 = vld [vmem:[%s7594_s15 + $0x198] sm:$0xff]  ;;  %v759_v43 = vmul.f32 %v8169_v35, %v10838_v51 }
 0x18f   : > { %995 = vperm.xlu1 %7323, %v7448_v33   ;;  %v1280_v59 = vpop.permute.xlu1 %1279  ;;  %v1665_v28 = vmax.f32 %v1601_v25, 0.0 }
 0x190   : > { %v1142_v18 = vadd.f32 %v1078_v17, %v754_v61  ;;  %v1466_v27 = vmul.f32 %v8177_v50, %v1280_v59  ;;  %v1714_v12 = vpack.c.bf16 %v1661_v6, %v1660_v24  ;;  %v1599_v57 = vadd.f32 %v8202_v39, %v1529_v29  ;;  %v6442_v61 = vld [vmem:[%s7594_s15 + $0x2d0] sm:$0xff]  ;;  %v10839_v29 = vld [vmem:[#allocation26_spill] sm:$0xff]  ;;  %v7451_v59 = vld [vmem:[%s7594_s15 + $0x1a8] sm:$0xff] }
 0x191   : > { %v904_v55 = vpop.permute.xlu0 %903  ;;  %3853 = vperm.xlu0 %7341, %v8418_v56   ;;  %v758_v17 = vmul.f32 %v8169_v35, %v10839_v29  ;;  %v1471_v24 = vmul.f32 %v8177_v50, %v8128_v48 }
 0x192   : > { %v1530_v10 = vadd.f32 %v1466_v27, %v1142_v18  ;;  %6883 = vmatprep.mubr.bf16.mxu0 %v1714_v12  ;;  %v1663_v15 = vmax.f32 %v1599_v57, 0.0  ;;  %v1081_v58 = vmul.f32 %v8162_v53, %v904_v55  ;;  %v6449_v27 = vld [vmem:[%s7594_s15 + $0x308] sm:$0xff]  ;;  %v7452_v55 = vld [vmem:[%s7594_s15 + $0x1b0] sm:$0xff] }
 0x193   : > { %7324 = vset.pattern.permute.xlu1 %v10765_v8  ;;  %v1288_v34 = vpop.permute.xlu1 %1287 }
 0x194   : > { %v1600_v26 = vadd.f32 %v8202_v39, %v1530_v10  ;;  %v1468_v37 = vmul.f32 %v8177_v50, %v1288_v34  ;;  %1375 = vperm.xlu1 %7324, %v7449_v0   ;;  %v1715_v36 = vpack.c.bf16 %v1663_v15, %v1662_v13  ;;  %v1145_v19 = vadd.f32 %v1081_v58, %v757_v47  ;;  %v6454_v47 = vld [vmem:[%s7594_s15 + $0x330] sm:$0xff] }
 0x195   : > { %v908_v21 = vpop.permute.xlu0 %907  ;;  %3865 = vperm.xlu0 %7341, %v6441_v60   ;;  %v760_v13 = vmul.f32 %v8169_v35, %v7938_v16 }
 0x196   : > { %v1532_v20 = vadd.f32 %v1468_v37, %v1144_v23  ;;  %v1664_v54 = vmax.f32 %v1600_v26, 0.0  ;;  %6884 = vmatmul.mubr.bf16.gmra.mrb[20].mxu0 %v1715_v36  ;;  %v1082_v9 = vmul.f32 %v8162_v53, %v908_v21  ;;  %v6450_v23 = vld [vmem:[%s7594_s15 + $0x310] sm:$0xff] }
 0x197   : > { %v1292_v45 = vpop.permute.xlu1 %1291 }
 0x198   : > { %v1469_v22 = vmul.f32 %v8177_v50, %v1292_v45  ;;  %1383 = vperm.xlu1 %7324, %v7448_v33   ;;  %v1716_v63 = vpack.c.bf16 %v1665_v28, %v1664_v54  ;;  %v1602_v52 = vadd.f32 %v8202_v39, %v1532_v20  ;;  %v1146_v12 = vadd.f32 %v1082_v9, %v758_v17  ;;  %v10840_v20 = vld [vmem:[#allocation27_spill] sm:$0xff] }
 0x199   : > { %v920_v2 = vpop.permute.xlu0 %919  ;;  %3869 = vperm.xlu0 %7341, %v6442_v61   ;;  %v761_v54 = vmul.f32 %v8169_v35, %v10840_v20  ;;  %v762_v9 = vmul.f32 %v8169_v35, %v7947_v14 }
 0x19a   : > { %v1533_v46 = vadd.f32 %v1469_v22, %v1145_v19  ;;  %6887 = vmatprep.mubr.bf16.mxu0 %v1716_v63  ;;  %v1666_v6 = vmax.f32 %v1602_v52, 0.0  ;;  %v1085_v0 = vmul.f32 %v8162_v53, %v920_v2 }
 0x19c   : > { %v1603_v42 = vadd.f32 %v8202_v39, %v1533_v46  ;;  %1387 = vperm.xlu1 %7324, %v7450_v31   ;;  %v912_v32 = vpop.permute.xlu1 %911  ;;  %v1149_v63 = vadd.f32 %v1085_v0, %v761_v54  ;;  %v6457_v46 = vld [vmem:[%s7594_s15 + $0x348] sm:$0xff] }
 0x19d   : > { %v1083_v5 = vmul.f32 %v8162_v53, %v912_v32  ;;  %v8435_v3 = vpop.permute.xlu0 %923  ;;  %3885 = vperm.xlu0 %7341, %v8440_v11  }
 0x19e   : > { %v1667_v44 = vmax.f32 %v1603_v42, 0.0 }
 0x19f   : > { %v1147_v62 = vadd.f32 %v1083_v5, %v759_v43  ;;  %v7454_v5 = vld [vmem:[%s7594_s15 + $0x1b8] sm:$0xff]  ;;  %v6458_v43 = vld [vmem:[%s7594_s15 + $0x350] sm:$0xff] }
 0x1a0   : > { %7325 = vset.pattern.permute.xlu1 %v10781_v49  ;;  %v916_v1 = vpop.permute.xlu1 %915  ;;  %v1717_v33 = vpack.c.bf16 %v1667_v44, %v1666_v6  ;;  %v10841_v44 = vld [vmem:[#allocation28_spill] sm:$0xff] }
 0x1a1   : > { %1007 = vperm.xlu1 %7325, %v7451_v59   ;;  %v8449_v18 = vpop.permute.xlu0 %935  ;;  %v1535_v57 = vadd.f32 %v1471_v24, %v1147_v62  ;;  %3897 = vperm.xlu0 %7341, %v6449_v27   ;;  %v1084_v15 = vmul.f32 %v8162_v53, %v916_v1  ;;  %v763_v29 = vmul.f32 %v8169_v35, %v10841_v44 }
 0x1a2   : > { %6888 = vmatmul.mubr.bf16.gmra.mrb[24].mxu0 %v1717_v33  ;;  %v1475_v1 = vmul.f32 %v8177_v50, %v8132_v7  ;;  %v1086_v33 = vmul.f32 %v8162_v53, %v8435_v3  ;;  %v7456_v7 = vld [vmem:[%s7594_s15 + $0x1d0] sm:$0xff]  ;;  %v7427_v3 = vld [vmem:[%s10732_s5] sm:$0xff]   ;;  %v1089_v20 = vmul.f32 %v8162_v53, %v8449_v18 }
 0x1a3   : > { %v1605_v26 = vadd.f32 %v8202_v39, %v1535_v57  ;;  %v1148_v36 = vadd.f32 %v1084_v15, %v760_v13  ;;  %v6462_v57 = vld [vmem:[%s7594_s15 + $0x370] sm:$0xff]  ;;  %v6465_v15 = vld [vmem:[%s7594_s15 + $0x388] sm:$0xff]  ;;  %6927 = vmatprep.subr.bf16.mxu1 %v7427_v3 }
 0x1a4   : > { %6928 = vmatpush3.bf16.msra.mxu1 %v7427_v3 }
 0x1a5   : > { %1011 = vperm.xlu1 %7325, %v7452_v55   ;;  %v1296_v48 = vpop.permute.xlu1 %1295  ;;  %v8454_v10 = vpop.permute.xlu0 %939  ;;  %3901 = vperm.xlu0 %7341, %v6450_v23   ;;  %v1669_v45 = vmax.f32 %v1605_v26, 0.0  ;;  %v10842_v23 = vld [vmem:[#allocation30_spill] sm:$0xff] }
 0x1a6   : > { %v1470_v25 = vmul.f32 %v8177_v50, %v1296_v48  ;;  %v1150_v48 = vadd.f32 %v1086_v33, %v762_v9  ;;  %v7458_v9 = vld [vmem:[%s7594_s15 + $0x1d8] sm:$0xff] }
 0x1a8   : > { %v1534_v34 = vadd.f32 %v1470_v25, %v1146_v12 }
 0x1a9   : > { %7326 = vset.pattern.permute.xlu1 %v10765_v8  ;;  %v1304_v58 = vpop.permute.xlu1 %1303  ;;  %v8463_v37 = vpop.permute.xlu0 %951  ;;  %3917 = vperm.xlu0 %7341, %v6454_v47   ;;  %v7428_v47 = vld [vmem:[%s10732_s5 + $0x8] sm:$0xff]  }
 0x1aa   : > { %v1604_v16 = vadd.f32 %v8202_v39, %v1534_v34  ;;  %v1472_v21 = vmul.f32 %v8177_v50, %v1304_v58  ;;  %1391 = vperm.xlu1 %7326, %v7453_v30   ;;  %v764_v34 = vmul.f32 %v8169_v35, %v10842_v23  ;;  %6929 = vmatprep.subr.bf16.mxu1 %v7428_v47 }
 0x1ab   : > { %6930 = vmatpush3.bf16.msra.mxu1 %v7428_v47 }
 0x1ac   : > { %v1536_v28 = vadd.f32 %v1472_v21, %v1148_v36  ;;  %v1668_v60 = vmax.f32 %v1604_v16, 0.0  ;;  %v6466_v21 = vld [vmem:[%s7594_s15 + $0x390] sm:$0xff] }
 0x1ad   : > { %v1308_v19 = vpop.permute.xlu1 %1307  ;;  %v8472_v22 = vpop.permute.xlu0 %955  ;;  %3929 = vperm.xlu0 %7341, %v6457_v46  }
 0x1ae   : > { %v1473_v2 = vmul.f32 %v8177_v50, %v1308_v19  ;;  %1399 = vperm.xlu1 %7326, %v7452_v55   ;;  %v1718_v52 = vpack.c.bf16 %v1669_v45, %v1668_v60  ;;  %v1606_v61 = vadd.f32 %v8202_v39, %v1536_v28  ;;  %v7455_v55 = vld [vmem:[%s7594_s15 + $0x1c8] sm:$0xff]  ;;  %v7457_v45 = vld [vmem:[%s7594_s15 + $0x1c0] sm:$0xff] }
 0x1b0   : > { %v1537_v42 = vadd.f32 %v1473_v2, %v1149_v63  ;;  %6891 = vmatprep.mubr.bf16.mxu0 %v1718_v52  ;;  %v1670_v17 = vmax.f32 %v1606_v61, 0.0  ;;  %v10843_v63 = vld [vmem:[#allocation29_spill] sm:$0xff] }
 0x1b1   : > { %v8477_v31 = vpop.permute.xlu0 %967  ;;  %3933 = vperm.xlu0 %7341, %v6458_v43   ;;  %v765_v2 = vmul.f32 %v8169_v35, %v10843_v63 }
 0x1b2   : > { %v1607_v32 = vadd.f32 %v8202_v39, %v1537_v42  ;;  %1403 = vperm.xlu1 %7326, %v7454_v5   ;;  %v928_v51 = vpop.permute.xlu1 %927  ;;  %v7429_v42 = vld [vmem:[%s10732_s5 + $0x10] sm:$0xff]  }
 0x1b3   : > { %v1087_v6 = vmul.f32 %v8162_v53, %v928_v51  ;;  %6931 = vmatprep.subr.bf16.mxu1 %v7429_v42 }
 0x1b4   : > { %v1671_v24 = vmax.f32 %v1607_v32, 0.0  ;;  %v1153_v32 = vadd.f32 %v1089_v20, %v765_v2  ;;  %6932 = vmatpush3.bf16.msra.mxu1 %v7429_v42  ;;  %v10847_v20 = vld [vmem:[#allocation34_spill] sm:$0xff]  ;;  %v1093_v2 = vmul.f32 %v8162_v53, %v8463_v37 }
 0x1b5   : > { %v8487_v62 = vpop.permute.xlu0 %971  ;;  %v1151_v59 = vadd.f32 %v1087_v6, %v763_v29  ;;  %3949 = vperm.xlu0 %7341, %v6462_v57   ;;  %v8534_v29 = vld [vmem:[%s7594_s15 + $0x218] sm:$0xff] }
 0x1b6   : > { %7327 = vset.pattern.permute.xlu1 %v10781_v49  ;;  %v932_v27 = vpop.permute.xlu1 %931  ;;  %v1719_v12 = vpack.c.bf16 %v1671_v24, %v1670_v17  ;;  %v7430_v17 = vld [vmem:[%s10732_s5 + $0x18] sm:$0xff]  }
 0x1b7   : > { %1023 = vperm.xlu1 %7327, %v7455_v55   ;;  %v1539_v13 = vadd.f32 %v1475_v1, %v1151_v59  ;;  %v1088_v26 = vmul.f32 %v8162_v53, %v932_v27  ;;  %6933 = vmatprep.subr.bf16.mxu1 %v7430_v17  ;;  %v10844_v27 = vld [vmem:[#allocation31_spill] sm:$0xff] }
 0x1b8   : > { %6892 = vmatmul.mubr.bf16.gmra.mrb[28].mxu0 %v1719_v12  ;;  %v767_v12 = vmul.f32 %v8169_v35, %v10844_v27  ;;  %6934 = vmatpush3.bf16.msra.mxu1 %v7430_v17  ;;  %v8585_v17 = vld [vmem:[%s7594_s15 + $0x268] sm:$0xff] }
 0x1b9   : > { %v8496_v14 = vpop.permute.xlu0 %983  ;;  %3961 = vperm.xlu0 %7341, %v6465_v15   ;;  %v1609_v16 = vadd.f32 %v8202_v39, %v1539_v13  ;;  %v1152_v54 = vadd.f32 %v1088_v26, %v764_v34  ;;  %v10846_v15 = vld [vmem:[#allocation59_spill] sm:$0xff] }
 0x1ba   : > { %v7459_v26 = vld [vmem:[%s7594_s15 + $0x1e8] sm:$0xff] }
 0x1bb   : > { %1027 = vperm.xlu1 %7327, %v7456_v7   ;;  %v1312_v25 = vpop.permute.xlu1 %1311  ;;  %v1673_v61 = vmax.f32 %v1609_v16, 0.0 }
 0x1bc   : > { %v1474_v58 = vmul.f32 %v8177_v50, %v1312_v25  ;;  %v1090_v25 = vmul.f32 %v8162_v53, %v8454_v10 }
 0x1bd   : > { %v8507_v0 = vpop.permute.xlu0 %987  ;;  %3965 = vperm.xlu0 %7341, %v6466_v21  }
 0x1be   : > { %v1538_v36 = vadd.f32 %v1474_v58, %v1150_v48  ;;  %v10845_v48 = vld [vmem:[#allocation32_spill] sm:$0xff] }
 0x1bf   : > { %7328 = vset.pattern.permute.xlu1 %v10765_v8  ;;  %v1320_v30 = vpop.permute.xlu1 %1319  ;;  %v766_v13 = vmul.f32 %v8169_v35, %v10845_v48 }
 0x1c0   : > { %v1608_v28 = vadd.f32 %v8202_v39, %v1538_v36  ;;  %v1476_v60 = vmul.f32 %v8177_v50, %v1320_v30  ;;  %1407 = vperm.xlu1 %7328, %v7457_v45   ;;  %v8559_v36 = vld [vmem:[%s7594_s15 + $0x240] sm:$0xff]  ;;  %v7460_v30 = vld [vmem:[%s7594_s15 + $0x1f0] sm:$0xff] }
 0x1c1   : > { %v8520_v19 = vpop.permute.xlu0 %999  ;;  %7398 = vset.pattern.permute.xlu0 %v10765_v8  ;;  %v1154_v16 = vadd.f32 %v1090_v25, %v766_v13  ;;  %v7462_v13 = vld [vmem:[%s7594_s15 + $0x1f8] sm:$0xff] }
 0x1c2   : > { %v1540_v52 = vadd.f32 %v1476_v60, %v1152_v54  ;;  %v1672_v46 = vmax.f32 %v1608_v28, 0.0  ;;  %4149 = vperm.xlu0 %7398, %v8224_v4   ;;  %v768_v54 = vmul.f32 %v8169_v35, %v10847_v20 }
 0x1c3   : > { %v1324_v18 = vpop.permute.xlu1 %1323 }
 0x1c4   : > { %v1477_v5 = vmul.f32 %v8177_v50, %v1324_v18  ;;  %1415 = vperm.xlu1 %7328, %v7456_v7   ;;  %v1720_v51 = vpack.c.bf16 %v1673_v61, %v1672_v46  ;;  %v1610_v6 = vadd.f32 %v8202_v39, %v1540_v52  ;;  %v1479_v7 = vmul.f32 %v8177_v50, %v10846_v15 }
 0x1c5   : > { %v8528_v43 = vpop.permute.xlu0 %1003 }
 0x1c6   : > { %v1541_v44 = vadd.f32 %v1477_v5, %v1153_v32  ;;  %6895 = vmatprep.mubr.bf16.mxu0 %v1720_v51  ;;  %v1674_v57 = vmax.f32 %v1610_v6, 0.0  ;;  %4161 = vperm.xlu0 %7398, %v8534_v29   ;;  %v7461_v32 = vld [vmem:[%s7594_s15 + $0x1e0] sm:$0xff]  ;;  %v10848_v5 = vld [vmem:[#allocation33_spill] sm:$0xff] }
 0x1c7   : > { %v769_v51 = vmul.f32 %v8169_v35, %v10848_v5 }
 0x1c8   : > { %v1611_v24 = vadd.f32 %v8202_v39, %v1541_v44  ;;  %1419 = vperm.xlu1 %7328, %v7458_v9   ;;  %v944_v1 = vpop.permute.xlu1 %943 }
 0x1c9   : > { %v1091_v33 = vmul.f32 %v8162_v53, %v944_v1  ;;  %v8542_v59 = vpop.permute.xlu0 %1015  ;;  %v1157_v9 = vadd.f32 %v1093_v2, %v769_v51  ;;  %v8615_v2 = vld [vmem:[%s7594_s15 + $0x2a8] sm:$0xff] }
 0x1ca   : > { %v1675_v55 = vmax.f32 %v1611_v24, 0.0  ;;  %4169 = vperm.xlu0 %7398, %v8247_v40   ;;  %v8570_v40 = vld [vmem:[%s7594_s15 + $0x258] sm:$0xff] }
 0x1cb   : > { %v1155_v3 = vadd.f32 %v1091_v33, %v767_v12 }
 0x1cc   : > { %7330 = vset.pattern.permute.xlu1 %v10781_v49  ;;  %v948_v23 = vpop.permute.xlu1 %947  ;;  %v1721_v34 = vpack.c.bf16 %v1675_v55, %v1674_v57  ;;  %v8593_v55 = vld [vmem:[%s7594_s15 + $0x280] sm:$0xff] }
 0x1cd   : > { %1039 = vperm.xlu1 %7330, %v7459_v26   ;;  %v8555_v58 = vpop.permute.xlu0 %1019  ;;  %v1543_v21 = vadd.f32 %v1479_v7, %v1155_v3  ;;  %v1092_v28 = vmul.f32 %v8162_v53, %v948_v23  ;;  %v10849_v3 = vld [vmem:[#allocation35_spill] sm:$0xff] }
 0x1ce   : > { %6896 = vmatmul.mubr.bf16.gmra.mrb[32].mxu0 %v1721_v34  ;;  %4181 = vperm.xlu0 %7398, %v8559_v36   ;;  %v771_v23 = vmul.f32 %v8169_v35, %v10849_v3 }
 0x1cf   : > { %v1613_v63 = vadd.f32 %v8202_v39, %v1543_v21  ;;  %v1156_v61 = vadd.f32 %v1092_v28, %v768_v54  ;;  %v10850_v21 = vld [vmem:[#allocation60_spill] sm:$0xff] }
 0x1d1   : > { %1043 = vperm.xlu1 %7330, %v7460_v30   ;;  %v1328_v10 = vpop.permute.xlu1 %1327  ;;  %v8562_v47 = vpop.permute.xlu0 %1031  ;;  %v1677_v44 = vmax.f32 %v1613_v63, 0.0  ;;  %v1094_v63 = vmul.f32 %v8162_v53, %v8472_v22  ;;  %v8625_v22 = vld [vmem:[%s7594_s15 + $0x2c0] sm:$0xff] }
 0x1d2   : > { %v1478_v60 = vmul.f32 %v8177_v50, %v1328_v10  ;;  %4193 = vperm.xlu0 %7398, %v8570_v40   ;;  %v10851_v10 = vmov 0  }
 0x1d4   : > { %v1542_v45 = vadd.f32 %v1478_v60, %v1154_v16  ;;  %v6435_v16 = vld [vmem:[%s7594_s15 + $0x298] sm:$0xff]  ;;  %v10852_v60 = vld [vmem:[#allocation36_spill] sm:$0xff] }
 0x1d5   : > { %7331 = vset.pattern.permute.xlu1 %v10765_v8  ;;  %v1336_v52 = vpop.permute.xlu1 %1335  ;;  %v8576_v46 = vpop.permute.xlu0 %1035 }
 0x1d6   : > { %v1612_v18 = vadd.f32 %v8202_v39, %v1542_v45  ;;  %v1480_v42 = vmul.f32 %v8177_v50, %v1336_v52  ;;  %1423 = vperm.xlu1 %7331, %v7461_v32   ;;  %4201 = vperm.xlu0 %7398, %v8585_v17   ;;  %v770_v45 = vmul.f32 %v8169_v35, %v10852_v60 }
 0x1d8   : > { %v1544_v6 = vadd.f32 %v1480_v42, %v1156_v61  ;;  %v1676_v37 = vmax.f32 %v1612_v18, 0.0  ;;  %v10853_v18 = vld [vmem:[#allocation38_spill] sm:$0xff]  ;;  %v1158_v32 = vadd.f32 %v1094_v63, %v770_v45 }
 0x1d9   : > { %v1340_v24 = vpop.permute.xlu1 %1339  ;;  %v8588_v33 = vpop.permute.xlu0 %1047  ;;  %v772_v42 = vmul.f32 %v8169_v35, %v10853_v18  ;;  %v7434_v18 = vld [vmem:[%s10730_s3 + $0x18] sm:$0xff]  }
 0x1da   : > { %v1481_v1 = vmul.f32 %v8177_v50, %v1340_v24  ;;  %1431 = vperm.xlu1 %7331, %v7460_v30   ;;  %v1722_v27 = vpack.c.bf16 %v1677_v44, %v1676_v37  ;;  %v1614_v12 = vadd.f32 %v8202_v39, %v1544_v6  ;;  %4213 = vperm.xlu0 %7398, %v8593_v55   ;;  %v7431_v37 = vld [vmem:[%s10730_s3] sm:$0xff]  }
 0x1db   : > { %v1483_v30 = vmul.f32 %v8177_v50, %v10850_v21  ;;  %v8635_v24 = vld [vmem:[%s10729_s2] ss:$0 sm:$0xff]  ;;  %7067 = vmatprep.subr.bf16.mxu0 %v7431_v37 }
 0x1dc   : > { %v1545_v57 = vadd.f32 %v1481_v1, %v1157_v9  ;;  %6899 = vmatprep.mubr.bf16.mxu0 %v1722_v27  ;;  %v1678_v34 = vmax.f32 %v1614_v12, 0.0  ;;  %7068 = vmatpush3.bf16.msra.mxu0 %v7431_v37 }
 0x1de   : > { %v1615_v48 = vadd.f32 %v8202_v39, %v1545_v57  ;;  %1435 = vperm.xlu1 %7331, %v7462_v13   ;;  %v960_v15 = vpop.permute.xlu1 %959  ;;  %v8597_v7 = vpop.permute.xlu0 %1427  ;;  %4225 = vperm.xlu0 %7398, %v6435_v16  }
 0x1df   : > { %v1095_v25 = vmul.f32 %v8162_v53, %v960_v15  ;;  %v7432_v15 = vld [vmem:[%s10730_s3 + $0x8] sm:$0xff]  }
 0x1e0   : > { %v1679_v26 = vmax.f32 %v1615_v48, 0.0  ;;  %v6443_v48 = vld [vmem:[%s7594_s15 + $0x2d8] sm:$0xff]  ;;  %7069 = vmatprep.subr.bf16.mxu0 %v7432_v15 }
 0x1e1   : > { %v1159_v39 = vadd.f32 %v1095_v25, %v771_v23  ;;  %v10854_v25 = vld [vmem:[#allocation37_spill] sm:$0xff]  ;;  %7070 = vmatpush3.bf16.msra.mxu0 %v7432_v15 }
 0x1e2   : > { %7334 = vset.pattern.permute.xlu1 %v10851_v10  ;;  %v964_v20 = vpop.permute.xlu1 %963  ;;  %v1723_v54 = vpack.c.bf16 %v1679_v26, %v1678_v34  ;;  %4233 = vperm.xlu0 %7398, %v8615_v2  }
 0x1e3   : > { %3387 = vperm.xlu1 %7334, %v8291_v41   ;;  %v8608_v28 = vpop.permute.xlu0 %3382  ;;  %v1547_v52 = vadd.f32 %v1483_v30, %v1159_v39  ;;  %v1096_v5 = vmul.f32 %v8162_v53, %v964_v20  ;;  %v8655_v39 = vld [vmem:[%s7594_s15 + $0x2e8] sm:$0xff]  ;;  %v7433_v20 = vld [vmem:[%s10730_s3 + $0x10] sm:$0xff]  }
 0x1e4   : > { %6900 = vmatmul.mubr.bf16.gmra.mrb[36].mxu0 %v1723_v54  ;;  %7071 = vmatprep.subr.bf16.mxu0 %v7433_v20 }
 0x1e5   : > { %v1617_v9 = vadd.f32 %v8635_v24, %v1547_v52  ;;  %v1160_v27 = vadd.f32 %v1096_v5, %v772_v42  ;;  %7072 = vmatpush3.bf16.msra.mxu0 %v7433_v20  ;;  %v10855_v5 = vld [vmem:[#allocation39_spill] sm:$0xff] }
 0x1e6   : > { %4245 = vperm.xlu0 %7398, %v8625_v22   ;;  %7073 = vmatprep.subr.bf16.mxu0 %v7434_v18 }
 0x1e7   : > { %7335 = vset.pattern.permute.xlu1 %v10781_v49  ;;  %v1344_v61 = vpop.permute.xlu1 %1343  ;;  %v8627_v6 = vpop.permute.xlu0 %3407  ;;  %v1681_v34 = vmax.f32 %v1617_v9, 0.0  ;;  %v10856_v9 = vld [vmem:[#allocation61_spill] sm:$0xff] }
 0x1e8   : > { %v1482_v51 = vmul.f32 %v8177_v50, %v1344_v61  ;;  %3765 = vperm.xlu1 %7335, %v8224_v4   ;;  %v1097_v4 = vmul.f32 %v8162_v53, %v8477_v31  ;;  %v773_v31 = vmul.f32 %v8169_v35, %v10854_v25  ;;  %v8667_v61 = vld [vmem:[%s7594_s15 + $0x300] sm:$0xff] }
 0x1e9   : > { %7074 = vmatpush3.bf16.msra.mxu0 %v7434_v18 }
 0x1ea   : > { %v1546_v44 = vadd.f32 %v1482_v51, %v1158_v32  ;;  %4257 = vperm.xlu0 %7398, %v6443_v48   ;;  %v1161_v16 = vadd.f32 %v1097_v4, %v773_v31  ;;  %v775_v51 = vmul.f32 %v8169_v35, %v10855_v5  ;;  %v7435_v48 = vld [vmem:[%s10730_s3 + $0x20] sm:$0xff]   ;;  %v1098_v31 = vmul.f32 %v8162_v53, %v8487_v62 }
 0x1eb   : > { %v1352_v1 = vpop.permute.xlu1 %1351  ;;  %v8645_v13 = vpop.permute.xlu0 %3412  ;;  %7075 = vmatprep.subr.bf16.mxu0 %v7435_v48 }
 0x1ec   : > { %v1616_v12 = vadd.f32 %v8635_v24, %v1546_v44  ;;  %v1484_v57 = vmul.f32 %v8177_v50, %v1352_v1  ;;  %7336 = vset.pattern.permute.xlu1 %v10851_v10  ;;  %v1487_v1 = vmul.f32 %v8177_v50, %v10856_v9  ;;  %v10859_v9 = vld [vmem:[#allocation41_spill] sm:$0xff] }
 0x1ed   : > { %3392 = vperm.xlu1 %7336, %v8310_v38   ;;  %7076 = vmatpush3.bf16.msra.mxu0 %v7435_v48 }
 0x1ee   : > { %v1548_v3 = vadd.f32 %v1484_v57, %v1160_v27  ;;  %v1680_v23 = vmax.f32 %v1616_v12, 0.0  ;;  %4265 = vperm.xlu0 %7398, %v8655_v39   ;;  %v6451_v57 = vld [vmem:[%s7594_s15 + $0x318] sm:$0xff] }
 0x1ef   : > { %v1356_v26 = vpop.permute.xlu1 %1355 }
 0x1f0   : > { %v1485_v21 = vmul.f32 %v8177_v50, %v1356_v26  ;;  %v1724_v30 = vpack.c.bf16 %v1681_v34, %v1680_v23  ;;  %v8661_v54 = vpop.permute.xlu0 %3769  ;;  %v1618_v60 = vadd.f32 %v8635_v24, %v1548_v3  ;;  %v8695_v23 = vld [vmem:[%s7594_s15 + $0x328] sm:$0xff] }
 0x1f1   : > { %3397 = vperm.xlu1 %7336, %v8534_v29   ;;  %v7436_v34 = vld [vmem:[%s10730_s3 + $0x28] sm:$0xff]  }
 0x1f2   : > { %v1549_v45 = vadd.f32 %v1485_v21, %v1161_v16  ;;  %6903 = vmatprep.mubr.bf16.mxu0 %v1724_v30  ;;  %v1682_v37 = vmax.f32 %v1618_v60, 0.0  ;;  %4277 = vperm.xlu0 %7398, %v8667_v61   ;;  %v10858_v30 = vld [vmem:[#allocation42_spill] sm:$0xff] }
 0x1f3   : > { %7077 = vmatprep.subr.bf16.mxu0 %v7436_v34  ;;  %v776_v20 = vmul.f32 %v8169_v35, %v10858_v30 }
 0x1f4   : > { %v1619_v63 = vadd.f32 %v8635_v24, %v1549_v45  ;;  %v976_v52 = vpop.permute.xlu1 %975  ;;  %v8674_v32 = vpop.permute.xlu0 %3773  ;;  %7078 = vmatpush3.bf16.msra.mxu0 %v7436_v34 }
 0x1f5   : > { %v1099_v42 = vmul.f32 %v8162_v53, %v976_v52  ;;  %7337 = vset.pattern.permute.xlu1 %v10781_v49  ;;  %v7437_v52 = vld [vmem:[%s10730_s3 + $0x30] sm:$0xff]  }
 0x1f6   : > { %3777 = vperm.xlu1 %7337, %v8534_v29   ;;  %v1683_v44 = vmax.f32 %v1619_v63, 0.0  ;;  %v10857_v29 = vld [vmem:[#allocation40_spill] sm:$0xff]  ;;  %4289 = vperm.xlu0 %7398, %v6451_v57   ;;  %v8710_v63 = vld [vmem:[%s7594_s15 + $0x340] sm:$0xff]  ;;  %v7438_v57 = vld [vmem:[%s10730_s3 + $0x38] sm:$0xff]  }
 0x1f7   : > { %v1163_v4 = vadd.f32 %v1099_v42, %v775_v51  ;;  %v774_v25 = vmul.f32 %v8169_v35, %v10857_v29  ;;  %v8716_v42 = vld [vmem:[%s7594_s15 + $0x220] sm:$0xff]  ;;  %7079 = vmatprep.subr.bf16.mxu0 %v7437_v52 }
 0x1f8   : > { %v980_v27 = vpop.permute.xlu1 %979  ;;  %v1725_v12 = vpack.c.bf16 %v1683_v44, %v1682_v37  ;;  %v8686_v15 = vpop.permute.xlu0 %3789  ;;  %7080 = vmatpush3.bf16.msra.mxu0 %v7437_v52 }
 0x1f9   : > { %v1551_v3 = vadd.f32 %v1487_v1, %v1163_v4  ;;  %v1162_v62 = vadd.f32 %v1098_v31, %v774_v25  ;;  %v1100_v21 = vmul.f32 %v8162_v53, %v980_v27  ;;  %v777_v1 = vmul.f32 %v8169_v35, %v10859_v9  ;;  %7081 = vmatprep.subr.bf16.mxu0 %v7438_v57 }
 0x1fa   : > { %7338 = vset.pattern.permute.xlu1 %v10765_v8  ;;  %6904 = vmatmul.mubr.bf16.gmra.mrb[40].mxu0 %v1725_v12  ;;  %v6459_v12 = vld [vmem:[%s7594_s15 + $0x358] sm:$0xff] }
 0x1fb   : > { %4153 = vperm.xlu1 %7338, %v8291_v41   ;;  %4297 = vperm.xlu0 %7398, %v8695_v23   ;;  %v1621_v45 = vadd.f32 %v8635_v24, %v1551_v3  ;;  %v1164_v5 = vadd.f32 %v1100_v21, %v776_v20 }
 0x1fc   : > { %v8700_v16 = vpop.permute.xlu0 %3801  ;;  %7082 = vmatpush3.bf16.msra.mxu0 %v7438_v57 }
 0x1fd   : > { %v1360_v26 = vpop.permute.xlu1 %1359 }
 0x1fe   : > { %v1486_v41 = vmul.f32 %v8177_v50, %v1360_v26 }
 0x1ff   : > { %4157 = vperm.xlu1 %7338, %v8310_v38   ;;  %v1101_v38 = vmul.f32 %v8162_v53, %v8496_v14  ;;  %4309 = vperm.xlu0 %7398, %v8710_v63   ;;  %v1685_v14 = vmax.f32 %v1621_v45, 0.0 }
 0x200   : > { %v1550_v60 = vadd.f32 %v1486_v41, %v1162_v62  ;;  %v8722_v44 = vpop.permute.xlu0 %3805  ;;  %v8739_v62 = vld [vmem:[%s7594_s15 + $0x368] sm:$0xff] }
 0x201   : > { %v1368_v18 = vpop.permute.xlu1 %1367  ;;  %v1165_v29 = vadd.f32 %v1101_v38, %v777_v1  ;;  %v8750_v38 = vld [vmem:[%s7594_s15 + $0x380] sm:$0xff] }
 0x202   : > { %v1620_v51 = vadd.f32 %v8635_v24, %v1550_v60  ;;  %v1488_v37 = vmul.f32 %v8177_v50, %v1368_v18  ;;  %v10860_v60 = vld [vmem:[#allocation43_spill] sm:$0xff] }
 0x203   : > { %7339 = vset.pattern.permute.xlu1 %v10851_v10  ;;  %4321 = vperm.xlu0 %7398, %v6459_v12   ;;  %v779_v45 = vmul.f32 %v8169_v35, %v10860_v60  ;;  %v10862_v12 = vld [vmem:[#allocation44_spill] sm:$0xff]  ;;  %v10863_v60 = vld [vmem:[#allocation46_spill] sm:$0xff] }
 0x204   : > { %v1552_v4 = vadd.f32 %v1488_v37, %v1164_v5  ;;  %3402 = vperm.xlu1 %7339, %v8716_v42   ;;  %v1684_v27 = vmax.f32 %v1620_v51, 0.0  ;;  %v8734_v3 = vpop.permute.xlu0 %3821  ;;  %v7464_v5 = vld [vmem:[%s7594_s15 + $0x228] sm:$0xff]  ;;  %v10861_v51 = vld [vmem:[#allocation62_spill] sm:$0xff]  ;;  %v778_v57 = vmul.f32 %v8169_v35, %v10862_v12  ;;  %v10864_v12 = vld [vmem:[#allocation45_spill] sm:$0xff] }
 0x205   : > { %v1372_v48 = vpop.permute.xlu1 %1371  ;;  %v1491_v37 = vmul.f32 %v8177_v50, %v10861_v51 }
 0x206   : > { %v1489_v25 = vmul.f32 %v8177_v50, %v1372_v48  ;;  %v1726_v31 = vpack.c.bf16 %v1685_v14, %v1684_v27  ;;  %v1622_v34 = vadd.f32 %v8635_v24, %v1552_v4  ;;  %v6423_v27 = vld [vmem:[%s7594_s15 + $0x238] sm:$0xff]  ;;  %v1102_v48 = vmul.f32 %v8162_v53, %v8507_v0 }
 0x207   : > { %4329 = vperm.xlu0 %7398, %v8739_v62   ;;  %v780_v0 = vmul.f32 %v8169_v35, %v10863_v60 }
 0x208   : > { %v1553_v26 = vadd.f32 %v1489_v25, %v1165_v29  ;;  %7340 = vset.pattern.permute.xlu1 %v10781_v49  ;;  %6907 = vmatprep.mubr.bf16.mxu0 %v1726_v31  ;;  %v8743_v30 = vpop.permute.xlu0 %3833  ;;  %v1686_v52 = vmax.f32 %v1622_v34, 0.0  ;;  %v6467_v29 = vld [vmem:[%s7594_s15 + $0x398] sm:$0xff]  ;;  %v1166_v34 = vadd.f32 %v1102_v48, %v778_v57  ;;  %v781_v57 = vmul.f32 %v8169_v35, %v10864_v12 }
 0x209   : > { %3781 = vperm.xlu1 %7340, %v8716_v42  }
 0x20a   : > { %v1623_v21 = vadd.f32 %v8635_v24, %v1553_v26  ;;  %v992_v41 = vpop.permute.xlu1 %991 }
 0x20b   : > { %v1103_v20 = vmul.f32 %v8162_v53, %v992_v41  ;;  %4341 = vperm.xlu0 %7398, %v8750_v38   ;;  %v8768_v41 = vld [vmem:[%s7594_s15 + $0x3a8] sm:$0xff] }
 0x20c   : > { %v1687_v18 = vmax.f32 %v1623_v21, 0.0  ;;  %v8757_v14 = vpop.permute.xlu0 %3837 }
 0x20d   : > { %3785 = vperm.xlu1 %7340, %v7464_v5   ;;  %v1167_v9 = vadd.f32 %v1103_v20, %v779_v45  ;;  %v1105_v5 = vmul.f32 %v8162_v53, %v8520_v19 }
 0x20e   : > { %v996_v1 = vpop.permute.xlu1 %995  ;;  %v1727_v4 = vpack.c.bf16 %v1687_v18, %v1686_v52 }
 0x20f   : > { %v1555_v25 = vadd.f32 %v1491_v37, %v1167_v9  ;;  %4353 = vperm.xlu0 %7398, %v6467_v29   ;;  %v1104_v26 = vmul.f32 %v8162_v53, %v996_v1  ;;  %v6472_v1 = vld [vmem:[%s7594_s15 + $0x3c0] sm:$0xff]  ;;  %v1169_v19 = vadd.f32 %v1105_v5, %v781_v57  ;;  %v10866_v57 = vld [vmem:[#allocation63_spill] sm:$0xff] }
 0x210   : > { %6908 = vmatmul.mubr.bf16.gmra.mrb[44].mxu0 %v1727_v4  ;;  %v8770_v20 = vpop.permute.xlu0 %3853 }
 0x211   : > { %7342 = vset.pattern.permute.xlu1 %v10851_v10  ;;  %v1625_v52 = vadd.f32 %v8635_v24, %v1555_v25  ;;  %v1168_v51 = vadd.f32 %v1104_v26, %v780_v0 }
 0x212   : > { %3417 = vperm.xlu1 %7342, %v6423_v27  }
 0x213   : > { %v1376_v31 = vpop.permute.xlu1 %1375  ;;  %4361 = vperm.xlu0 %7398, %v8768_v41   ;;  %v1689_v25 = vmax.f32 %v1625_v52, 0.0 }
 0x214   : > { %v1490_v21 = vmul.f32 %v8177_v50, %v1376_v31  ;;  %v8782_v4 = vpop.permute.xlu0 %3865 }
 0x216   : > { %v1554_v45 = vadd.f32 %v1490_v21, %v1166_v34  ;;  %7343 = vset.pattern.permute.xlu1 %v10781_v49  ;;  %v6475_v21 = vld [vmem:[%s7594_s15 + $0x3d8] sm:$0xff] }
 0x217   : > { %3793 = vperm.xlu1 %7343, %v6423_v27   ;;  %v1384_v18 = vpop.permute.xlu1 %1383  ;;  %4373 = vperm.xlu0 %7398, %v6472_v1  }
 0x218   : > { %v1624_v37 = vadd.f32 %v8635_v24, %v1554_v45  ;;  %v1492_v9 = vmul.f32 %v8177_v50, %v1384_v18  ;;  %v8790_v60 = vpop.permute.xlu0 %3869  ;;  %v7465_v18 = vld [vmem:[%s7594_s15 + $0x230] sm:$0xff] }
 0x21a   : > { %v1556_v48 = vadd.f32 %v1492_v9, %v1168_v51  ;;  %v1688_v29 = vmax.f32 %v1624_v37, 0.0  ;;  %v10865_v9 = vld [vmem:[#allocation47_spill] sm:$0xff] }
 0x21b   : > { %7344 = vset.pattern.permute.xlu1 %v10765_v8  ;;  %v1388_v31 = vpop.permute.xlu1 %1387  ;;  %4385 = vperm.xlu0 %7398, %v6475_v21   ;;  %v1106_v21 = vmul.f32 %v8162_v53, %v8528_v43  ;;  %v10868_v43 = vld [vmem:[#allocation50_spill] sm:$0xff] }
 0x21c   : > { %v1493_v34 = vmul.f32 %v8177_v50, %v1388_v31  ;;  %4165 = vperm.xlu1 %7344, %v8716_v42   ;;  %v1728_v26 = vpack.c.bf16 %v1689_v25, %v1688_v29  ;;  %v1626_v0 = vadd.f32 %v8635_v24, %v1556_v48  ;;  %v8795_v37 = vpop.permute.xlu0 %3885  ;;  %v783_v42 = vmul.f32 %v8169_v35, %v10865_v9 }
 0x21d   : > { %v1495_v48 = vmul.f32 %v8177_v50, %v10866_v57  ;;  %v784_v9 = vmul.f32 %v8169_v35, %v10868_v43  ;;  %v8826_v57 = vld [vmem:[%s7594_s15 + $0x270] sm:$0xff] }
 0x21e   : > { %v1557_v45 = vadd.f32 %v1493_v34, %v1169_v19  ;;  %6911 = vmatprep.mubr.bf16.mxu0 %v1728_v26  ;;  %v1690_v1 = vmax.f32 %v1626_v0, 0.0  ;;  %v10867_v34 = vld [vmem:[#allocation48_spill] sm:$0xff] }
 0x21f   : > { %7411 = vset.pattern.permute.xlu0 %v10851_v10  ;;  %v782_v26 = vmul.f32 %v8169_v35, %v10867_v34 }
 0x220   : > { %v1627_v52 = vadd.f32 %v8635_v24, %v1557_v45  ;;  %4173 = vperm.xlu1 %7344, %v7465_v18   ;;  %v1008_v51 = vpop.permute.xlu1 %1007  ;;  %3422 = vperm.xlu0 %7411, %v8559_v36   ;;  %v8804_v19 = vpop.permute.xlu0 %3897 }
 0x221   : > { %v1107_v5 = vmul.f32 %v8162_v53, %v1008_v51  ;;  %v1170_v18 = vadd.f32 %v1106_v21, %v782_v26  ;;  %v10869_v26 = vld [vmem:[#allocation49_spill] sm:$0xff] }
 0x222   : > { %v1691_v12 = vmax.f32 %v1627_v52, 0.0  ;;  %v785_v21 = vmul.f32 %v8169_v35, %v10869_v26 }
 0x223   : > { %v1171_v29 = vadd.f32 %v1107_v5, %v783_v42 }
 0x224   : > { %4177 = vperm.xlu1 %7344, %v6423_v27   ;;  %v1012_v25 = vpop.permute.xlu1 %1011  ;;  %v1729_v31 = vpack.c.bf16 %v1691_v12, %v1690_v1  ;;  %v8811_v45 = vpop.permute.xlu0 %3901  ;;  %3447 = vperm.xlu0 %7411, %v8585_v17   ;;  %v8815_v27 = vld [vmem:[%s7594_s15 + $0x248] sm:$0xff] }
 0x225   : > { %v1559_v0 = vadd.f32 %v1495_v48, %v1171_v29  ;;  %v1108_v51 = vmul.f32 %v8162_v53, %v1012_v25  ;;  %v1109_v29 = vmul.f32 %v8162_v53, %v8542_v59 }
 0x226   : > { %6912 = vmatmul.mubr.bf16.gmra.mrb[48].mxu0 %v1729_v31 }
 0x227   : > { %v1629_v1 = vadd.f32 %v8635_v24, %v1559_v0  ;;  %v1172_v25 = vadd.f32 %v1108_v51, %v784_v9  ;;  %v1173_v59 = vadd.f32 %v1109_v29, %v785_v21 }
 0x228   : > { %7345 = vset.pattern.permute.xlu1 %v10851_v10  ;;  %v8823_v12 = vpop.permute.xlu0 %3917  ;;  %3452 = vperm.xlu0 %7411, %v8826_v57  }
 0x229   : > { %3427 = vperm.xlu1 %7345, %v8815_v27   ;;  %v1392_v52 = vpop.permute.xlu1 %1391 }
 0x22a   : > { %v1494_v5 = vmul.f32 %v8177_v50, %v1392_v52 }
 0x22c   : > { %v1558_v42 = vadd.f32 %v1494_v5, %v1170_v18  ;;  %v1693_v18 = vmax.f32 %v1629_v1, 0.0  ;;  %v8837_v5 = vpop.permute.xlu0 %3929  ;;  %3462 = vperm.xlu0 %7411, %v8593_v55  }
 0x22d   : > { %7346 = vset.pattern.permute.xlu1 %v10781_v49  ;;  %v1400_v48 = vpop.permute.xlu1 %1399  ;;  %10870 = vst [vmem:[#allocation5_spill] sm:$0xff] %v8837_v5 }
 0x22e   : > { %v1628_v31 = vadd.f32 %v8635_v24, %v1558_v42  ;;  %v1496_v34 = vmul.f32 %v8177_v50, %v1400_v48  ;;  %3797 = vperm.xlu1 %7346, %v8559_v36   ;;  %v7468_v42 = vld [vmem:[%s7594_s15 + $0x250] sm:$0xff] }
 0x230   : > { %v1560_v0 = vadd.f32 %v1496_v34, %v1172_v25  ;;  %v1692_v52 = vmax.f32 %v1628_v31, 0.0  ;;  %v8844_v25 = vpop.permute.xlu0 %3933  ;;  %3487 = vperm.xlu0 %7411, %v8615_v2   ;;  %v10872_v34 = vld [vmem:[#allocation51_spill] sm:$0xff] }
 0x231   : > { %v1404_v43 = vpop.permute.xlu1 %1403  ;;  %10871 = vst [vmem:[#allocation4_spill] sm:$0xff] %v8844_v25  ;;  %v787_v26 = vmul.f32 %v8169_v35, %v10872_v34 }
 0x232   : > { %v1497_v51 = vmul.f32 %v8177_v50, %v1404_v43  ;;  %7347 = vset.pattern.permute.xlu1 %v10851_v10  ;;  %v1730_v9 = vpack.c.bf16 %v1693_v18, %v1692_v52  ;;  %v1630_v36 = vadd.f32 %v8635_v24, %v1560_v0  ;;  %v10874_v0 = vld [vmem:[#allocation64_spill] sm:$0xff] }
 0x233   : > { %3432 = vperm.xlu1 %7347, %v7468_v42   ;;  %v1499_v43 = vmul.f32 %v8177_v50, %v10874_v0 }
 0x234   : > { %v1561_v48 = vadd.f32 %v1497_v51, %v1173_v59  ;;  %6915 = vmatprep.mubr.bf16.mxu0 %v1730_v9  ;;  %v1694_v21 = vmax.f32 %v1630_v36, 0.0  ;;  %v8852_v18 = vpop.permute.xlu0 %3949  ;;  %3492 = vperm.xlu0 %7411, %v8418_v56   ;;  %v10875_v9 = vld [vmem:[#allocation52_spill] sm:$0xff] }
 0x235   : > { %10873 = vst [vmem:[#allocation6_spill] sm:$0xff] %v8852_v18  ;;  %v8895_v18 = vld [vmem:[%s7594_s15 + $0x260] sm:$0xff] }
 0x236   : > { %v1631_v1 = vadd.f32 %v8635_v24, %v1561_v48  ;;  %v1024_v31 = vpop.permute.xlu1 %1023  ;;  %v786_v48 = vmul.f32 %v8169_v35, %v10875_v9 }
 0x237   : > { %v1111_v29 = vmul.f32 %v8162_v53, %v1024_v31  ;;  %3437 = vperm.xlu1 %7347, %v8570_v40   ;;  %v1110_v31 = vmul.f32 %v8162_v53, %v8555_v58  ;;  %v8872_v58 = vld [vmem:[%s10731_s4] ss:$0 sm:$0xff] }
 0x238   : > { %v1695_v52 = vmax.f32 %v1631_v1, 0.0  ;;  %v8863_v36 = vpop.permute.xlu0 %3961  ;;  %3502 = vperm.xlu0 %7411, %v8625_v22   ;;  %v10878_v22 = vld [vmem:[#allocation54_spill] sm:$0xff] }
 0x239   : > { %v1175_v2 = vadd.f32 %v1111_v29, %v787_v26  ;;  %10876 = vst [vmem:[#allocation7_spill] sm:$0xff] %v8863_v36  ;;  %v1174_v29 = vadd.f32 %v1110_v31, %v786_v48 }
 0x23a   : > { %v1028_v59 = vpop.permute.xlu1 %1027  ;;  %v1731_v51 = vpack.c.bf16 %v1695_v52, %v1694_v21  ;;  %v788_v21 = vmul.f32 %v8169_v35, %v10878_v22 }
 0x23b   : > { %7348 = vset.pattern.permute.xlu1 %v10781_v49  ;;  %v1563_v56 = vadd.f32 %v1499_v43, %v1175_v2  ;;  %v1112_v34 = vmul.f32 %v8162_v53, %v1028_v59  ;;  %v1113_v2 = vmul.f32 %v8162_v53, %v8562_v47 }
 0x23c   : > { %3809 = vperm.xlu1 %7348, %v8570_v40   ;;  %6916 = vmatmul.mubr.bf16.gmra.mrb[52].mxu0 %v1731_v51  ;;  %v8874_v40 = vpop.permute.xlu0 %3965 }
 0x23d   : > { %10877 = vst [vmem:[#allocation2_spill] sm:$0xff] %v8874_v40  ;;  %3527 = vperm.xlu0 %7411, %v8655_v39   ;;  %v1633_v43 = vadd.f32 %v8635_v24, %v1563_v56  ;;  %v1176_v48 = vadd.f32 %v1112_v34, %v788_v21 }
 0x23f   : > { %v1408_v1 = vpop.permute.xlu1 %1407 }
 0x240   : > { %v1498_v26 = vmul.f32 %v8177_v50, %v1408_v1  ;;  %7349 = vset.pattern.permute.xlu1 %v10765_v8 }
 0x241   : > { %4185 = vperm.xlu1 %7349, %v8815_v27   ;;  %v6865_v0 = vpop.f32.mrb[0].mxu0  ;;  %v8890_v47 = vpop.permute.xlu0 %4149  ;;  %3532 = vperm.xlu0 %7411, %v8440_v11  }
 0x242   : > { %v1562_v52 = vadd.f32 %v1498_v26, %v1174_v29  ;;  %v1850_v59 = vadd.f32 %v6865_v0, %v8872_v58  ;;  %v1841_v51 = vpop.f32.mrb[1].mxu0  ;;  %v10879_v29 = vld [vmem:[#allocation53_spill] sm:$0xff]  ;;  %v1697_v0 = vmax.f32 %v1633_v43, 0.0 }
 0x243   : > { %v1416_v9 = vpop.permute.xlu1 %1415  ;;  %v1842_v27 = vadd.f32 %v8872_v58, %v1841_v51  ;;  %v6866_v1 = vpop.f32.mrb[2].mxu0  ;;  %v789_v26 = vmul.f32 %v8169_v35, %v10879_v29 }
 0x244   : > { %v1632_v31 = vadd.f32 %v8635_v24, %v1562_v52  ;;  %v1500_v39 = vmul.f32 %v8177_v50, %v1416_v9  ;;  %v1853_v56 = vadd.f32 %v6866_v1, %v8872_v58  ;;  %v1844_v22 = vpop.f32.mrb[3].mxu0  ;;  %v2098_v9 = vmax.f32 %v1850_v59, 0.0 }
 0x245   : > { %4189 = vperm.xlu1 %7349, %v7468_v42   ;;  %v1845_v21 = vadd.f32 %v8872_v58, %v1844_v22  ;;  %v1177_v51 = vadd.f32 %v1113_v2, %v789_v26  ;;  %v2096_v29 = vmax.f32 %v1842_v27, 0.0  ;;  %v8899_v11 = vpop.permute.xlu0 %4161  ;;  %3542 = vperm.xlu0 %7411, %v8667_v61  }
 0x246   : > { %v1564_v34 = vadd.f32 %v1500_v39, %v1176_v48  ;;  %v1696_v52 = vmax.f32 %v1632_v31, 0.0  ;;  %v2099_v40 = vmax.f32 %v1853_v56, 0.0 }
 0x247   : > { %v1420_v36 = vpop.permute.xlu1 %1419  ;;  %v2097_v25 = vmax.f32 %v1845_v21, 0.0 }
 0x248   : > { %v1501_v1 = vmul.f32 %v8177_v50, %v1420_v36  ;;  %v1732_v42 = vpack.c.bf16 %v1697_v0, %v1696_v52  ;;  %v2161_v5 = vpack.c.bf16 %v2099_v40, %v2098_v9  ;;  %v1634_v43 = vadd.f32 %v8635_v24, %v1564_v34  ;;  %v10880_v0 = vld [vmem:[#allocation55_spill] sm:$0xff] }
 0x249   : > { %7350 = vset.pattern.permute.xlu1 %v10851_v10  ;;  %v6869_v59 = vpop.f32.mrb[4].mxu0  ;;  %v2160_v48 = vpack.c.bf16 %v2097_v25, %v2096_v29  ;;  %v8911_v34 = vpop.permute.xlu0 %4169  ;;  %3567 = vperm.xlu0 %7411, %v8695_v23   ;;  %v1503_v23 = vmul.f32 %v8177_v50, %v8597_v7 }
 0x24a   : > { %v1565_v2 = vadd.f32 %v1501_v1, %v1177_v51  ;;  %3442 = vperm.xlu1 %7350, %v8895_v18   ;;  %6919 = vmatprep.mubr.bf16.mxu0 %v1732_v42  ;;  %v1866_v31 = vadd.f32 %v6869_v59, %v8872_v58  ;;  %v1857_v36 = vpop.f32.mrb[5].mxu0  ;;  %v1698_v21 = vmax.f32 %v1634_v43, 0.0  ;;  %v791_v51 = vmul.f32 %v8169_v35, %v10880_v0  ;;  %v7469_v43 = vld [vmem:[%s7594_s15 + $0x330] sm:$0xff]  ;;  %v8935_v0 = vld [vmem:[%s7594_s15 + $0x278] sm:$0xff] }
 0x24b   : > { %v1858_v27 = vadd.f32 %v8872_v58, %v1857_v36  ;;  %v6870_v39 = vpop.f32.mrb[6].mxu0  ;;  %6935 = vmatprep.mubr.msk.bf16.mxu1 %vm2231_vm0, %v2160_v48 }
 0x24c   : > { %v1635_v40 = vadd.f32 %v8635_v24, %v1565_v2  ;;  %v1040_v26 = vpop.permute.xlu1 %1039  ;;  %v1869_v61 = vadd.f32 %v6870_v39, %v8872_v58  ;;  %v1860_v22 = vpop.f32.mrb[7].mxu0  ;;  %6936 = vmatmul.mubr.msk.bf16.vlgmr.msra.gmra.mrb[0].mxu1 %vm2231_vm0, %v2161_v5  ;;  %v2102_v9 = vmax.f32 %v1866_v31, 0.0  ;;  %v1114_v31 = vmul.f32 %v8162_v53, %v8576_v46 }
 0x24d   : > { %v1115_v56 = vmul.f32 %v8162_v53, %v1040_v26  ;;  %v1861_v25 = vadd.f32 %v8872_v58, %v1860_v22  ;;  %v2100_v1 = vmax.f32 %v1858_v27, 0.0  ;;  %v8921_v36 = vpop.permute.xlu0 %4181  ;;  %3572 = vperm.xlu0 %7411, %v7469_v43  }
 0x24e   : > { %7351 = vset.pattern.permute.xlu1 %v10781_v49  ;;  %v1699_v52 = vmax.f32 %v1635_v40, 0.0  ;;  %v2103_v29 = vmax.f32 %v1869_v61, 0.0  ;;  %v10881_v40 = vld [vmem:[#allocation56_spill] sm:$0xff] }
 0x24f   : > { %3813 = vperm.xlu1 %7351, %v8895_v18   ;;  %v2101_v5 = vmax.f32 %v1861_v25, 0.0  ;;  %v1179_v48 = vadd.f32 %v1115_v56, %v791_v51  ;;  %v790_v39 = vmul.f32 %v8169_v35, %v10881_v40 }
 0x250   : > { %v1044_v42 = vpop.permute.xlu1 %1043  ;;  %v1733_v2 = vpack.c.bf16 %v1699_v52, %v1698_v21  ;;  %v2163_v59 = vpack.c.bf16 %v2103_v29, %v2102_v9 }
 0x251   : > { %v2162_v27 = vpack.c.bf16 %v2101_v5, %v2100_v1  ;;  %v6873_v26 = vpop.f32.mrb[8].mxu0  ;;  %v1567_v25 = vadd.f32 %v1503_v23, %v1179_v48  ;;  %3582 = vperm.xlu0 %7411, %v8710_v63   ;;  %v1178_v51 = vadd.f32 %v1114_v31, %v790_v39  ;;  %v1116_v9 = vmul.f32 %v8162_v53, %v1044_v42  ;;  %v8941_v1 = vpop.permute.xlu0 %4193  ;;  %v10882_v23 = vld [vmem:[#allocation58_spill] sm:$0xff] }
 0x252   : > { %6920 = vmatmul.mubr.bf16.gmra.mrb[56].mxu0 %v1733_v2  ;;  %v1882_v61 = vadd.f32 %v6873_v26, %v8872_v58  ;;  %v1873_v22 = vpop.f32.mrb[9].mxu0  ;;  %v1117_v63 = vmul.f32 %v8162_v53, %v8588_v33 }
 0x253   : > { %3817 = vperm.xlu1 %7351, %v8585_v17   ;;  %v1874_v7 = vadd.f32 %v8872_v58, %v1873_v22  ;;  %v6874_v56 = vpop.f32.mrb[10].mxu0  ;;  %6939 = vmatprep.mubr.msk.bf16.mxu1 %vm2231_vm0, %v2162_v27  ;;  %v1637_v31 = vadd.f32 %v8635_v24, %v1567_v25 }
 0x254   : > { %v1885_v21 = vadd.f32 %v6874_v56, %v8872_v58  ;;  %v1876_v52 = vpop.f32.mrb[11].mxu0  ;;  %6940 = vmatmul.mubr.msk.bf16.gmra.mrb[4].mxu1 %vm2231_vm0, %v2163_v59  ;;  %v2106_v5 = vmax.f32 %v1882_v61, 0.0  ;;  %v792_v59 = vmul.f32 %v8169_v35, %v10882_v23 }
 0x255   : > { %v1424_v46 = vpop.permute.xlu1 %1423  ;;  %v1877_v17 = vadd.f32 %v8872_v58, %v1876_v52  ;;  %v2104_v48 = vmax.f32 %v1874_v7, 0.0  ;;  %3607 = vperm.xlu0 %7411, %v8739_v62   ;;  %v8953_v56 = vpop.permute.xlu0 %4201 }
 0x256   : > { %v1502_v29 = vmul.f32 %v8177_v50, %v1424_v46  ;;  %v2107_v2 = vmax.f32 %v1885_v21, 0.0  ;;  %v1180_v27 = vadd.f32 %v1116_v9, %v792_v59  ;;  %v10883_v46 = vld [vmem:[#allocation57_spill] sm:$0xff] }
 0x257   : > { %7352 = vset.pattern.permute.xlu1 %v10851_v10  ;;  %v2105_v43 = vmax.f32 %v1877_v17, 0.0  ;;  %v793_v33 = vmul.f32 %v8169_v35, %v10883_v46 }
 0x258   : > { %v1566_v40 = vadd.f32 %v1502_v29, %v1178_v51  ;;  %3457 = vperm.xlu1 %7352, %v8935_v0   ;;  %v2165_v42 = vpack.c.bf16 %v2107_v2, %v2106_v5  ;;  %v1701_v2 = vmax.f32 %v1637_v31, 0.0 }
 0x259   : > { %v1432_v39 = vpop.permute.xlu1 %1431  ;;  %v2164_v26 = vpack.c.bf16 %v2105_v43, %v2104_v48  ;;  %v6877_v7 = vpop.f32.mrb[12].mxu0  ;;  %v1181_v23 = vadd.f32 %v1117_v63, %v793_v33 }
 0x25a   : > { %v1636_v61 = vadd.f32 %v8635_v24, %v1566_v40  ;;  %v1504_v22 = vmul.f32 %v8177_v50, %v1432_v39  ;;  %v1898_v21 = vadd.f32 %v6877_v7, %v8872_v58  ;;  %v1889_v52 = vpop.f32.mrb[13].mxu0  ;;  %v8966_v43 = vpop.permute.xlu0 %4213  ;;  %v7470_v40 = vld [vmem:[%s7594_s15 + $0x370] sm:$0xff] }
 0x25b   : > { %v1890_v25 = vadd.f32 %v8872_v58, %v1889_v52  ;;  %v6878_v62 = vpop.f32.mrb[14].mxu0  ;;  %6943 = vmatprep.mubr.msk.bf16.mxu1 %vm2231_vm0, %v2164_v26  ;;  %3612 = vperm.xlu0 %7411, %v7470_v40  }
 0x25c   : > { %v1568_v51 = vadd.f32 %v1504_v22, %v1180_v27  ;;  %7353 = vset.pattern.permute.xlu1 %v10781_v49  ;;  %v1700_v9 = vmax.f32 %v1636_v61, 0.0  ;;  %v1901_v17 = vadd.f32 %v6878_v62, %v8872_v58  ;;  %v1892_v29 = vpop.f32.mrb[15].mxu0  ;;  %6944 = vmatmul.mubr.msk.bf16.gmra.mrb[8].mxu1 %vm2231_vm0, %v2165_v42  ;;  %v2110_v39 = vmax.f32 %v1898_v21, 0.0 }
 0x25d   : > { %3825 = vperm.xlu1 %7353, %v8935_v0   ;;  %v1436_v5 = vpop.permute.xlu1 %1435  ;;  %v1893_v59 = vadd.f32 %v8872_v58, %v1892_v29  ;;  %v2108_v22 = vmax.f32 %v1890_v25, 0.0 }
 0x25e   : > { %v1505_v48 = vmul.f32 %v8177_v50, %v1436_v5  ;;  %v2111_v27 = vmax.f32 %v1901_v17, 0.0  ;;  %v1734_v26 = vpack.c.bf16 %v1701_v2, %v1700_v9  ;;  %v1638_v61 = vadd.f32 %v8635_v24, %v1568_v51  ;;  %v8975_v51 = vpop.permute.xlu0 %4225 }
 0x25f   : > { %v2109_v42 = vmax.f32 %v1893_v59, 0.0  ;;  %3622 = vperm.xlu0 %7411, %v8750_v38  }
 0x260   : > { %v1569_v7 = vadd.f32 %v1505_v48, %v1181_v23  ;;  %v2167_v52 = vpack.c.bf16 %v2111_v27, %v2110_v39  ;;  %6923 = vmatprep.mubr.bf16.mxu0 %v1734_v26  ;;  %v1702_v17 = vmax.f32 %v1638_v61, 0.0 }
 0x261   : > { %7354 = vset.pattern.permute.xlu1 %v10765_v8  ;;  %v2166_v63 = vpack.c.bf16 %v2109_v42, %v2108_v22  ;;  %v6881_v46 = vpop.f32.mrb[16].mxu0 }
 0x262   : > { %v1639_v31 = vadd.f32 %v8635_v24, %v1569_v7  ;;  %4197 = vperm.xlu1 %7354, %v8895_v18   ;;  %v3388_v33 = vpop.permute.xlu1 %3387  ;;  %v1914_v21 = vadd.f32 %v6881_v46, %v8872_v58  ;;  %v1905_v62 = vpop.f32.mrb[17].mxu0 }
 0x263   : > { %v1906_v25 = vadd.f32 %v8872_v58, %v1905_v62  ;;  %v6882_v9 = vpop.f32.mrb[18].mxu0  ;;  %6947 = vmatprep.mubr.msk.bf16.mxu1 %vm2231_vm0, %v2166_v63  ;;  %3647 = vperm.xlu0 %7411, %v8768_v41   ;;  %v8984_v40 = vpop.permute.xlu0 %4233 }
 0x264   : > { %v1703_v29 = vmax.f32 %v1639_v31, 0.0  ;;  %v1917_v5 = vadd.f32 %v6882_v9, %v8872_v58  ;;  %v1908_v2 = vpop.f32.mrb[19].mxu0  ;;  %6948 = vmatmul.mubr.msk.bf16.gmra.mrb[12].mxu1 %vm2231_vm0, %v2167_v52  ;;  %v2114_v23 = vmax.f32 %v1914_v21, 0.0 }
 0x265   : > { %v1909_v18 = vadd.f32 %v8872_v58, %v1908_v2  ;;  %v2112_v39 = vmax.f32 %v1906_v25, 0.0  ;;  %v8997_v25 = vld [vmem:[%s7594_s15 + $0x288] sm:$0xff]  ;;  %v3700_v2 = vmul.f32 %v8608_v28, %v8169_v35 }
 0x266   : > { %4205 = vperm.xlu1 %7354, %v8826_v57   ;;  %v1735_v38 = vpack.c.bf16 %v1703_v29, %v1702_v17  ;;  %v2115_v59 = vmax.f32 %v1917_v5, 0.0 }
 0x267   : > { %v3766_v48 = vpop.permute.xlu1 %3765  ;;  %v2113_v27 = vmax.f32 %v1909_v18, 0.0  ;;  %v8988_v7 = vpop.permute.xlu0 %4245 }
 0x268   : > { %6924 = vmatmul.mubr.bf16.gmra.mrb[60].mxu0 %v1735_v38  ;;  %v2169_v26 = vpack.c.bf16 %v2115_v59, %v2114_v23  ;;  %v4020_v18 = vmul.f32 %v3766_v48, %v8162_v53  ;;  %v4021_v48 = vmul.f32 %v8661_v54, %v8162_v53 }
 0x269   : > { %v2168_v61 = vpack.c.bf16 %v2113_v27, %v2112_v39  ;;  %v6885_v22 = vpop.f32.mrb[20].mxu0  ;;  %v4404_v39 = vmul.f32 %v8890_v47, %v8177_v50 }
 0x26a   : > { %4209 = vperm.xlu1 %7354, %v8935_v0   ;;  %v1930_v42 = vadd.f32 %v6885_v22, %v8872_v58  ;;  %v1921_v57 = vpop.f32.mrb[21].mxu0  ;;  %v4084_v27 = vadd.f32 %v4020_v18, %v3700_v2 }
 0x26b   : > { %v1922_v41 = vadd.f32 %v8872_v58, %v1921_v57  ;;  %v6886_v52 = vpop.f32.mrb[22].mxu0  ;;  %6951 = vmatprep.mubr.msk.bf16.mxu1 %vm2231_vm0, %v2168_v61  ;;  %v9000_v9 = vpop.permute.xlu0 %4257  ;;  %v3701_v61 = vmul.f32 %v3388_v33, %v8169_v35  ;;  %v4407_v33 = vmul.f32 %v8899_v11, %v8177_v50 }
 0x26c   : > { %v3393_v63 = vpop.permute.xlu1 %3392  ;;  %v1933_v31 = vadd.f32 %v6886_v52, %v8872_v58  ;;  %v1924_v46 = vpop.f32.mrb[23].mxu0  ;;  %6952 = vmatmul.mubr.msk.bf16.gmra.mrb[16].mxu1 %vm2231_vm0, %v2169_v26  ;;  %v2118_v0 = vmax.f32 %v1930_v42, 0.0 }
 0x26d   : > { %v1925_v21 = vadd.f32 %v8872_v58, %v1924_v46  ;;  %v2116_v17 = vmax.f32 %v1922_v41, 0.0  ;;  %v4468_v46 = vadd.f32 %v4404_v39, %v4084_v27 }
 0x26e   : > { %7355 = vset.pattern.permute.xlu1 %v10851_v10  ;;  %v2119_v62 = vmax.f32 %v1933_v31, 0.0 }
 0x26f   : > { %3467 = vperm.xlu1 %7355, %v8997_v25   ;;  %v2117_v29 = vmax.f32 %v1925_v21, 0.0  ;;  %v9006_v59 = vpop.permute.xlu0 %4265 }
 0x270   : > { %v3398_v5 = vpop.permute.xlu1 %3397  ;;  %v2171_v38 = vpack.c.bf16 %v2119_v62, %v2118_v0  ;;  %v7472_v62 = vld [vmem:[%s7594_s15 + $0x290] sm:$0xff] }
 0x271   : > { %v2170_v23 = vpack.c.bf16 %v2117_v29, %v2116_v17  ;;  %v4022_v17 = vmul.f32 %v8674_v32, %v8162_v53  ;;  %v4085_v29 = vadd.f32 %v4021_v48, %v3701_v61  ;;  %v4532_v32 = vadd.f32 %v8635_v24, %v4468_v46  ;;  %v9047_v46 = vld [vmem:[%s10729_s2] ss:$0 sm:$0xff] }
 0x273   : > { %7356 = vset.pattern.permute.xlu1 %v10781_v49  ;;  %6955 = vmatprep.mubr.msk.bf16.mxu1 %vm2231_vm0, %v2170_v23  ;;  %v9020_v52 = vpop.permute.xlu0 %4277 }
 0x274   : > { %3829 = vperm.xlu1 %7356, %v8593_v55   ;;  %6956 = vmatmul.mubr.msk.bf16.gmra.mrb[20].mxu1 %vm2231_vm0, %v2171_v38  ;;  %v3703_v55 = vmul.f32 %v3398_v5, %v8169_v35  ;;  %v3702_v38 = vmul.f32 %v3393_v63, %v8169_v35 }
 0x275   : > { %v3778_v26 = vpop.permute.xlu1 %3777  ;;  %v6889_v28 = vpop.f32.mrb[24].mxu0 }
 0x276   : > { %v4023_v22 = vmul.f32 %v3778_v26, %v8162_v53  ;;  %v1946_v42 = vadd.f32 %v6889_v28, %v8872_v58  ;;  %v1937_v57 = vpop.f32.mrb[25].mxu0  ;;  %v4086_v61 = vadd.f32 %v4022_v17, %v3702_v38 }
 0x277   : > { %v1938_v47 = vadd.f32 %v8872_v58, %v1937_v57  ;;  %v6890_v41 = vpop.f32.mrb[26].mxu0  ;;  %v9032_v39 = vpop.permute.xlu0 %4289 }
 0x278   : > { %v1949_v31 = vadd.f32 %v6890_v41, %v8872_v58  ;;  %7357 = vset.pattern.permute.xlu1 %v10851_v10  ;;  %v1940_v54 = vpop.f32.mrb[27].mxu0  ;;  %v4087_v21 = vadd.f32 %v4023_v22, %v3703_v55  ;;  %v2122_v5 = vmax.f32 %v1946_v42, 0.0  ;;  %v7473_v55 = vld [vmem:[%s7594_s15 + $0x298] sm:$0xff] }
 0x279   : > { %v1941_v0 = vadd.f32 %v8872_v58, %v1940_v54  ;;  %3472 = vperm.xlu1 %7357, %v7472_v62   ;;  %v2120_v23 = vmax.f32 %v1938_v47, 0.0  ;;  %v4596_v54 = vmax.f32 %v4532_v32, 0.0 }
 0x27a   : > { %v2123_v2 = vmax.f32 %v1949_v31, 0.0  ;;  %v4154_v18 = vpop.permute.xlu1 %4153  ;;  %v4471_v28 = vadd.f32 %v4407_v33, %v4087_v21 }
 0x27b   : > { %v2121_v26 = vmax.f32 %v1941_v0, 0.0  ;;  %v4405_v11 = vmul.f32 %v4154_v18, %v8177_v50  ;;  %v9039_v47 = vpop.permute.xlu0 %4297 }
 0x27c   : > { %v2173_v27 = vpack.c.bf16 %v2123_v2, %v2122_v5  ;;  %v4535_v41 = vadd.f32 %v8635_v24, %v4471_v28 }
 0x27d   : > { %v2172_v22 = vpack.c.bf16 %v2121_v26, %v2120_v23  ;;  %v4469_v57 = vadd.f32 %v4405_v11, %v4085_v29  ;;  %3477 = vperm.xlu1 %7357, %v7473_v55  }
 0x27e   : > { %v4158_v48 = vpop.permute.xlu1 %4157  ;;  %v4599_v5 = vmax.f32 %v4535_v41, 0.0 }
 0x27f   : > { %v4533_v42 = vadd.f32 %v8635_v24, %v4469_v57  ;;  %v4406_v63 = vmul.f32 %v4158_v48, %v8177_v50  ;;  %6959 = vmatprep.mubr.msk.bf16.mxu1 %vm2231_vm0, %v2172_v22  ;;  %v9050_v29 = vpop.permute.xlu0 %4309  ;;  %v9059_v57 = vld [vmem:[%s7594_s15 + $0x2a0] sm:$0xff] }
 0x280   : > { %6960 = vmatmul.mubr.msk.bf16.gmra.mrb[24].mxu1 %vm2231_vm0, %v2173_v27 }
 0x281   : > { %v4470_v31 = vadd.f32 %v4406_v63, %v4086_v61  ;;  %7358 = vset.pattern.permute.xlu1 %v10781_v49  ;;  %v4597_v33 = vmax.f32 %v4533_v42, 0.0 }
 0x282   : > { %3841 = vperm.xlu1 %7358, %v7473_v55  }
 0x283   : > { %v4534_v21 = vadd.f32 %v9047_v46, %v4470_v31  ;;  %v3403_v0 = vpop.permute.xlu1 %3402  ;;  %v4660_v17 = vpack.c.bf16 %v4597_v33, %v4596_v54  ;;  %v9054_v38 = vpop.permute.xlu0 %4321  ;;  %v3705_v54 = vmul.f32 %v8627_v6, %v8169_v35 }
 0x285   : > { %v4598_v24 = vmax.f32 %v4534_v21, 0.0  ;;  %7083 = vmatprep.mubr.bf16.mxu0 %v4660_v17 }
 0x286   : > { %7359 = vset.pattern.permute.xlu1 %v10765_v8 }
 0x287   : > { %v4661_v2 = vpack.c.bf16 %v4599_v5, %v4598_v24  ;;  %4217 = vperm.xlu1 %7359, %v8997_v25   ;;  %v4409_v24 = vmul.f32 %v8911_v34, %v8177_v50 }
 0x288   : > { %v3782_v18 = vpop.permute.xlu1 %3781 }
 0x289   : > { %7084 = vmatmul.mubr.bf16.vlgmr.msra.gmra.mrb[64].mxu0 %v4661_v2  ;;  %v4024_v6 = vmul.f32 %v3782_v18, %v8162_v53 }
 0x28b   : > { %4221 = vperm.xlu1 %7359, %v7472_v62   ;;  %v6893_v23 = vpop.f32.mrb[28].mxu0  ;;  %v9065_v62 = vpop.permute.xlu0 %4329 }
 0x28c   : > { %v1962_v26 = vadd.f32 %v6893_v23, %v8872_v58  ;;  %v3786_v11 = vpop.permute.xlu1 %3785  ;;  %v1953_v27 = vpop.f32.mrb[29].mxu0  ;;  %v7475_v23 = vld [vmem:[%s7594_s15 + $0x2a8] sm:$0xff] }
 0x28d   : > { %v1954_v28 = vadd.f32 %v8872_v58, %v1953_v27  ;;  %v6894_v22 = vpop.f32.mrb[30].mxu0  ;;  %v4025_v33 = vmul.f32 %v3786_v11, %v8162_v53  ;;  %v4026_v11 = vmul.f32 %v8686_v15, %v8162_v53  ;;  %v3704_v27 = vmul.f32 %v3403_v0, %v8169_v35 }
 0x28e   : > { %v1965_v55 = vadd.f32 %v6894_v22, %v8872_v58  ;;  %v1956_v32 = vpop.f32.mrb[31].mxu0  ;;  %v2126_v48 = vmax.f32 %v1962_v26, 0.0  ;;  %v3706_v26 = vmul.f32 %v8645_v13, %v8169_v35 }
 0x28f   : > { %v1957_v25 = vadd.f32 %v8872_v58, %v1956_v32  ;;  %7360 = vset.pattern.permute.xlu1 %v10851_v10  ;;  %v2124_v42 = vmax.f32 %v1954_v28, 0.0  ;;  %v9074_v5 = vpop.permute.xlu0 %4341  ;;  %v4089_v2 = vadd.f32 %v4025_v33, %v3705_v54  ;;  %v4088_v32 = vadd.f32 %v4024_v6, %v3704_v27 }
 0x290   : > { %v2127_v61 = vmax.f32 %v1965_v55, 0.0  ;;  %3482 = vperm.xlu1 %7360, %v9059_v57   ;;  %v6439_v55 = vld [vmem:[%s7594_s15 + $0x2b8] sm:$0xff]  ;;  %v4090_v18 = vadd.f32 %v4026_v11, %v3706_v26 }
 0x291   : > { %v2125_v63 = vmax.f32 %v1957_v25, 0.0  ;;  %v3418_v41 = vpop.permute.xlu1 %3417  ;;  %v4473_v28 = vadd.f32 %v4409_v24, %v4089_v2 }
 0x292   : > { %v2175_v31 = vpack.c.bf16 %v2127_v61, %v2126_v48 }
 0x293   : > { %v2174_v21 = vpack.c.bf16 %v2125_v63, %v2124_v42  ;;  %v9087_v34 = vpop.permute.xlu0 %4353  ;;  %v4537_v13 = vadd.f32 %v9047_v46, %v4473_v28 }
 0x294   : > { %7361 = vset.pattern.permute.xlu1 %v10781_v49 }
 0x295   : > { %3845 = vperm.xlu1 %7361, %v9059_v57   ;;  %6963 = vmatprep.mubr.msk.bf16.mxu1 %vm2231_vm0, %v2174_v21  ;;  %v4601_v26 = vmax.f32 %v4537_v13, 0.0 }
 0x296   : > { %v3794_v17 = vpop.permute.xlu1 %3793  ;;  %6964 = vmatmul.mubr.msk.bf16.gmra.mrb[28].mxu1 %vm2231_vm0, %v2175_v31  ;;  %v3707_v31 = vmul.f32 %v3418_v41, %v8169_v35 }
 0x297   : > { %v4027_v15 = vmul.f32 %v3794_v17, %v8162_v53  ;;  %v9096_v21 = vpop.permute.xlu0 %4361 }
 0x299   : > { %3849 = vperm.xlu1 %7361, %v7475_v23   ;;  %v4091_v11 = vadd.f32 %v4027_v15, %v3707_v31 }
 0x29b   : > { %v4166_v22 = vpop.permute.xlu1 %4165 }
 0x29c   : > { %v4408_v25 = vmul.f32 %v4166_v22, %v8177_v50 }
 0x29d   : > { %7362 = vset.pattern.permute.xlu1 %v10851_v10 }
 0x29e   : > { %v4472_v48 = vadd.f32 %v4408_v25, %v4088_v32  ;;  %3497 = vperm.xlu1 %7362, %v6439_v55  }
 0x29f   : > { %v4174_v61 = vpop.permute.xlu1 %4173 }
 0x2a0   : > { %v4536_v0 = vadd.f32 %v9047_v46, %v4472_v48  ;;  %v4410_v42 = vmul.f32 %v4174_v61, %v8177_v50 }
 0x2a1   : > { %v6897_v63 = vpop.f32.mrb[32].mxu0 }
 0x2a2   : > { %v4474_v54 = vadd.f32 %v4410_v42, %v4090_v18  ;;  %v1978_v33 = vadd.f32 %v6897_v63, %v8872_v58  ;;  %7363 = vset.pattern.permute.xlu1 %v10781_v49  ;;  %v1969_v24 = vpop.f32.mrb[33].mxu0  ;;  %v4600_v2 = vmax.f32 %v4536_v0, 0.0  ;;  %v9106_v63 = vpop.permute.xlu0 %4373 }
 0x2a3   : > { %v1970_v6 = vadd.f32 %v8872_v58, %v1969_v24  ;;  %3857 = vperm.xlu1 %7363, %v6439_v55   ;;  %v4178_v17 = vpop.permute.xlu1 %4177  ;;  %v6898_v23 = vpop.f32.mrb[34].mxu0 }
 0x2a4   : > { %v4411_v27 = vmul.f32 %v4178_v17, %v8177_v50  ;;  %v1981_v41 = vadd.f32 %v6898_v23, %v8872_v58  ;;  %v1972_v28 = vpop.f32.mrb[35].mxu0  ;;  %v4662_v32 = vpack.c.bf16 %v4601_v26, %v4600_v2  ;;  %v4538_v25 = vadd.f32 %v9047_v46, %v4474_v54  ;;  %v7476_v2 = vld [vmem:[%s7594_s15 + $0x2b0] sm:$0xff] }
 0x2a5   : > { %v1973_v22 = vadd.f32 %v8872_v58, %v1972_v28  ;;  %v2130_v18 = vmax.f32 %v1978_v33, 0.0  ;;  %v2128_v0 = vmax.f32 %v1970_v6, 0.0 }
 0x2a6   : > { %v4475_v48 = vadd.f32 %v4411_v27, %v4091_v11  ;;  %v2131_v61 = vmax.f32 %v1981_v41, 0.0  ;;  %7087 = vmatprep.mubr.bf16.mxu0 %v4662_v32  ;;  %v4602_v54 = vmax.f32 %v4538_v25, 0.0  ;;  %v9112_v23 = vpop.permute.xlu0 %4385  ;;  %v9116_v11 = vld [vmem:[%s7594_s15 + $0x2c8] sm:$0xff] }
 0x2a7   : > { %v2129_v42 = vmax.f32 %v1973_v22, 0.0  ;;  %7364 = vset.pattern.permute.xlu1 %v10765_v8 }
 0x2a8   : > { %v4539_v13 = vadd.f32 %v9047_v46, %v4475_v48  ;;  %v2177_v15 = vpack.c.bf16 %v2131_v61, %v2130_v18  ;;  %4229 = vperm.xlu1 %7364, %v9059_v57   ;;  %v3428_v31 = vpop.permute.xlu1 %3427  ;;  %v7478_v61 = vld [vmem:[%s7594_s15 + $0x2c0] sm:$0xff] }
 0x2a9   : > { %v2176_v24 = vpack.c.bf16 %v2129_v42, %v2128_v0  ;;  %v4412_v42 = vmul.f32 %v8921_v36, %v8177_v50  ;;  %v4415_v36 = vmul.f32 %v8941_v1, %v8177_v50 }
 0x2aa   : > { %v4603_v33 = vmax.f32 %v4539_v13, 0.0  ;;  %v3423_v57 = vpop.permute.xlu0 %3422 }
 0x2ab   : > { %6967 = vmatprep.mubr.msk.bf16.mxu1 %vm2231_vm0, %v2176_v24  ;;  %v3708_v28 = vmul.f32 %v3423_v57, %v8169_v35 }
 0x2ac   : > { %4237 = vperm.xlu1 %7364, %v7476_v2   ;;  %6968 = vmatmul.mubr.msk.bf16.gmra.mrb[32].mxu1 %vm2231_vm0, %v2177_v15  ;;  %v4663_v6 = vpack.c.bf16 %v4603_v33, %v4602_v54  ;;  %v4029_v54 = vmul.f32 %v8700_v16, %v8162_v53 }
 0x2ad   : > { %v3798_v17 = vpop.permute.xlu1 %3797 }
 0x2ae   : > { %7088 = vmatmul.mubr.bf16.gmra.mrb[68].mxu0 %v4663_v6  ;;  %v4028_v41 = vmul.f32 %v3798_v17, %v8162_v53  ;;  %v3709_v17 = vmul.f32 %v3428_v31, %v8169_v35  ;;  %v4030_v31 = vmul.f32 %v8722_v44, %v8162_v53 }
 0x2b0   : > { %4241 = vperm.xlu1 %7364, %v6439_v55   ;;  %v4092_v13 = vadd.f32 %v4028_v41, %v3708_v28 }
 0x2b2   : > { %v3433_v26 = vpop.permute.xlu1 %3432  ;;  %v4476_v41 = vadd.f32 %v4412_v42, %v4092_v13  ;;  %v7480_v42 = vld [vmem:[%s7594_s15 + $0x2d8] sm:$0xff] }
 0x2b4   : > { %7365 = vset.pattern.permute.xlu1 %v10851_v10  ;;  %v4540_v13 = vadd.f32 %v9047_v46, %v4476_v41 }
 0x2b5   : > { %3507 = vperm.xlu1 %7365, %v9116_v11  }
 0x2b6   : > { %v3438_v27 = vpop.permute.xlu1 %3437 }
 0x2b7   : > { %v6901_v22 = vpop.f32.mrb[36].mxu0  ;;  %v3711_v57 = vmul.f32 %v3438_v27, %v8169_v35  ;;  %v3710_v27 = vmul.f32 %v3433_v26, %v8169_v35  ;;  %v7439_v26 = vld [vmem:[%s10734_s7] sm:$0xff]  }
 0x2b8   : > { %v1994_v32 = vadd.f32 %v6901_v22, %v8872_v58  ;;  %v1985_v25 = vpop.f32.mrb[37].mxu0  ;;  %6999 = vmatprep.subr.bf16.mxu1 %v7439_v26 }
 0x2b9   : > { %v1986_v55 = vadd.f32 %v8872_v58, %v1985_v25  ;;  %7366 = vset.pattern.permute.xlu1 %v10781_v49  ;;  %v6902_v18 = vpop.f32.mrb[38].mxu0  ;;  %7000 = vmatpush3.bf16.msra.mxu1 %v7439_v26 }
 0x2ba   : > { %v1997_v48 = vadd.f32 %v6902_v18, %v8872_v58  ;;  %3861 = vperm.xlu1 %7366, %v7478_v61   ;;  %v1988_v0 = vpop.f32.mrb[39].mxu0  ;;  %v2134_v33 = vmax.f32 %v1994_v32, 0.0  ;;  %v7479_v32 = vld [vmem:[%s7594_s15 + $0x2d0] sm:$0xff]  ;;  %v4093_v61 = vadd.f32 %v4029_v54, %v3709_v17 }
 0x2bb   : > { %v1989_v15 = vadd.f32 %v8872_v58, %v1988_v0  ;;  %v3810_v24 = vpop.permute.xlu1 %3809  ;;  %v2132_v22 = vmax.f32 %v1986_v55, 0.0 }
 0x2bc   : > { %v2135_v2 = vmax.f32 %v1997_v48, 0.0  ;;  %v4031_v6 = vmul.f32 %v3810_v24, %v8162_v53  ;;  %v4094_v24 = vadd.f32 %v4030_v31, %v3710_v27 }
 0x2bd   : > { %v2133_v25 = vmax.f32 %v1989_v15, 0.0 }
 0x2be   : > { %v2179_v18 = vpack.c.bf16 %v2135_v2, %v2134_v33  ;;  %7367 = vset.pattern.permute.xlu1 %v10851_v10  ;;  %v4095_v16 = vadd.f32 %v4031_v6, %v3711_v57  ;;  %v4604_v2 = vmax.f32 %v4540_v13, 0.0 }
 0x2bf   : > { %v2178_v28 = vpack.c.bf16 %v2133_v25, %v2132_v22  ;;  %3512 = vperm.xlu1 %7367, %v7479_v32  }
 0x2c0   : > { %v4186_v48 = vpop.permute.xlu1 %4185  ;;  %v4479_v0 = vadd.f32 %v4415_v36, %v4095_v16 }
 0x2c1   : > { %v4413_v55 = vmul.f32 %v4186_v48, %v8177_v50  ;;  %6971 = vmatprep.mubr.msk.bf16.mxu1 %vm2231_vm0, %v2178_v28 }
 0x2c2   : > { %6972 = vmatmul.mubr.msk.bf16.gmra.mrb[36].mxu1 %vm2231_vm0, %v2179_v18  ;;  %v4543_v17 = vadd.f32 %v9047_v46, %v4479_v0  ;;  %v7440_v18 = vld [vmem:[%s10734_s7 + $0x8] sm:$0xff]  }
 0x2c3   : > { %v4477_v1 = vadd.f32 %v4413_v55, %v4093_v61  ;;  %3517 = vperm.xlu1 %7367, %v7480_v42   ;;  %7001 = vmatprep.subr.bf16.mxu1 %v7440_v18 }
 0x2c4   : > { %v4190_v15 = vpop.permute.xlu1 %4189  ;;  %v4607_v41 = vmax.f32 %v4543_v17, 0.0  ;;  %7002 = vmatpush3.bf16.msra.mxu1 %v7440_v18 }
 0x2c5   : > { %v4541_v33 = vadd.f32 %v9047_v46, %v4477_v1  ;;  %v4414_v44 = vmul.f32 %v4190_v15, %v8177_v50 }
 0x2c7   : > { %v4478_v54 = vadd.f32 %v4414_v44, %v4094_v24  ;;  %7368 = vset.pattern.permute.xlu1 %v10781_v49  ;;  %v4605_v6 = vmax.f32 %v4541_v33, 0.0  ;;  %v9164_v44 = vld [vmem:[%s7594_s15 + $0x2e0] sm:$0xff] }
 0x2c8   : > { %3873 = vperm.xlu1 %7368, %v7480_v42  }
 0x2c9   : > { %v4542_v57 = vadd.f32 %v9047_v46, %v4478_v54  ;;  %v3443_v22 = vpop.permute.xlu1 %3442  ;;  %v4664_v25 = vpack.c.bf16 %v4605_v6, %v4604_v2  ;;  %v3448_v54 = vpop.permute.xlu0 %3447 }
 0x2ca   : > { %v3713_v17 = vmul.f32 %v3448_v54, %v8169_v35 }
 0x2cb   : > { %7091 = vmatprep.mubr.bf16.mxu0 %v4664_v25  ;;  %v4606_v36 = vmax.f32 %v4542_v57, 0.0  ;;  %v4417_v57 = vmul.f32 %v8953_v56, %v8177_v50 }
 0x2cc   : > { %7369 = vset.pattern.permute.xlu1 %v10765_v8 }
 0x2cd   : > { %4249 = vperm.xlu1 %7369, %v9116_v11   ;;  %v6905_v28 = vpop.f32.mrb[40].mxu0  ;;  %v4665_v16 = vpack.c.bf16 %v4607_v41, %v4606_v36  ;;  %v3453_v36 = vpop.permute.xlu0 %3452 }
 0x2ce   : > { %v2010_v48 = vadd.f32 %v6905_v28, %v8872_v58  ;;  %v3814_v31 = vpop.permute.xlu1 %3813  ;;  %v2001_v61 = vpop.f32.mrb[41].mxu0 }
 0x2cf   : > { %v2002_v27 = vadd.f32 %v8872_v58, %v2001_v61  ;;  %v6906_v55 = vpop.f32.mrb[42].mxu0  ;;  %7092 = vmatmul.mubr.bf16.gmra.mrb[72].mxu0 %v4665_v16  ;;  %v4032_v41 = vmul.f32 %v3814_v31, %v8162_v53  ;;  %v7481_v16 = vld [vmem:[%s7594_s15 + $0x2e8] sm:$0xff]  ;;  %v3712_v61 = vmul.f32 %v3443_v22, %v8169_v35 }
 0x2d0   : > { %v2013_v0 = vadd.f32 %v6906_v55, %v8872_v58  ;;  %v2004_v1 = vpop.f32.mrb[43].mxu0  ;;  %v2138_v13 = vmax.f32 %v2010_v48, 0.0  ;;  %v4034_v48 = vmul.f32 %v8734_v3, %v8162_v53 }
 0x2d1   : > { %v2005_v42 = vadd.f32 %v8872_v58, %v2004_v1  ;;  %4253 = vperm.xlu1 %7369, %v7479_v32   ;;  %v2136_v24 = vmax.f32 %v2002_v27, 0.0  ;;  %v3714_v27 = vmul.f32 %v3453_v36, %v8169_v35  ;;  %v4096_v56 = vadd.f32 %v4032_v41, %v3712_v61 }
 0x2d2   : > { %v2139_v15 = vmax.f32 %v2013_v0, 0.0  ;;  %v3818_v11 = vpop.permute.xlu1 %3817  ;;  %v6447_v0 = vld [vmem:[%s7594_s15 + $0x2f8] sm:$0xff] }
 0x2d3   : > { %v2137_v33 = vmax.f32 %v2005_v42, 0.0  ;;  %v4033_v6 = vmul.f32 %v3818_v11, %v8162_v53  ;;  %v4098_v11 = vadd.f32 %v4034_v48, %v3714_v27 }
 0x2d4   : > { %v2181_v26 = vpack.c.bf16 %v2139_v15, %v2138_v13 }
 0x2d5   : > { %v2180_v2 = vpack.c.bf16 %v2137_v33, %v2136_v24  ;;  %7370 = vset.pattern.permute.xlu1 %v10851_v10  ;;  %v4097_v25 = vadd.f32 %v4033_v6, %v3713_v17 }
 0x2d6   : > { %3522 = vperm.xlu1 %7370, %v9164_v44  }
 0x2d7   : > { %v3458_v32 = vpop.permute.xlu1 %3457  ;;  %6975 = vmatprep.mubr.msk.bf16.mxu1 %vm2231_vm0, %v2180_v2  ;;  %v4481_v28 = vadd.f32 %v4417_v57, %v4097_v25 }
 0x2d8   : > { %6976 = vmatmul.mubr.msk.bf16.gmra.mrb[40].mxu1 %vm2231_vm0, %v2181_v26  ;;  %v3715_v57 = vmul.f32 %v3458_v32, %v8169_v35 }
 0x2d9   : > { %v4545_v31 = vadd.f32 %v9047_v46, %v4481_v28 }
 0x2da   : > { %7371 = vset.pattern.permute.xlu1 %v10781_v49 }
 0x2db   : > { %3877 = vperm.xlu1 %7371, %v9164_v44   ;;  %v4609_v36 = vmax.f32 %v4545_v31, 0.0 }
 0x2dc   : > { %v3826_v18 = vpop.permute.xlu1 %3825 }
 0x2dd   : > { %v4035_v26 = vmul.f32 %v3826_v18, %v8162_v53 }
 0x2df   : > { %3881 = vperm.xlu1 %7371, %v7481_v16  }
 0x2e1   : > { %v4198_v55 = vpop.permute.xlu1 %4197 }
 0x2e2   : > { %v4416_v1 = vmul.f32 %v4198_v55, %v8177_v50  ;;  %v4099_v55 = vadd.f32 %v4035_v26, %v3715_v57 }
 0x2e3   : > { %7372 = vset.pattern.permute.xlu1 %v10851_v10  ;;  %v6909_v42 = vpop.f32.mrb[44].mxu0 }
 0x2e4   : > { %v4480_v13 = vadd.f32 %v4416_v1, %v4096_v56  ;;  %v2026_v15 = vadd.f32 %v6909_v42, %v8872_v58  ;;  %3537 = vperm.xlu1 %7372, %v6447_v0   ;;  %v2017_v3 = vpop.f32.mrb[45].mxu0 }
 0x2e5   : > { %v2018_v22 = vadd.f32 %v8872_v58, %v2017_v3  ;;  %v4206_v24 = vpop.permute.xlu1 %4205  ;;  %v6910_v33 = vpop.f32.mrb[46].mxu0 }
 0x2e6   : > { %v4544_v54 = vadd.f32 %v9047_v46, %v4480_v13  ;;  %v4418_v2 = vmul.f32 %v4206_v24, %v8177_v50  ;;  %v2029_v6 = vadd.f32 %v6910_v33, %v8872_v58  ;;  %v2020_v17 = vpop.f32.mrb[47].mxu0  ;;  %v2142_v41 = vmax.f32 %v2026_v15, 0.0 }
 0x2e7   : > { %v2021_v25 = vadd.f32 %v8872_v58, %v2020_v17  ;;  %v2140_v61 = vmax.f32 %v2018_v22, 0.0  ;;  %v7482_v22 = vld [vmem:[%s7594_s15 + $0x2f0] sm:$0xff] }
 0x2e8   : > { %v4482_v28 = vadd.f32 %v4418_v2, %v4098_v11  ;;  %v2143_v16 = vmax.f32 %v2029_v6, 0.0  ;;  %7373 = vset.pattern.permute.xlu1 %v10781_v49  ;;  %v4608_v48 = vmax.f32 %v4544_v54, 0.0  ;;  %v3463_v2 = vpop.permute.xlu0 %3462  ;;  %v9206_v6 = vld [vmem:[%s10731_s4] ss:$0 sm:$0xff] }
 0x2e9   : > { %v2141_v18 = vmax.f32 %v2021_v25, 0.0  ;;  %3889 = vperm.xlu1 %7373, %v6447_v0   ;;  %v4210_v27 = vpop.permute.xlu1 %4209  ;;  %v9212_v25 = vld [vmem:[%s7594_s15 + $0x308] sm:$0xff] }
 0x2ea   : > { %v2183_v56 = vpack.c.bf16 %v2143_v16, %v2142_v41  ;;  %v4419_v1 = vmul.f32 %v4210_v27, %v8177_v50  ;;  %v4666_v42 = vpack.c.bf16 %v4609_v36, %v4608_v48  ;;  %v4546_v58 = vadd.f32 %v9047_v46, %v4482_v28 }
 0x2eb   : > { %v2182_v32 = vpack.c.bf16 %v2141_v18, %v2140_v61  ;;  %v3716_v48 = vmul.f32 %v3463_v2, %v8169_v35  ;;  %v7486_v2 = vld [vmem:[%s7594_s15 + $0x310] sm:$0xff] }
 0x2ec   : > { %v4483_v31 = vadd.f32 %v4419_v1, %v4099_v55  ;;  %7095 = vmatprep.mubr.bf16.mxu0 %v4666_v42  ;;  %v4610_v11 = vmax.f32 %v4546_v58, 0.0  ;;  %v7485_v42 = vld [vmem:[%s7594_s15 + $0x300] sm:$0xff] }
 0x2ed   : > { %7374 = vset.pattern.permute.xlu1 %v10765_v8  ;;  %6979 = vmatprep.mubr.msk.bf16.mxu1 %vm2231_vm0, %v2182_v32  ;;  %v4420_v32 = vmul.f32 %v8966_v43, %v8177_v50  ;;  %v4423_v43 = vmul.f32 %v8975_v51, %v8177_v50  ;;  %v7487_v51 = vld [vmem:[%s7594_s15 + $0x318] sm:$0xff] }
 0x2ee   : > { %v4547_v13 = vadd.f32 %v9047_v46, %v4483_v31  ;;  %4261 = vperm.xlu1 %7374, %v9164_v44   ;;  %v3468_v15 = vpop.permute.xlu1 %3467  ;;  %6980 = vmatmul.mubr.msk.bf16.gmra.mrb[44].mxu1 %vm2231_vm0, %v2183_v56 }
 0x2f0   : > { %v4611_v3 = vmax.f32 %v4547_v13, 0.0 }
 0x2f2   : > { %4269 = vperm.xlu1 %7374, %v7482_v22   ;;  %v4667_v24 = vpack.c.bf16 %v4611_v3, %v4610_v11  ;;  %v4037_v3 = vmul.f32 %v8743_v30, %v8162_v53  ;;  %v3717_v22 = vmul.f32 %v3468_v15, %v8169_v35  ;;  %v6470_v30 = vld [vmem:[%s7594_s15 + $0x3b0] sm:$0xff]  ;;  %v4038_v15 = vmul.f32 %v8757_v14, %v8162_v53  ;;  %v7488_v14 = vld [vmem:[%s7594_s15 + $0x3c0] sm:$0xff] }
 0x2f3   : > { %v3830_v33 = vpop.permute.xlu1 %3829  ;;  %3652 = vperm.xlu0 %7411, %v6470_v30  }
 0x2f4   : > { %7096 = vmatmul.mubr.bf16.gmra.mrb[76].mxu0 %v4667_v24  ;;  %v4036_v16 = vmul.f32 %v3830_v33, %v8162_v53 }
 0x2f6   : > { %4273 = vperm.xlu1 %7374, %v6447_v0   ;;  %v4100_v58 = vadd.f32 %v4036_v16, %v3716_v48 }
 0x2f7   : > { %3662 = vperm.xlu0 %7411, %v7488_v14  }
 0x2f8   : > { %v3473_v26 = vpop.permute.xlu1 %3472  ;;  %v4484_v33 = vadd.f32 %v4420_v32, %v4100_v58 }
 0x2f9   : > { %v6913_v54 = vpop.f32.mrb[48].mxu0 }
 0x2fa   : > { %v2042_v44 = vadd.f32 %v9206_v6, %v6913_v54  ;;  %7375 = vset.pattern.permute.xlu1 %v10851_v10  ;;  %v2033_v17 = vpop.f32.mrb[49].mxu0 }
 0x2fb   : > { %v2034_v57 = vadd.f32 %v9206_v6, %v2033_v17  ;;  %3547 = vperm.xlu1 %7375, %v9212_v25   ;;  %v6914_v0 = vpop.f32.mrb[50].mxu0  ;;  %v4101_v17 = vadd.f32 %v4037_v3, %v3717_v22 }
 0x2fc   : > { %v2045_v36 = vadd.f32 %v9206_v6, %v6914_v0  ;;  %v3478_v41 = vpop.permute.xlu1 %3477  ;;  %v2036_v28 = vpop.f32.mrb[51].mxu0  ;;  %v2146_v18 = vmax.f32 %v2042_v44, 0.0 }
 0x2fd   : > { %v2037_v61 = vadd.f32 %v9206_v6, %v2036_v28  ;;  %v2144_v55 = vmax.f32 %v2034_v57, 0.0  ;;  %v3719_v24 = vmul.f32 %v3478_v41, %v8169_v35  ;;  %v3718_v57 = vmul.f32 %v3473_v26, %v8169_v35 }
 0x2fe   : > { %v2147_v27 = vmax.f32 %v2045_v36, 0.0  ;;  %v4548_v28 = vadd.f32 %v9047_v46, %v4484_v33 }
 0x2ff   : > { %v2145_v56 = vmax.f32 %v2037_v61, 0.0  ;;  %7376 = vset.pattern.permute.xlu1 %v10781_v49  ;;  %v4102_v48 = vadd.f32 %v4038_v15, %v3718_v57 }
 0x300   : > { %v2185_v1 = vpack.c.bf16 %v2147_v27, %v2146_v18  ;;  %3893 = vperm.xlu1 %7376, %v7485_v42   ;;  %v4612_v26 = vmax.f32 %v4548_v28, 0.0 }
 0x301   : > { %v2184_v31 = vpack.c.bf16 %v2145_v56, %v2144_v55  ;;  %v3842_v13 = vpop.permute.xlu1 %3841 }
 0x302   : > { %v4039_v11 = vmul.f32 %v3842_v13, %v8162_v53 }
 0x303   : > { %6983 = vmatprep.mubr.msk.bf16.mxu1 %vm2231_vm0, %v2184_v31 }
 0x304   : > { %7377 = vset.pattern.permute.xlu1 %v10851_v10  ;;  %6984 = vmatmul.mubr.msk.bf16.gmra.mrb[48].mxu1 %vm2231_vm0, %v2185_v1  ;;  %v4103_v54 = vadd.f32 %v4039_v11, %v3719_v24  ;;  %v9247_v1 = vld [vmem:[%s7594_s15 + $0x3e8] sm:$0xff] }
 0x305   : > { %3552 = vperm.xlu1 %7377, %v7486_v2   ;;  %3687 = vperm.xlu0 %7411, %v9247_v1  }
 0x306   : > { %v4218_v44 = vpop.permute.xlu1 %4217  ;;  %v4487_v36 = vadd.f32 %v4423_v43, %v4103_v54 }
 0x307   : > { %v4421_v0 = vmul.f32 %v4218_v44, %v8177_v50  ;;  %v6478_v44 = vld [vmem:[%s7594_s15 + $0x3f0] sm:$0xff] }
 0x308   : > { %v4551_v56 = vadd.f32 %v9047_v46, %v4487_v36 }
 0x309   : > { %v4485_v41 = vadd.f32 %v4421_v0, %v4101_v17  ;;  %3557 = vperm.xlu1 %7377, %v7487_v51   ;;  %3692 = vperm.xlu0 %7411, %v6478_v44  }
 0x30a   : > { %v4222_v16 = vpop.permute.xlu1 %4221  ;;  %v4615_v43 = vmax.f32 %v4551_v56, 0.0 }
 0x30b   : > { %v4549_v61 = vadd.f32 %v9047_v46, %v4485_v41  ;;  %v4422_v18 = vmul.f32 %v4222_v16, %v8177_v50 }
 0x30d   : > { %v4486_v27 = vadd.f32 %v4422_v18, %v4102_v48  ;;  %7378 = vset.pattern.permute.xlu1 %v10781_v49  ;;  %v4613_v55 = vmax.f32 %v4549_v61, 0.0  ;;  %7414 = vset.pattern.permute.xlu0 %v10781_v49  ;;  %v3488_v61 = vpop.permute.xlu0 %3487  ;;  %v6473_v18 = vld [vmem:[%s7594_s15 + $0x3c8] sm:$0xff] }
 0x30e   : > { %3905 = vperm.xlu1 %7378, %v7487_v51   ;;  %3981 = vperm.xlu0 %7414, %v6470_v30   ;;  %v3721_v14 = vmul.f32 %v3488_v61, %v8169_v35  ;;  %v9274_v30 = vld [vmem:[%s10733_s6] ss:$0 sm:$0xff] }
 0x30f   : > { %v4550_v42 = vadd.f32 %v9047_v46, %v4486_v27  ;;  %v9250_v32 = vpop.permute.xlu1 %3482  ;;  %v6917_v58 = vpop.f32.mrb[52].mxu0  ;;  %v4668_v31 = vpack.c.bf16 %v4613_v55, %v4612_v26  ;;  %v6474_v26 = vld [vmem:[%s7594_s15 + $0x3d0] sm:$0xff] }
 0x310   : > { %v2058_v13 = vadd.f32 %v9206_v6, %v6917_v58  ;;  %v2049_v11 = vpop.f32.mrb[53].mxu0 }
 0x311   : > { %v2050_v3 = vadd.f32 %v9206_v6, %v2049_v11  ;;  %v6918_v22 = vpop.f32.mrb[54].mxu0  ;;  %7099 = vmatprep.mubr.bf16.mxu0 %v4668_v31  ;;  %v4614_v24 = vmax.f32 %v4550_v42, 0.0  ;;  %v3493_v56 = vpop.permute.xlu0 %3492  ;;  %v4425_v42 = vmul.f32 %v8984_v40, %v8177_v50 }
 0x312   : > { %v2061_v33 = vadd.f32 %v9206_v6, %v6918_v22  ;;  %7379 = vset.pattern.permute.xlu1 %v10765_v8  ;;  %v2052_v54 = vpop.f32.mrb[55].mxu0  ;;  %v2150_v57 = vmax.f32 %v2058_v13, 0.0  ;;  %3993 = vperm.xlu0 %7414, %v6473_v18  }
 0x313   : > { %v2053_v15 = vadd.f32 %v9206_v6, %v2052_v54  ;;  %4281 = vperm.xlu1 %7379, %v9212_v25   ;;  %v4669_v17 = vpack.c.bf16 %v4615_v43, %v4614_v24  ;;  %v2148_v41 = vmax.f32 %v2050_v3, 0.0  ;;  %v9263_v25 = vld [vmem:[%s7594_s15 + $0x320] sm:$0xff]  ;;  %v4042_v24 = vmul.f32 %v8770_v20, %v8162_v53 }
 0x314   : > { %v2151_v0 = vmax.f32 %v2061_v33, 0.0  ;;  %v3846_v36 = vpop.permute.xlu1 %3845  ;;  %v3722_v54 = vmul.f32 %v3493_v56, %v8169_v35  ;;  %v3720_v20 = vmul.f32 %v9250_v32, %v8169_v35 }
 0x315   : > { %v2149_v51 = vmax.f32 %v2053_v15, 0.0  ;;  %7100 = vmatmul.mubr.bf16.gmra.mrb[80].mxu0 %v4669_v17  ;;  %v4040_v40 = vmul.f32 %v3846_v36, %v8162_v53 }
 0x316   : > { %v2187_v28 = vpack.c.bf16 %v2151_v0, %v2150_v57  ;;  %3997 = vperm.xlu0 %7414, %v6474_v26   ;;  %v9297_v26 = vld [vmem:[%s7594_s15 + $0x338] sm:$0xff] }
 0x317   : > { %v2186_v16 = vpack.c.bf16 %v2149_v51, %v2148_v41  ;;  %4285 = vperm.xlu1 %7379, %v7486_v2   ;;  %v7489_v41 = vld [vmem:[%s7594_s15 + $0x328] sm:$0xff] }
 0x318   : > { %v3850_v48 = vpop.permute.xlu1 %3849 }
 0x319   : > { %6987 = vmatprep.mubr.msk.bf16.mxu1 %vm2231_vm0, %v2186_v16  ;;  %v4041_v2 = vmul.f32 %v3850_v48, %v8162_v53 }
 0x31a   : > { %6988 = vmatmul.mubr.msk.bf16.gmra.mrb[52].mxu1 %vm2231_vm0, %v2187_v28  ;;  %4013 = vperm.xlu0 %7414, %v6478_v44  }
 0x31b   : > { %7380 = vset.pattern.permute.xlu1 %v10851_v10  ;;  %v4105_v58 = vadd.f32 %v4041_v2, %v3721_v14  ;;  %v4106_v14 = vadd.f32 %v4042_v24, %v3722_v54 }
 0x31c   : > { %3562 = vperm.xlu1 %7380, %v9263_v25  }
 0x31d   : > { %v3498_v27 = vpop.permute.xlu1 %3497  ;;  %v4489_v17 = vadd.f32 %v4425_v42, %v4105_v58 }
 0x31e   : > { %7418 = vset.pattern.permute.xlu0 %v10765_v8 }
 0x31f   : > { %v6937_v55 = vpop.f32.mrb[0].mxu1  ;;  %v4553_v24 = vadd.f32 %v9047_v46, %v4489_v17  ;;  %4393 = vperm.xlu0 %7418, %v9247_v1  }
 0x320   : > { %7381 = vset.pattern.permute.xlu1 %v10781_v49  ;;  %v2371_v31 = vadd.f32 %v6937_v55, %v9274_v30  ;;  %v2362_v13 = vpop.f32.mrb[1].mxu1  ;;  %v4104_v55 = vadd.f32 %v4040_v40, %v3720_v20 }
 0x321   : > { %3909 = vperm.xlu1 %7381, %v9263_v25   ;;  %v2363_v11 = vadd.f32 %v9274_v30, %v2362_v13  ;;  %v6938_v3 = vpop.f32.mrb[2].mxu1 }
 0x322   : > { %v3858_v22 = vpop.permute.xlu1 %3857  ;;  %v2374_v43 = vadd.f32 %v6938_v3, %v9274_v30  ;;  %v2365_v33 = vpop.f32.mrb[3].mxu1  ;;  %v2619_v57 = vmax.f32 %v2371_v31, 0.0 }
 0x323   : > { %v2366_v15 = vadd.f32 %v9274_v30, %v2365_v33  ;;  %v2617_v28 = vmax.f32 %v2363_v11, 0.0  ;;  %v4043_v17 = vmul.f32 %v3858_v22, %v8162_v53 }
 0x324   : > { %v2620_v0 = vmax.f32 %v2374_v43, 0.0 }
 0x325   : > { %3913 = vperm.xlu1 %7381, %v7489_v41   ;;  %v6921_v51 = vpop.f32.mrb[56].mxu0  ;;  %v2618_v16 = vmax.f32 %v2366_v15, 0.0 }
 0x326   : > { %v2074_v48 = vadd.f32 %v9206_v6, %v6921_v51  ;;  %v2065_v61 = vpop.f32.mrb[57].mxu0  ;;  %v9293_v18 = vpack.c.bf16 %v2620_v0, %v2619_v57  ;;  %v3723_v57 = vmul.f32 %v3498_v27, %v8169_v35 }
 0x327   : > { %v2066_v36 = vadd.f32 %v9206_v6, %v2065_v61  ;;  %v4230_v44 = vpop.permute.xlu1 %4229  ;;  %v6922_v2 = vpop.f32.mrb[58].mxu0  ;;  %v9299_v56 = vpack.c.bf16 %v2618_v16, %v2617_v28 }
 0x328   : > { %v4424_v42 = vmul.f32 %v4230_v44, %v8177_v50  ;;  %v2077_v32 = vadd.f32 %v9206_v6, %v6922_v2  ;;  %v6941_v58 = vpop.f32.mrb[4].mxu1  ;;  %v2068_v31 = vpop.f32.mrb[59].mxu0  ;;  %v2154_v43 = vmax.f32 %v2074_v48, 0.0 }
 0x329   : > { %v2387_v13 = vadd.f32 %v6941_v58, %v9274_v30  ;;  %v2069_v11 = vadd.f32 %v9206_v6, %v2068_v31  ;;  %v2378_v3 = vpop.f32.mrb[5].mxu1  ;;  %7382 = vset.pattern.permute.xlu1 %v10851_v10  ;;  %v2152_v0 = vmax.f32 %v2066_v36, 0.0 }
 0x32a   : > { %v4488_v33 = vadd.f32 %v4424_v42, %v4104_v55  ;;  %v2155_v54 = vmax.f32 %v2077_v32, 0.0  ;;  %v2379_v40 = vadd.f32 %v9274_v30, %v2378_v3  ;;  %v6942_v15 = vpop.f32.mrb[6].mxu1  ;;  %3577 = vperm.xlu1 %7382, %v9297_v26   ;;  %v4617_v32 = vmax.f32 %v4553_v24, 0.0 }
 0x32b   : > { %v2153_v41 = vmax.f32 %v2069_v11, 0.0  ;;  %v2390_v51 = vadd.f32 %v6942_v15, %v9274_v30  ;;  %v2381_v20 = vpop.f32.mrb[7].mxu1  ;;  %v4238_v28 = vpop.permute.xlu1 %4237  ;;  %v2623_v61 = vmax.f32 %v2387_v13, 0.0  ;;  %v4107_v11 = vadd.f32 %v4043_v17, %v3723_v57 }
 0x32c   : > { %v4552_v1 = vadd.f32 %v9047_v46, %v4488_v33  ;;  %v2189_v16 = vpack.c.bf16 %v2155_v54, %v2154_v43  ;;  %v2382_v48 = vadd.f32 %v9274_v30, %v2381_v20  ;;  %v4426_v55 = vmul.f32 %v4238_v28, %v8177_v50 }
 0x32d   : > { %v2188_v44 = vpack.c.bf16 %v2153_v41, %v2152_v0  ;;  %v2624_v2 = vmax.f32 %v2390_v51, 0.0  ;;  %v2621_v42 = vmax.f32 %v2379_v40, 0.0 }
 0x32e   : > { %v2622_v27 = vmax.f32 %v2382_v48, 0.0  ;;  %7383 = vset.pattern.permute.xlu1 %v10781_v49  ;;  %v4616_v36 = vmax.f32 %v4552_v1, 0.0  ;;  %v4490_v31 = vadd.f32 %v4426_v55, %v4106_v14 }
 0x32f   : > { %v9318_v58 = vpack.c.bf16 %v2624_v2, %v2623_v61  ;;  %3921 = vperm.xlu1 %7383, %v9297_v26   ;;  %v4242_v22 = vpop.permute.xlu1 %4241  ;;  %6991 = vmatprep.mubr.msk.bf16.mxu1 %vm2231_vm0, %v2188_v44  ;;  %v6945_v43 = vpop.f32.mrb[8].mxu1 }
 0x330   : > { %v9322_v13 = vpack.c.bf16 %v2622_v27, %v2621_v42  ;;  %v4427_v3 = vmul.f32 %v4242_v22, %v8177_v50  ;;  %6992 = vmatmul.mubr.msk.bf16.gmra.mrb[56].mxu1 %vm2231_vm0, %v2189_v16  ;;  %v4670_v33 = vpack.c.bf16 %v4617_v32, %v4616_v36  ;;  %v2403_v54 = vadd.f32 %v6945_v43, %v9274_v30  ;;  %v2394_v24 = vpop.f32.mrb[9].mxu1  ;;  %v7490_v27 = vld [vmem:[%s7594_s15 + $0x330] sm:$0xff] }
 0x331   : > { %v4554_v40 = vadd.f32 %v9047_v46, %v4490_v31  ;;  %v2395_v15 = vadd.f32 %v9274_v30, %v2394_v24  ;;  %v6946_v0 = vpop.f32.mrb[10].mxu1 }
 0x332   : > { %v4491_v14 = vadd.f32 %v4427_v3, %v4107_v11  ;;  %7103 = vmatprep.mubr.bf16.mxu0 %v4670_v33  ;;  %v2406_v57 = vadd.f32 %v6946_v0, %v9274_v30  ;;  %v2397_v41 = vpop.f32.mrb[11].mxu1  ;;  %v2627_v17 = vmax.f32 %v2403_v54, 0.0 }
 0x333   : > { %7384 = vset.pattern.permute.xlu1 %v10765_v8  ;;  %v2398_v20 = vadd.f32 %v9274_v30, %v2397_v41  ;;  %v2625_v16 = vmax.f32 %v2395_v15, 0.0  ;;  %v4618_v61 = vmax.f32 %v4554_v40, 0.0 }
 0x334   : > { %v4555_v51 = vadd.f32 %v9047_v46, %v4491_v14  ;;  %4293 = vperm.xlu1 %7384, %v9263_v25   ;;  %v9334_v28 = vpop.permute.xlu1 %3507  ;;  %v2628_v1 = vmax.f32 %v2406_v57, 0.0 }
 0x335   : > { %v2626_v48 = vmax.f32 %v2398_v20, 0.0 }
 0x336   : > { %v4619_v44 = vmax.f32 %v4555_v51, 0.0  ;;  %v9336_v2 = vpack.c.bf16 %v2628_v1, %v2627_v17 }
 0x337   : > { %v9338_v55 = vpack.c.bf16 %v2626_v48, %v2625_v16  ;;  %v6949_v42 = vpop.f32.mrb[12].mxu1  ;;  %v3503_v16 = vpop.permute.xlu0 %3502 }
 0x338   : > { %4301 = vperm.xlu1 %7384, %v7490_v27   ;;  %v4671_v46 = vpack.c.bf16 %v4619_v44, %v4618_v61  ;;  %v2419_v36 = vadd.f32 %v6949_v42, %v9274_v30  ;;  %v2410_v32 = vpop.f32.mrb[13].mxu1 }
 0x339   : > { %v3862_v25 = vpop.permute.xlu1 %3861  ;;  %v2411_v31 = vadd.f32 %v9274_v30, %v2410_v32  ;;  %v6950_v22 = vpop.f32.mrb[14].mxu1 }
 0x33a   : > { %7104 = vmatmul.mubr.bf16.gmra.mrb[84].mxu0 %v4671_v46  ;;  %v2422_v11 = vadd.f32 %v6950_v22, %v9274_v30  ;;  %v2413_v3 = vpop.f32.mrb[15].mxu1  ;;  %v2631_v40 = vmax.f32 %v2419_v36, 0.0  ;;  %v4044_v22 = vmul.f32 %v3862_v25, %v8162_v53  ;;  %v4428_v25 = vmul.f32 %v8988_v7, %v8177_v50 }
 0x33b   : > { %v6925_v43 = vpop.f32.mrb[60].mxu0  ;;  %v2414_v33 = vadd.f32 %v9274_v30, %v2413_v3  ;;  %v2629_v57 = vmax.f32 %v2411_v31, 0.0  ;;  %v9359_v31 = vld [vmem:[%s7594_s15 + $0x348] sm:$0xff]  ;;  %v3725_v7 = vmul.f32 %v9334_v28, %v8169_v35 }
 0x33c   : > { %v2090_v54 = vadd.f32 %v9206_v6, %v6925_v43  ;;  %4305 = vperm.xlu1 %7384, %v9297_v26   ;;  %v2081_v24 = vpop.f32.mrb[61].mxu0  ;;  %v2632_v14 = vmax.f32 %v2422_v11, 0.0 }
 0x33d   : > { %v2082_v15 = vadd.f32 %v9206_v6, %v2081_v24  ;;  %v6926_v0 = vpop.f32.mrb[62].mxu0  ;;  %v2630_v41 = vmax.f32 %v2414_v33, 0.0 }
 0x33e   : > { %v2093_v51 = vadd.f32 %v9206_v6, %v6926_v0  ;;  %v9349_v20 = vpop.permute.xlu1 %3512  ;;  %v2084_v17 = vpop.f32.mrb[63].mxu0  ;;  %v9351_v1 = vpack.c.bf16 %v2632_v14, %v2631_v40  ;;  %v2158_v61 = vmax.f32 %v2090_v54, 0.0 }
 0x33f   : > { %v2085_v48 = vadd.f32 %v9206_v6, %v2084_v17  ;;  %v9354_v26 = vpack.c.bf16 %v2630_v41, %v2629_v57  ;;  %v6953_v42 = vpop.f32.mrb[16].mxu1  ;;  %v2156_v27 = vmax.f32 %v2082_v15, 0.0  ;;  %v3724_v6 = vmul.f32 %v3503_v16, %v8169_v35  ;;  %v7492_v17 = vld [vmem:[%s7594_s15 + $0x340] sm:$0xff] }
 0x340   : > { %v2159_v44 = vmax.f32 %v2093_v51, 0.0  ;;  %7385 = vset.pattern.permute.xlu1 %v10851_v10  ;;  %v2435_v36 = vadd.f32 %v6953_v42, %v9274_v30  ;;  %v2426_v32 = vpop.f32.mrb[17].mxu1 }
 0x341   : > { %v2157_v46 = vmax.f32 %v2085_v48, 0.0  ;;  %3587 = vperm.xlu1 %7385, %v9359_v31   ;;  %v2427_v3 = vadd.f32 %v9274_v30, %v2426_v32  ;;  %v6954_v43 = vpop.f32.mrb[18].mxu1  ;;  %v4108_v57 = vadd.f32 %v4044_v22, %v3724_v6 }
 0x342   : > { %v2191_v11 = vpack.c.bf16 %v2159_v44, %v2158_v61  ;;  %v3518_v33 = vpop.permute.xlu1 %3517  ;;  %v2438_v24 = vadd.f32 %v6954_v43, %v9274_v30  ;;  %v2429_v40 = vpop.f32.mrb[19].mxu1  ;;  %v2635_v15 = vmax.f32 %v2435_v36, 0.0  ;;  %v4045_v61 = vmul.f32 %v8782_v4, %v8162_v53  ;;  %v7493_v43 = vld [vmem:[%s7594_s15 + $0x350] sm:$0xff] }
 0x343   : > { %v2190_v54 = vpack.c.bf16 %v2157_v46, %v2156_v27  ;;  %v2430_v14 = vadd.f32 %v9274_v30, %v2429_v40  ;;  %v2633_v41 = vmax.f32 %v2427_v3, 0.0  ;;  %v3727_v46 = vmul.f32 %v3518_v33, %v8169_v35 }
 0x344   : > { %v2636_v0 = vmax.f32 %v2438_v24, 0.0  ;;  %v4492_v22 = vadd.f32 %v4428_v25, %v4108_v57  ;;  %v4431_v4 = vmul.f32 %v9000_v9, %v8177_v50  ;;  %v4046_v33 = vmul.f32 %v8790_v60, %v8162_v53  ;;  %v9403_v60 = vld [vmem:[%s10729_s2] ss:$0 sm:$0xff] }
 0x345   : > { %7386 = vset.pattern.permute.xlu1 %v10781_v49  ;;  %6995 = vmatprep.mubr.msk.bf16.mxu1 %vm2231_vm0, %v2190_v54  ;;  %v2634_v51 = vmax.f32 %v2430_v14, 0.0  ;;  %v4109_v54 = vadd.f32 %v4045_v61, %v3725_v7  ;;  %v3726_v14 = vmul.f32 %v9349_v20, %v8169_v35 }
 0x346   : > { %3925 = vperm.xlu1 %7386, %v7492_v17   ;;  %6996 = vmatmul.mubr.msk.bf16.gmra.mrb[60].mxu1 %vm2231_vm0, %v2191_v11  ;;  %v9373_v16 = vpack.c.bf16 %v2636_v0, %v2635_v15 }
 0x347   : > { %v3874_v48 = vpop.permute.xlu1 %3873  ;;  %7003 = vmatprep.mubr.msk.bf16.mxu1 %vm2736_vm1, %v9299_v56  ;;  %v9381_v44 = vpack.c.bf16 %v2634_v51, %v2633_v41  ;;  %v6957_v27 = vpop.f32.mrb[20].mxu1  ;;  %v4556_v41 = vadd.f32 %v9403_v60, %v4492_v22 }
 0x348   : > { %v4047_v42 = vmul.f32 %v3874_v48, %v8162_v53  ;;  %v2451_v36 = vadd.f32 %v6957_v27, %v9274_v30  ;;  %v2442_v32 = vpop.f32.mrb[21].mxu1  ;;  %v7495_v48 = vld [vmem:[%s7594_s15 + $0x358] sm:$0xff] }
 0x349   : > { %v2443_v56 = vadd.f32 %v9274_v30, %v2442_v32  ;;  %v6958_v6 = vpop.f32.mrb[22].mxu1  ;;  %v4620_v32 = vmax.f32 %v4556_v41, 0.0 }
 0x34a   : > { %7387 = vset.pattern.permute.xlu1 %v10851_v10  ;;  %v4111_v28 = vadd.f32 %v4047_v42, %v3727_v46  ;;  %v2454_v11 = vadd.f32 %v6958_v6, %v9274_v30  ;;  %v2445_v3 = vpop.f32.mrb[23].mxu1  ;;  %v2639_v15 = vmax.f32 %v2451_v36, 0.0 }
 0x34b   : > { %3592 = vperm.xlu1 %7387, %v7493_v43   ;;  %v2446_v24 = vadd.f32 %v9274_v30, %v2445_v3  ;;  %v2637_v25 = vmax.f32 %v2443_v56, 0.0 }
 0x34c   : > { %v4250_v40 = vpop.permute.xlu1 %4249  ;;  %v2640_v0 = vmax.f32 %v2454_v11, 0.0  ;;  %v4495_v51 = vadd.f32 %v4431_v4, %v4111_v28 }
 0x34d   : > { %v4429_v9 = vmul.f32 %v4250_v40, %v8177_v50  ;;  %v2638_v57 = vmax.f32 %v2446_v24, 0.0 }
 0x34e   : > { %7004 = vmatmul.mubr.msk.bf16.vlgmr.msra.gmra.mrb[64].mxu1 %vm2736_vm1, %v9293_v18  ;;  %v9406_v17 = vpack.c.bf16 %v2640_v0, %v2639_v15  ;;  %v4110_v18 = vadd.f32 %v4046_v33, %v3726_v14  ;;  %v4559_v56 = vadd.f32 %v9403_v60, %v4495_v51 }
 0x34f   : > { %v4493_v20 = vadd.f32 %v4429_v9, %v4109_v54  ;;  %3597 = vperm.xlu1 %7387, %v7495_v48   ;;  %7007 = vmatprep.mubr.msk.bf16.mxu1 %vm2736_vm1, %v9322_v13  ;;  %v9411_v61 = vpack.c.bf16 %v2638_v57, %v2637_v25 }
 0x350   : > { %v4254_v7 = vpop.permute.xlu1 %4253  ;;  %v4623_v15 = vmax.f32 %v4559_v56, 0.0 }
 0x351   : > { %v4557_v42 = vadd.f32 %v9403_v60, %v4493_v20  ;;  %v4430_v27 = vmul.f32 %v4254_v7, %v8177_v50 }
 0x353   : > { %v4494_v46 = vadd.f32 %v4430_v27, %v4110_v18  ;;  %7388 = vset.pattern.permute.xlu1 %v10781_v49  ;;  %v6961_v36 = vpop.f32.mrb[24].mxu1  ;;  %v4621_v22 = vmax.f32 %v4557_v42, 0.0 }
 0x354   : > { %v2467_v6 = vadd.f32 %v6961_v36, %v9274_v30  ;;  %3937 = vperm.xlu1 %7388, %v7495_v48   ;;  %v2458_v13 = vpop.f32.mrb[25].mxu1 }
 0x355   : > { %v4558_v4 = vadd.f32 %v9403_v60, %v4494_v46  ;;  %v2459_v28 = vadd.f32 %v9274_v30, %v2458_v13  ;;  %v9420_v11 = vpop.permute.xlu1 %3522  ;;  %v6962_v3 = vpop.f32.mrb[26].mxu1  ;;  %v4672_v33 = vpack.c.bf16 %v4621_v22, %v4620_v32  ;;  %v9447_v32 = vld [vmem:[%s7594_s15 + $0x360] sm:$0xff] }
 0x356   : > { %v2470_v54 = vadd.f32 %v6962_v3, %v9274_v30  ;;  %v2461_v24 = vpop.f32.mrb[27].mxu1  ;;  %7008 = vmatmul.mubr.msk.bf16.gmra.mrb[68].mxu1 %vm2736_vm1, %v9318_v58  ;;  %v2643_v0 = vmax.f32 %v2467_v6, 0.0 }
 0x357   : > { %v2462_v40 = vadd.f32 %v9274_v30, %v2461_v24  ;;  %7011 = vmatprep.mubr.msk.bf16.mxu1 %vm2736_vm1, %v9338_v55  ;;  %7107 = vmatprep.mubr.bf16.mxu0 %v4672_v33  ;;  %v4622_v14 = vmax.f32 %v4558_v4, 0.0  ;;  %v2641_v25 = vmax.f32 %v2459_v28, 0.0  ;;  %v9435_v55 = vld [vmem:[%s10731_s4] ss:$0 sm:$0xff] }
 0x358   : > { %v2644_v9 = vmax.f32 %v2470_v54, 0.0  ;;  %7389 = vset.pattern.permute.xlu1 %v10765_v8  ;;  %v4433_v54 = vmul.f32 %v9006_v59, %v8177_v50  ;;  %v3728_v59 = vmul.f32 %v9420_v11, %v8169_v35 }
 0x359   : > { %v2642_v57 = vmax.f32 %v2462_v40, 0.0  ;;  %4313 = vperm.xlu1 %7389, %v9359_v31   ;;  %v4673_v41 = vpack.c.bf16 %v4623_v15, %v4622_v14 }
 0x35a   : > { %v9430_v51 = vpack.c.bf16 %v2644_v9, %v2643_v0  ;;  %v3878_v58 = vpop.permute.xlu1 %3877 }
 0x35b   : > { %v9437_v20 = vpack.c.bf16 %v2642_v57, %v2641_v25  ;;  %7108 = vmatmul.mubr.bf16.gmra.mrb[88].mxu0 %v4673_v41  ;;  %v4048_v15 = vmul.f32 %v3878_v58, %v8162_v53  ;;  %v7496_v41 = vld [vmem:[%s7594_s15 + $0x368] sm:$0xff] }
 0x35c   : > { %v7085_v48 = vpop.f32.mrb[64].mxu0 }
 0x35d   : > { %v4806_v7 = vadd.f32 %v7085_v48, %v9435_v55  ;;  %4317 = vperm.xlu1 %7389, %v7493_v43   ;;  %v4797_v18 = vpop.f32.mrb[65].mxu0 }
 0x35e   : > { %v4798_v31 = vadd.f32 %v9435_v55, %v4797_v18  ;;  %v3882_v42 = vpop.permute.xlu1 %3881  ;;  %7012 = vmatmul.mubr.msk.bf16.gmra.mrb[72].mxu1 %vm2736_vm1, %v9336_v2  ;;  %v7086_v27 = vpop.f32.mrb[66].mxu0 }
 0x35f   : > { %v4809_v46 = vadd.f32 %v7086_v27, %v9435_v55  ;;  %7015 = vmatprep.mubr.msk.bf16.mxu1 %vm2736_vm1, %v9354_v26  ;;  %v4800_v36 = vpop.f32.mrb[67].mxu0  ;;  %v5054_v56 = vmax.f32 %v4806_v7, 0.0  ;;  %v3528_v2 = vpop.permute.xlu0 %3527  ;;  %v4049_v26 = vmul.f32 %v3882_v42, %v8162_v53  ;;  %v6463_v27 = vld [vmem:[%s7594_s15 + $0x378] sm:$0xff] }
 0x360   : > { %v4801_v22 = vadd.f32 %v9435_v55, %v4800_v36  ;;  %v5052_v6 = vmax.f32 %v4798_v31, 0.0  ;;  %v3729_v3 = vmul.f32 %v3528_v2, %v8169_v35 }
 0x361   : > { %v5055_v43 = vmax.f32 %v4809_v46, 0.0  ;;  %7390 = vset.pattern.permute.xlu1 %v10851_v10 }
 0x362   : > { %v5053_v13 = vmax.f32 %v4801_v22, 0.0  ;;  %3602 = vperm.xlu1 %7390, %v9447_v32   ;;  %v4113_v24 = vadd.f32 %v4049_v26, %v3729_v3 }
 0x363   : > { %v9452_v4 = vpack.c.bf16 %v5055_v43, %v5054_v56  ;;  %v3538_v28 = vpop.permute.xlu1 %3537  ;;  %v3533_v25 = vpop.permute.xlu0 %3532 }
 0x364   : > { %v9456_v33 = vpack.c.bf16 %v5053_v13, %v5052_v6  ;;  %v3730_v48 = vmul.f32 %v3533_v25, %v8169_v35  ;;  %v4497_v7 = vadd.f32 %v4433_v54, %v4113_v24 }
 0x366   : > { %7391 = vset.pattern.permute.xlu1 %v10781_v49  ;;  %7016 = vmatmul.mubr.msk.bf16.gmra.mrb[76].mxu1 %vm2736_vm1, %v9351_v1  ;;  %v4050_v1 = vmul.f32 %v8795_v37, %v8162_v53  ;;  %v4112_v37 = vadd.f32 %v4048_v15, %v3728_v59  ;;  %v4561_v2 = vadd.f32 %v9403_v60, %v4497_v7  ;;  %v7497_v7 = vld [vmem:[%s7594_s15 + $0x370] sm:$0xff] }
 0x367   : > { %3941 = vperm.xlu1 %7391, %v9447_v32   ;;  %7019 = vmatprep.mubr.msk.bf16.mxu1 %vm2736_vm1, %v9381_v44 }
 0x368   : > { %v3890_v40 = vpop.permute.xlu1 %3889  ;;  %v4114_v43 = vadd.f32 %v4050_v1, %v3730_v48 }
 0x369   : > { %v6965_v14 = vpop.f32.mrb[28].mxu1  ;;  %v4051_v54 = vmul.f32 %v3890_v40, %v8162_v53 }
 0x36a   : > { %v2483_v0 = vadd.f32 %v6965_v14, %v9274_v30  ;;  %v2474_v9 = vpop.f32.mrb[29].mxu1  ;;  %v3731_v14 = vmul.f32 %v3538_v28, %v8169_v35 }
 0x36b   : > { %v2475_v57 = vadd.f32 %v9274_v30, %v2474_v9  ;;  %3945 = vperm.xlu1 %7391, %v7496_v41   ;;  %v6966_v44 = vpop.f32.mrb[30].mxu1 }
 0x36c   : > { %v2486_v58 = vadd.f32 %v6966_v44, %v9274_v30  ;;  %v2477_v18 = vpop.f32.mrb[31].mxu1  ;;  %v2647_v46 = vmax.f32 %v2483_v0, 0.0  ;;  %v4625_v0 = vmax.f32 %v4561_v2, 0.0  ;;  %v4115_v1 = vadd.f32 %v4051_v54, %v3731_v14 }
 0x36d   : > { %v2478_v31 = vadd.f32 %v9274_v30, %v2477_v18  ;;  %v4262_v42 = vpop.permute.xlu1 %4261  ;;  %v2645_v56 = vmax.f32 %v2475_v57, 0.0 }
 0x36e   : > { %v2648_v36 = vmax.f32 %v2486_v58, 0.0  ;;  %v4432_v22 = vmul.f32 %v4262_v42, %v8177_v50  ;;  %7020 = vmatmul.mubr.msk.bf16.gmra.mrb[80].mxu1 %vm2736_vm1, %v9373_v16 }
 0x36f   : > { %v2646_v11 = vmax.f32 %v2478_v31, 0.0  ;;  %7392 = vset.pattern.permute.xlu1 %v10851_v10  ;;  %7023 = vmatprep.mubr.msk.bf16.mxu1 %vm2736_vm1, %v9411_v61 }
 0x370   : > { %v9484_v6 = vpack.c.bf16 %v2648_v36, %v2647_v46  ;;  %v4496_v13 = vadd.f32 %v4432_v22, %v4112_v37  ;;  %3617 = vperm.xlu1 %7392, %v6463_v27  }
 0x371   : > { %v2695_v3 = vpack.c.bf16 %v2646_v11, %v2645_v56  ;;  %v4270_v26 = vpop.permute.xlu1 %4269 }
 0x372   : > { %v4560_v16 = vadd.f32 %v9403_v60, %v4496_v13  ;;  %v4434_v24 = vmul.f32 %v4270_v26, %v8177_v50 }
 0x374   : > { %v4498_v15 = vadd.f32 %v4434_v24, %v4114_v43  ;;  %7393 = vset.pattern.permute.xlu1 %v10781_v49  ;;  %v4624_v61 = vmax.f32 %v4560_v16, 0.0 }
 0x375   : > { %3953 = vperm.xlu1 %7393, %v6463_v27   ;;  %v4274_v9 = vpop.permute.xlu1 %4273 }
 0x376   : > { %v4435_v25 = vmul.f32 %v4274_v9, %v8177_v50  ;;  %7024 = vmatmul.mubr.msk.bf16.gmra.mrb[84].mxu1 %vm2736_vm1, %v9406_v17  ;;  %v4674_v40 = vpack.c.bf16 %v4625_v0, %v4624_v61  ;;  %v4562_v28 = vadd.f32 %v9403_v60, %v4498_v15  ;;  %v3543_v0 = vpop.permute.xlu0 %3542 }
 0x377   : > { %7027 = vmatprep.mubr.msk.bf16.mxu1 %vm2736_vm1, %v9437_v20 }
 0x378   : > { %v4499_v57 = vadd.f32 %v4435_v25, %v4115_v1  ;;  %7111 = vmatprep.mubr.bf16.mxu0 %v4674_v40  ;;  %v4626_v59 = vmax.f32 %v4562_v28, 0.0  ;;  %v9517_v40 = vld [vmem:[%s7594_s15 + $0x388] sm:$0xff]  ;;  %v3732_v28 = vmul.f32 %v3543_v0, %v8169_v35 }
 0x379   : > { %7394 = vset.pattern.permute.xlu1 %v10765_v8 }
 0x37a   : > { %v4563_v41 = vadd.f32 %v9403_v60, %v4499_v57  ;;  %4325 = vperm.xlu1 %7394, %v9447_v32   ;;  %v3548_v44 = vpop.permute.xlu1 %3547 }
 0x37c   : > { %v4627_v48 = vmax.f32 %v4563_v41, 0.0 }
 0x37e   : > { %4333 = vperm.xlu1 %7394, %v7497_v7   ;;  %7028 = vmatmul.mubr.msk.bf16.gmra.mrb[88].mxu1 %vm2736_vm1, %v9430_v51  ;;  %v4675_v17 = vpack.c.bf16 %v4627_v48, %v4626_v59 }
 0x37f   : > { %v3894_v20 = vpop.permute.xlu1 %3893  ;;  %v6969_v58 = vpop.f32.mrb[32].mxu1  ;;  %7031 = vmatprep.mubr.msk.bf16.mxu1 %vm2736_vm1, %v2695_v3 }
 0x380   : > { %v2499_v18 = vadd.f32 %v6969_v58, %v9274_v30  ;;  %v2490_v31 = vpop.f32.mrb[33].mxu1  ;;  %7112 = vmatmul.mubr.bf16.gmra.mrb[92].mxu0 %v4675_v17  ;;  %v4052_v57 = vmul.f32 %v3894_v20, %v8162_v53  ;;  %v7499_v17 = vld [vmem:[%s7594_s15 + $0x380] sm:$0xff]  ;;  %v3733_v20 = vmul.f32 %v3548_v44, %v8169_v35 }
 0x381   : > { %v2491_v42 = vadd.f32 %v9274_v30, %v2490_v31  ;;  %v6970_v32 = vpop.f32.mrb[34].mxu1  ;;  %v7089_v37 = vpop.f32.mrb[68].mxu0 }
 0x382   : > { %v2502_v46 = vadd.f32 %v6970_v32, %v9274_v30  ;;  %v4822_v36 = vadd.f32 %v7089_v37, %v9435_v55  ;;  %4337 = vperm.xlu1 %7394, %v6463_v27   ;;  %v2493_v22 = vpop.f32.mrb[35].mxu1  ;;  %v4813_v51 = vpop.f32.mrb[69].mxu0  ;;  %v2651_v13 = vmax.f32 %v2499_v18, 0.0  ;;  %v4116_v7 = vadd.f32 %v4052_v57, %v3732_v28 }
 0x383   : > { %v2494_v56 = vadd.f32 %v9274_v30, %v2493_v22  ;;  %v4814_v11 = vadd.f32 %v9435_v55, %v4813_v51  ;;  %v7090_v43 = vpop.f32.mrb[70].mxu0  ;;  %v2649_v16 = vmax.f32 %v2491_v42, 0.0  ;;  %v4053_v32 = vmul.f32 %v8804_v19, %v8162_v53  ;;  %v7501_v19 = vld [vmem:[%s7594_s15 + $0x398] sm:$0xff] }
 0x384   : > { %v2652_v2 = vmax.f32 %v2502_v46, 0.0  ;;  %v4825_v3 = vadd.f32 %v7090_v43, %v9435_v55  ;;  %v3553_v26 = vpop.permute.xlu1 %3552  ;;  %v4816_v54 = vpop.f32.mrb[71].mxu0  ;;  %v5058_v27 = vmax.f32 %v4822_v36, 0.0  ;;  %v7500_v46 = vld [vmem:[%s7594_s15 + $0x390] sm:$0xff] }
 0x385   : > { %v2650_v24 = vmax.f32 %v2494_v56, 0.0  ;;  %v4817_v14 = vadd.f32 %v9435_v55, %v4816_v54  ;;  %v5056_v1 = vmax.f32 %v4814_v11, 0.0  ;;  %v4117_v22 = vadd.f32 %v4053_v32, %v3733_v20 }
 0x386   : > { %v2698_v15 = vpack.c.bf16 %v2652_v2, %v2651_v13  ;;  %v5059_v61 = vmax.f32 %v4825_v3, 0.0  ;;  %7395 = vset.pattern.permute.xlu1 %v10851_v10  ;;  %7032 = vmatmul.mubr.msk.bf16.gmra.mrb[92].mxu1 %vm2736_vm1, %v9484_v6  ;;  %v4436_v6 = vmul.f32 %v9020_v52, %v8177_v50  ;;  %v4439_v52 = vmul.f32 %v9032_v39, %v8177_v50 }
 0x387   : > { %v2697_v9 = vpack.c.bf16 %v2650_v24, %v2649_v16  ;;  %v5057_v25 = vmax.f32 %v4817_v14, 0.0  ;;  %3627 = vperm.xlu1 %7395, %v9517_v40   ;;  %v3734_v51 = vmul.f32 %v3553_v26, %v8169_v35  ;;  %v4054_v11 = vmul.f32 %v8811_v45, %v8162_v53 }
 0x388   : > { %v9522_v41 = vpack.c.bf16 %v5059_v61, %v5058_v27  ;;  %v3558_v59 = vpop.permute.xlu1 %3557  ;;  %v4500_v42 = vadd.f32 %v4436_v6, %v4116_v7 }
 0x389   : > { %v9524_v48 = vpack.c.bf16 %v5057_v25, %v5056_v1  ;;  %7035 = vmatprep.mubr.msk.bf16.mxu1 %vm2736_vm1, %v2697_v9  ;;  %v3735_v31 = vmul.f32 %v3558_v59, %v8169_v35  ;;  %v4118_v16 = vadd.f32 %v4054_v11, %v3734_v51 }
 0x38a   : > { %v4564_v56 = vadd.f32 %v9403_v60, %v4500_v42 }
 0x38b   : > { %7396 = vset.pattern.permute.xlu1 %v10781_v49 }
 0x38c   : > { %3957 = vperm.xlu1 %7396, %v7499_v17   ;;  %v4628_v61 = vmax.f32 %v4564_v56, 0.0 }
 0x38d   : > { %v3906_v58 = vpop.permute.xlu1 %3905 }
 0x38e   : > { %v4055_v18 = vmul.f32 %v3906_v58, %v8162_v53  ;;  %7036 = vmatmul.mubr.msk.bf16.gmra.mrb[96].mxu1 %vm2736_vm1, %v2698_v15 }
 0x390   : > { %7397 = vset.pattern.permute.xlu1 %v10851_v10  ;;  %v4119_v37 = vadd.f32 %v4055_v18, %v3735_v31  ;;  %v7441_v18 = vld [vmem:[%s10732_s5] sm:$0xff]  }
 0x391   : > { %3632 = vperm.xlu1 %7397, %v7500_v46   ;;  %7147 = vmatprep.subr.bf16.mxu1 %v7441_v18 }
 0x392   : > { %v4282_v36 = vpop.permute.xlu1 %4281  ;;  %v4503_v43 = vadd.f32 %v4439_v52, %v4119_v37  ;;  %7148 = vmatpush3.bf16.msra.mxu1 %v7441_v18  ;;  %v7442_v37 = vld [vmem:[%s10732_s5 + $0x8] sm:$0xff]  }
 0x393   : > { %v4437_v44 = vmul.f32 %v4282_v36, %v8177_v50  ;;  %7149 = vmatprep.subr.bf16.mxu1 %v7442_v37 }
 0x394   : > { %v4567_v25 = vadd.f32 %v9403_v60, %v4503_v43 }
 0x395   : > { %v4501_v13 = vadd.f32 %v4437_v44, %v4117_v22  ;;  %3637 = vperm.xlu1 %7397, %v7501_v19   ;;  %v6973_v2 = vpop.f32.mrb[36].mxu1 }
 0x396   : > { %v2515_v39 = vadd.f32 %v6973_v2, %v9274_v30  ;;  %v4286_v3 = vpop.permute.xlu1 %4285  ;;  %v2506_v54 = vpop.f32.mrb[37].mxu1  ;;  %v4631_v32 = vmax.f32 %v4567_v25, 0.0  ;;  %7150 = vmatpush3.bf16.msra.mxu1 %v7442_v37  ;;  %v9575_v2 = vld [vmem:[%s7594_s15 + $0x3a0] sm:$0xff]  ;;  %v7502_v37 = vld [vmem:[%s7594_s15 + $0x3a8] sm:$0xff] }
 0x397   : > { %v4565_v24 = vadd.f32 %v9403_v60, %v4501_v13  ;;  %v4438_v26 = vmul.f32 %v4286_v3, %v8177_v50  ;;  %v2507_v14 = vadd.f32 %v9274_v30, %v2506_v54  ;;  %v6974_v15 = vpop.f32.mrb[38].mxu1  ;;  %v7444_v54 = vld [vmem:[%s10732_s5 + $0x18] sm:$0xff]  }
 0x398   : > { %v2518_v27 = vadd.f32 %v6974_v15, %v9274_v30  ;;  %v2509_v45 = vpop.f32.mrb[39].mxu1  ;;  %v2655_v28 = vmax.f32 %v2515_v39, 0.0 }
 0x399   : > { %v4502_v0 = vadd.f32 %v4438_v26, %v4118_v16  ;;  %v2510_v9 = vadd.f32 %v9274_v30, %v2509_v45  ;;  %7399 = vset.pattern.permute.xlu1 %v10781_v49  ;;  %v4629_v1 = vmax.f32 %v4565_v24, 0.0  ;;  %v2653_v6 = vmax.f32 %v2507_v14, 0.0  ;;  %v3568_v26 = vpop.permute.xlu0 %3567 }
 0x39a   : > { %v2656_v57 = vmax.f32 %v2518_v27, 0.0  ;;  %3969 = vperm.xlu1 %7399, %v7501_v19   ;;  %v3737_v27 = vmul.f32 %v3568_v26, %v8169_v35 }
 0x39b   : > { %v4566_v59 = vadd.f32 %v9403_v60, %v4502_v0  ;;  %v2654_v7 = vmax.f32 %v2510_v9, 0.0  ;;  %v9556_v17 = vpop.permute.xlu1 %3562  ;;  %v4676_v58 = vpack.c.bf16 %v4629_v1, %v4628_v61 }
 0x39c   : > { %v2700_v20 = vpack.c.bf16 %v2656_v57, %v2655_v28  ;;  %v4441_v57 = vmul.f32 %v9039_v47, %v8177_v50 }
 0x39d   : > { %v2699_v31 = vpack.c.bf16 %v2654_v7, %v2653_v6  ;;  %7115 = vmatprep.mubr.bf16.mxu0 %v4676_v58  ;;  %v4630_v42 = vmax.f32 %v4566_v59, 0.0 }
 0x39e   : > { %7400 = vset.pattern.permute.xlu1 %v10765_v8 }
 0x39f   : > { %4345 = vperm.xlu1 %7400, %v9517_v40   ;;  %7039 = vmatprep.mubr.msk.bf16.mxu1 %vm2736_vm1, %v2699_v31  ;;  %v4677_v52 = vpack.c.bf16 %v4631_v32, %v4630_v42  ;;  %v7443_v40 = vld [vmem:[%s10732_s5 + $0x10] sm:$0xff]  }
 0x3a0   : > { %v3910_v36 = vpop.permute.xlu1 %3909  ;;  %7040 = vmatmul.mubr.msk.bf16.gmra.mrb[100].mxu1 %vm2736_vm1, %v2700_v20  ;;  %7151 = vmatprep.subr.bf16.mxu1 %v7443_v40 }
 0x3a1   : > { %7116 = vmatmul.mubr.bf16.gmra.mrb[96].mxu0 %v4677_v52  ;;  %7152 = vmatpush3.bf16.msra.mxu1 %v7443_v40  ;;  %v4056_v20 = vmul.f32 %v3910_v36, %v8162_v53 }
 0x3a2   : > { %v7093_v22 = vpop.f32.mrb[72].mxu0  ;;  %7153 = vmatprep.subr.bf16.mxu1 %v7444_v54 }
 0x3a3   : > { %v4838_v51 = vadd.f32 %v7093_v22, %v9435_v55  ;;  %4349 = vperm.xlu1 %7400, %v7500_v46   ;;  %v4829_v44 = vpop.f32.mrb[73].mxu0  ;;  %v3736_v22 = vmul.f32 %v9556_v17, %v8169_v35 }
 0x3a4   : > { %v4830_v56 = vadd.f32 %v9435_v55, %v4829_v44  ;;  %v3914_v11 = vpop.permute.xlu1 %3913  ;;  %v7094_v43 = vpop.f32.mrb[74].mxu0 }
 0x3a5   : > { %v4841_v13 = vadd.f32 %v7094_v43, %v9435_v55  ;;  %v4832_v19 = vpop.f32.mrb[75].mxu0  ;;  %v5062_v3 = vmax.f32 %v4838_v51, 0.0  ;;  %v4057_v45 = vmul.f32 %v3914_v11, %v8162_v53  ;;  %7154 = vmatpush3.bf16.msra.mxu1 %v7444_v54  ;;  %v3573_v44 = vpop.permute.xlu0 %3572  ;;  %v6471_v11 = vld [vmem:[%s7594_s15 + $0x3b8] sm:$0xff]  ;;  %v4120_v43 = vadd.f32 %v4056_v20, %v3736_v22 }
 0x3a6   : > { %v4833_v39 = vadd.f32 %v9435_v55, %v4832_v19  ;;  %v5060_v16 = vmax.f32 %v4830_v56, 0.0  ;;  %v3738_v36 = vmul.f32 %v3573_v44, %v8169_v35 }
 0x3a7   : > { %v5063_v46 = vmax.f32 %v4841_v13, 0.0  ;;  %7401 = vset.pattern.permute.xlu1 %v10851_v10  ;;  %v4121_v59 = vadd.f32 %v4057_v45, %v3737_v27 }
 0x3a8   : > { %v5061_v24 = vmax.f32 %v4833_v39, 0.0  ;;  %3642 = vperm.xlu1 %7401, %v9575_v2  }
 0x3a9   : > { %v9583_v14 = vpack.c.bf16 %v5063_v46, %v5062_v3  ;;  %v3578_v15 = vpop.permute.xlu1 %3577  ;;  %v4505_v47 = vadd.f32 %v4441_v57, %v4121_v59 }
 0x3aa   : > { %v9587_v61 = vpack.c.bf16 %v5061_v24, %v5060_v16  ;;  %v3739_v16 = vmul.f32 %v3578_v15, %v8169_v35 }
 0x3ab   : > { %v6977_v0 = vpop.f32.mrb[40].mxu1  ;;  %v4569_v17 = vadd.f32 %v9403_v60, %v4505_v47 }
 0x3ac   : > { %v2531_v9 = vadd.f32 %v6977_v0, %v9274_v30  ;;  %7402 = vset.pattern.permute.xlu1 %v10781_v49  ;;  %v2522_v1 = vpop.f32.mrb[41].mxu1 }
 0x3ad   : > { %v2523_v25 = vadd.f32 %v9274_v30, %v2522_v1  ;;  %3973 = vperm.xlu1 %7402, %v9575_v2   ;;  %v6978_v28 = vpop.f32.mrb[42].mxu1  ;;  %v4633_v27 = vmax.f32 %v4569_v17, 0.0 }
 0x3ae   : > { %v2534_v6 = vadd.f32 %v6978_v28, %v9274_v30  ;;  %v3922_v7 = vpop.permute.xlu1 %3921  ;;  %v2525_v58 = vpop.f32.mrb[43].mxu1  ;;  %v2659_v31 = vmax.f32 %v2531_v9, 0.0 }
 0x3af   : > { %v2526_v18 = vadd.f32 %v9274_v30, %v2525_v58  ;;  %v2657_v32 = vmax.f32 %v2523_v25, 0.0  ;;  %v4058_v30 = vmul.f32 %v8823_v12, %v8162_v53  ;;  %v4059_v46 = vmul.f32 %v3922_v7, %v8162_v53  ;;  %v9623_v58 = vld [vmem:[%s10733_s6] ss:$0 sm:$0xff] }
 0x3b0   : > { %v2660_v42 = vmax.f32 %v2534_v6, 0.0 }
 0x3b1   : > { %v2658_v52 = vmax.f32 %v2526_v18, 0.0  ;;  %3977 = vperm.xlu1 %7402, %v7502_v37   ;;  %v4122_v3 = vadd.f32 %v4058_v30, %v3738_v36  ;;  %v4123_v0 = vadd.f32 %v4059_v46, %v3739_v16 }
 0x3b2   : > { %v2702_v51 = vpack.c.bf16 %v2660_v42, %v2659_v31 }
 0x3b3   : > { %v2701_v40 = vpack.c.bf16 %v2658_v52, %v2657_v32  ;;  %v4294_v56 = vpop.permute.xlu1 %4293  ;;  %v7504_v52 = vld [vmem:[%s7594_s15 + $0x3b0] sm:$0xff] }
 0x3b4   : > { %v4440_v13 = vmul.f32 %v4294_v56, %v8177_v50 }
 0x3b5   : > { %7403 = vset.pattern.permute.xlu1 %v10851_v10  ;;  %7043 = vmatprep.mubr.msk.bf16.mxu1 %vm2736_vm1, %v2701_v40 }
 0x3b6   : > { %v4504_v19 = vadd.f32 %v4440_v13, %v4120_v43  ;;  %3657 = vperm.xlu1 %7403, %v6471_v11   ;;  %7044 = vmatmul.mubr.msk.bf16.gmra.mrb[104].mxu1 %vm2736_vm1, %v2702_v51 }
 0x3b7   : > { %v4302_v39 = vpop.permute.xlu1 %4301 }
 0x3b8   : > { %v4568_v12 = vadd.f32 %v9403_v60, %v4504_v19  ;;  %v4442_v54 = vmul.f32 %v4302_v39, %v8177_v50 }
 0x3ba   : > { %v4632_v24 = vmax.f32 %v4568_v12, 0.0  ;;  %v4506_v26 = vadd.f32 %v4442_v54, %v4122_v3  ;;  %7404 = vset.pattern.permute.xlu1 %v10781_v49 }
 0x3bb   : > { %3985 = vperm.xlu1 %7404, %v6471_v11   ;;  %v4306_v45 = vpop.permute.xlu1 %4305 }
 0x3bc   : > { %v4443_v9 = vmul.f32 %v4306_v45, %v8177_v50  ;;  %v4678_v1 = vpack.c.bf16 %v4633_v27, %v4632_v24  ;;  %v4570_v25 = vadd.f32 %v9403_v60, %v4506_v26  ;;  %v9638_v45 = vld [vmem:[%s7594_s15 + $0x3c8] sm:$0xff] }
 0x3be   : > { %v4507_v28 = vadd.f32 %v4443_v9, %v4123_v0  ;;  %7119 = vmatprep.mubr.bf16.mxu0 %v4678_v1  ;;  %v4634_v6 = vmax.f32 %v4570_v25, 0.0 }
 0x3bf   : > { %7405 = vset.pattern.permute.xlu1 %v10765_v8 }
 0x3c0   : > { %v4571_v15 = vadd.f32 %v9403_v60, %v4507_v28  ;;  %4357 = vperm.xlu1 %7405, %v9575_v2   ;;  %v3588_v57 = vpop.permute.xlu1 %3587 }
 0x3c1   : > { %v6981_v59 = vpop.f32.mrb[44].mxu1 }
 0x3c2   : > { %v4635_v7 = vmax.f32 %v4571_v15, 0.0  ;;  %v2547_v18 = vadd.f32 %v9623_v58, %v6981_v59  ;;  %v2538_v20 = vpop.f32.mrb[45].mxu1  ;;  %v7506_v59 = vld [vmem:[%s7594_s15 + $0x3c0] sm:$0xff] }
 0x3c3   : > { %v2539_v31 = vadd.f32 %v9623_v58, %v2538_v20  ;;  %v6982_v42 = vpop.f32.mrb[46].mxu1  ;;  %v3741_v20 = vmul.f32 %v3588_v57, %v8169_v35  ;;  %v4447_v57 = vmul.f32 %v9054_v38, %v8177_v50 }
 0x3c4   : > { %v2550_v32 = vadd.f32 %v9623_v58, %v6982_v42  ;;  %4365 = vperm.xlu1 %7405, %v7504_v52   ;;  %v2541_v2 = vpop.f32.mrb[47].mxu1  ;;  %v4679_v37 = vpack.c.bf16 %v4635_v7, %v4634_v6  ;;  %v2663_v51 = vmax.f32 %v2547_v18, 0.0  ;;  %v4444_v7 = vmul.f32 %v9050_v29, %v8177_v50 }
 0x3c5   : > { %v2542_v22 = vadd.f32 %v9623_v58, %v2541_v2  ;;  %v3926_v47 = vpop.permute.xlu1 %3925  ;;  %v2661_v40 = vmax.f32 %v2539_v31, 0.0 }
 0x3c6   : > { %v2664_v44 = vmax.f32 %v2550_v32, 0.0  ;;  %7120 = vmatmul.mubr.bf16.gmra.mrb[100].mxu0 %v4679_v37  ;;  %v4060_v9 = vmul.f32 %v3926_v47, %v8162_v53  ;;  %v10884_v32 = vld [vmem:[#allocation5_spill] sm:$0xff]  ;;  %v7507_v37 = vld [vmem:[%s7594_s15 + $0x3d0] sm:$0xff] }
 0x3c7   : > { %v2662_v56 = vmax.f32 %v2542_v22, 0.0  ;;  %v7097_v30 = vpop.f32.mrb[76].mxu0  ;;  %v4061_v52 = vmul.f32 %v10884_v32, %v8162_v53 }
 0x3c8   : > { %v2704_v36 = vpack.c.bf16 %v2664_v44, %v2663_v51  ;;  %v4854_v43 = vadd.f32 %v7097_v30, %v9435_v55  ;;  %4369 = vperm.xlu1 %7405, %v6471_v11   ;;  %v4845_v13 = vpop.f32.mrb[77].mxu0  ;;  %v3583_v11 = vpop.permute.xlu0 %3582 }
 0x3c9   : > { %v2703_v19 = vpack.c.bf16 %v2662_v56, %v2661_v40  ;;  %v4846_v17 = vadd.f32 %v9435_v55, %v4845_v13  ;;  %v7098_v39 = vpop.f32.mrb[78].mxu0  ;;  %v3740_v0 = vmul.f32 %v3583_v11, %v8169_v35  ;;  %v4125_v40 = vadd.f32 %v4061_v52, %v3741_v20 }
 0x3ca   : > { %v4857_v3 = vadd.f32 %v7098_v39, %v9435_v55  ;;  %v3593_v46 = vpop.permute.xlu1 %3592  ;;  %v4848_v12 = vpop.f32.mrb[79].mxu0  ;;  %v5066_v16 = vmax.f32 %v4854_v43, 0.0  ;;  %v10885_v43 = vld [vmem:[#allocation4_spill] sm:$0xff] }
 0x3cb   : > { %v4849_v54 = vadd.f32 %v9435_v55, %v4848_v12  ;;  %7047 = vmatprep.mubr.msk.bf16.mxu1 %vm2736_vm1, %v2703_v19  ;;  %v5064_v26 = vmax.f32 %v4846_v17, 0.0  ;;  %v4124_v15 = vadd.f32 %v4060_v9, %v3740_v0  ;;  %v3742_v47 = vmul.f32 %v3593_v46, %v8169_v35 }
 0x3cc   : > { %v5067_v24 = vmax.f32 %v4857_v3, 0.0  ;;  %7406 = vset.pattern.permute.xlu1 %v10851_v10  ;;  %7048 = vmatmul.mubr.msk.bf16.gmra.mrb[108].mxu1 %vm2736_vm1, %v2704_v36  ;;  %v4062_v13 = vmul.f32 %v10885_v43, %v8162_v53 }
 0x3cd   : > { %v5065_v27 = vmax.f32 %v4849_v54, 0.0  ;;  %3667 = vperm.xlu1 %7406, %v9638_v45   ;;  %v4508_v42 = vadd.f32 %v4444_v7, %v4124_v15  ;;  %v7508_v54 = vld [vmem:[%s7594_s15 + $0x3d8] sm:$0xff] }
 0x3ce   : > { %v9643_v1 = vpack.c.bf16 %v5067_v24, %v5066_v16  ;;  %v3598_v25 = vpop.permute.xlu1 %3597  ;;  %v4126_v38 = vadd.f32 %v4062_v13, %v3742_v47 }
 0x3cf   : > { %v9645_v28 = vpack.c.bf16 %v5065_v27, %v5064_v26  ;;  %v3743_v31 = vmul.f32 %v3598_v25, %v8169_v35  ;;  %v4572_v39 = vadd.f32 %v9403_v60, %v4508_v42 }
 0x3d1   : > { %7407 = vset.pattern.permute.xlu1 %v10781_v49  ;;  %v4636_v15 = vmax.f32 %v4572_v39, 0.0 }
 0x3d2   : > { %3989 = vperm.xlu1 %7407, %v7506_v59  }
 0x3d3   : > { %v3938_v6 = vpop.permute.xlu1 %3937 }
 0x3d4   : > { %v4063_v18 = vmul.f32 %v3938_v6, %v8162_v53 }
 0x3d6   : > { %7408 = vset.pattern.permute.xlu1 %v10851_v10  ;;  %v4127_v2 = vadd.f32 %v4063_v18, %v3743_v31 }
 0x3d7   : > { %3672 = vperm.xlu1 %7408, %v7507_v37   ;;  %v6985_v22 = vpop.f32.mrb[48].mxu1 }
 0x3d8   : > { %v2563_v29 = vadd.f32 %v9623_v58, %v6985_v22  ;;  %v4314_v51 = vpop.permute.xlu1 %4313  ;;  %v2554_v44 = vpop.f32.mrb[49].mxu1  ;;  %v4511_v3 = vadd.f32 %v4447_v57, %v4127_v2 }
 0x3d9   : > { %v4445_v56 = vmul.f32 %v4314_v51, %v8177_v50  ;;  %v2555_v30 = vadd.f32 %v9623_v58, %v2554_v44  ;;  %v6986_v36 = vpop.f32.mrb[50].mxu1 }
 0x3da   : > { %v2566_v19 = vadd.f32 %v9623_v58, %v6986_v36  ;;  %v2557_v17 = vpop.f32.mrb[51].mxu1  ;;  %v2667_v16 = vmax.f32 %v2563_v29, 0.0  ;;  %v4575_v18 = vadd.f32 %v9403_v60, %v4511_v3  ;;  %v9683_v36 = vld [vmem:[%s7594_s15 + $0x3e0] sm:$0xff] }
 0x3db   : > { %v4509_v46 = vadd.f32 %v4445_v56, %v4125_v40  ;;  %v2558_v12 = vadd.f32 %v9623_v58, %v2557_v17  ;;  %3677 = vperm.xlu1 %7408, %v7508_v54   ;;  %v2665_v27 = vmax.f32 %v2555_v30, 0.0  ;;  %v3608_v17 = vpop.permute.xlu0 %3607 }
 0x3dc   : > { %v2668_v24 = vmax.f32 %v2566_v19, 0.0  ;;  %v4318_v11 = vpop.permute.xlu1 %4317  ;;  %v4639_v52 = vmax.f32 %v4575_v18, 0.0 }
 0x3dd   : > { %v4573_v26 = vadd.f32 %v9403_v60, %v4509_v46  ;;  %v2666_v0 = vmax.f32 %v2558_v12, 0.0  ;;  %v4446_v9 = vmul.f32 %v4318_v11, %v8177_v50 }
 0x3de   : > { %v2706_v25 = vpack.c.bf16 %v2668_v24, %v2667_v16  ;;  %v3745_v24 = vmul.f32 %v3608_v17, %v8169_v35 }
 0x3df   : > { %v4637_v59 = vmax.f32 %v4573_v26, 0.0  ;;  %v2705_v6 = vpack.c.bf16 %v2666_v0, %v2665_v27  ;;  %v4510_v7 = vadd.f32 %v4446_v9, %v4126_v38  ;;  %7409 = vset.pattern.permute.xlu1 %v10781_v49 }
 0x3e0   : > { %4001 = vperm.xlu1 %7409, %v7508_v54  }
 0x3e1   : > { %v4574_v20 = vadd.f32 %v9403_v60, %v4510_v7  ;;  %v3603_v31 = vpop.permute.xlu1 %3602  ;;  %7051 = vmatprep.mubr.msk.bf16.mxu1 %vm2736_vm1, %v2705_v6  ;;  %v4680_v42 = vpack.c.bf16 %v4637_v59, %v4636_v15 }
 0x3e2   : > { %7052 = vmatmul.mubr.msk.bf16.gmra.mrb[112].mxu1 %vm2736_vm1, %v2706_v25 }
 0x3e3   : > { %v4638_v32 = vmax.f32 %v4574_v20, 0.0  ;;  %7123 = vmatprep.mubr.bf16.mxu0 %v4680_v42 }
 0x3e4   : > { %7410 = vset.pattern.permute.xlu1 %v10765_v8 }
 0x3e5   : > { %4377 = vperm.xlu1 %7410, %v9638_v45   ;;  %v4681_v2 = vpack.c.bf16 %v4639_v52, %v4638_v32  ;;  %v4449_v32 = vmul.f32 %v9065_v62, %v8177_v50 }
 0x3e6   : > { %v3942_v22 = vpop.permute.xlu1 %3941 }
 0x3e7   : > { %7124 = vmatmul.mubr.bf16.gmra.mrb[104].mxu0 %v4681_v2  ;;  %v4064_v52 = vmul.f32 %v3942_v22, %v8162_v53  ;;  %v3613_v2 = vpop.permute.xlu0 %3612 }
 0x3e8   : > { %v7101_v47 = vpop.f32.mrb[80].mxu0 }
 0x3e9   : > { %v4870_v29 = vadd.f32 %v7101_v47, %v9435_v55  ;;  %4381 = vperm.xlu1 %7410, %v7507_v37   ;;  %v4861_v51 = vpop.f32.mrb[81].mxu0  ;;  %v7509_v47 = vld [vmem:[%s7594_s15 + $0x3e8] sm:$0xff] }
 0x3ea   : > { %v4862_v44 = vadd.f32 %v9435_v55, %v4861_v51  ;;  %v3946_v57 = vpop.permute.xlu1 %3945  ;;  %v7102_v40 = vpop.f32.mrb[82].mxu0 }
 0x3eb   : > { %v4873_v56 = vadd.f32 %v7102_v40, %v9435_v55  ;;  %v4864_v30 = vpop.f32.mrb[83].mxu0  ;;  %v5070_v45 = vmax.f32 %v4870_v29, 0.0  ;;  %v4065_v11 = vmul.f32 %v3946_v57, %v8162_v53  ;;  %v3744_v29 = vmul.f32 %v3603_v31, %v8169_v35  ;;  %v6479_v57 = vld [vmem:[%s7594_s15 + $0x3f8] sm:$0xff]  ;;  %v10886_v40 = vld [vmem:[#allocation6_spill] sm:$0xff] }
 0x3ec   : > { %v4865_v43 = vadd.f32 %v9435_v55, %v4864_v30  ;;  %v5068_v39 = vmax.f32 %v4862_v44, 0.0  ;;  %v3746_v30 = vmul.f32 %v3613_v2, %v8169_v35 }
 0x3ed   : > { %v5071_v13 = vmax.f32 %v4873_v56, 0.0  ;;  %7412 = vset.pattern.permute.xlu1 %v10851_v10  ;;  %v6989_v19 = vpop.f32.mrb[52].mxu1  ;;  %v4129_v7 = vadd.f32 %v4065_v11, %v3745_v24  ;;  %v4066_v56 = vmul.f32 %v10886_v40, %v8162_v53  ;;  %v4128_v62 = vadd.f32 %v4064_v52, %v3744_v29 }
 0x3ee   : > { %v5069_v37 = vmax.f32 %v4865_v43, 0.0  ;;  %v2579_v3 = vadd.f32 %v9623_v58, %v6989_v19  ;;  %3682 = vperm.xlu1 %7412, %v9683_v36   ;;  %v2570_v46 = vpop.f32.mrb[53].mxu1 }
 0x3ef   : > { %v9689_v12 = vpack.c.bf16 %v5071_v13, %v5070_v45  ;;  %v2571_v54 = vadd.f32 %v9623_v58, %v2570_v46  ;;  %v3618_v38 = vpop.permute.xlu1 %3617  ;;  %v6990_v16 = vpop.f32.mrb[54].mxu1  ;;  %v4513_v51 = vadd.f32 %v4449_v32, %v4129_v7  ;;  %v4130_v13 = vadd.f32 %v4066_v56, %v3746_v30 }
 0x3f0   : > { %v9694_v26 = vpack.c.bf16 %v5069_v37, %v5068_v39  ;;  %v2582_v27 = vadd.f32 %v9623_v58, %v6990_v16  ;;  %v2573_v0 = vpop.f32.mrb[55].mxu1  ;;  %v2671_v25 = vmax.f32 %v2579_v3, 0.0  ;;  %v3747_v37 = vmul.f32 %v3618_v38, %v8169_v35 }
 0x3f1   : > { %v2574_v9 = vadd.f32 %v9623_v58, %v2573_v0  ;;  %v2669_v59 = vmax.f32 %v2571_v54, 0.0  ;;  %v4577_v45 = vadd.f32 %v9403_v60, %v4513_v51  ;;  %v7511_v51 = vld [vmem:[%s7594_s15 + $0x3f0] sm:$0xff] }
 0x3f2   : > { %v2672_v15 = vmax.f32 %v2582_v27, 0.0  ;;  %7413 = vset.pattern.permute.xlu1 %v10781_v49 }
 0x3f3   : > { %v2670_v6 = vmax.f32 %v2574_v9, 0.0  ;;  %4005 = vperm.xlu1 %7413, %v9683_v36   ;;  %v4641_v54 = vmax.f32 %v4577_v45, 0.0 }
 0x3f4   : > { %v2708_v18 = vpack.c.bf16 %v2672_v15, %v2671_v25  ;;  %v3954_v20 = vpop.permute.xlu1 %3953 }
 0x3f5   : > { %v2707_v42 = vpack.c.bf16 %v2670_v6, %v2669_v59  ;;  %v4067_v19 = vmul.f32 %v3954_v20, %v8162_v53  ;;  %v9727_v59 = vld [vmem:[%s10729_s2] ss:$0 sm:$0xff] }
 0x3f7   : > { %4009 = vperm.xlu1 %7413, %v7509_v47   ;;  %7055 = vmatprep.mubr.msk.bf16.mxu1 %vm2736_vm1, %v2707_v42  ;;  %v4131_v16 = vadd.f32 %v4067_v19, %v3747_v37  ;;  %v3623_v37 = vpop.permute.xlu0 %3622 }
 0x3f8   : > { %7056 = vmatmul.mubr.msk.bf16.gmra.mrb[116].mxu1 %vm2736_vm1, %v2708_v18 }
 0x3f9   : > { %v4326_v44 = vpop.permute.xlu1 %4325 }
 0x3fa   : > { %v4448_v22 = vmul.f32 %v4326_v44, %v8177_v50 }
 0x3fb   : > { %7415 = vset.pattern.permute.xlu1 %v10851_v10 }
 0x3fc   : > { %v4512_v43 = vadd.f32 %v4448_v22, %v4128_v62  ;;  %3697 = vperm.xlu1 %7415, %v6479_v57  }
 0x3fd   : > { %v4334_v31 = vpop.permute.xlu1 %4333 }
 0x3fe   : > { %v4576_v17 = vadd.f32 %v9403_v60, %v4512_v43  ;;  %v4450_v39 = vmul.f32 %v4334_v31, %v8177_v50 }
 0x400   : > { %v4640_v3 = vmax.f32 %v4576_v17, 0.0  ;;  %v4514_v46 = vadd.f32 %v4450_v39, %v4130_v13  ;;  %7416 = vset.pattern.permute.xlu1 %v10781_v49 }
 0x401   : > { %4017 = vperm.xlu1 %7416, %v6479_v57   ;;  %v4338_v10 = vpop.permute.xlu1 %4337 }
 0x402   : > { %v4451_v24 = vmul.f32 %v4338_v10, %v8177_v50  ;;  %v4682_v11 = vpack.c.bf16 %v4641_v54, %v4640_v3  ;;  %v4578_v0 = vadd.f32 %v9403_v60, %v4514_v46  ;;  %v3748_v54 = vmul.f32 %v3623_v37, %v8169_v35 }
 0x403   : > { %v6993_v27 = vpop.f32.mrb[56].mxu1 }
 0x404   : > { %v4515_v9 = vadd.f32 %v4451_v24, %v4131_v16  ;;  %v2595_v25 = vadd.f32 %v9623_v58, %v6993_v27  ;;  %v2586_v15 = vpop.f32.mrb[57].mxu1  ;;  %7127 = vmatprep.mubr.bf16.mxu0 %v4682_v11  ;;  %v4642_v42 = vmax.f32 %v4578_v0, 0.0  ;;  %v4452_v27 = vmul.f32 %v9074_v5, %v8177_v50 }
 0x405   : > { %v2587_v38 = vadd.f32 %v9623_v58, %v2586_v15  ;;  %7417 = vset.pattern.permute.xlu1 %v10765_v8  ;;  %v6994_v49 = vpop.f32.mrb[58].mxu1 }
 0x406   : > { %v4579_v6 = vadd.f32 %v9727_v59, %v4515_v9  ;;  %v2598_v60 = vadd.f32 %v9623_v58, %v6994_v49  ;;  %4389 = vperm.xlu1 %7417, %v9683_v36   ;;  %v3628_v7 = vpop.permute.xlu1 %3627  ;;  %v2589_v18 = vpop.f32.mrb[59].mxu1  ;;  %v2675_v8 = vmax.f32 %v2595_v25, 0.0 }
 0x407   : > { %v2590_v20 = vadd.f32 %v9623_v58, %v2589_v18  ;;  %v2673_v2 = vmax.f32 %v2587_v38, 0.0  ;;  %v3749_v9 = vmul.f32 %v3628_v7, %v8169_v35  ;;  %v10887_v18 = vld [vmem:[#allocation7_spill] sm:$0xff]  ;;  %v4455_v7 = vmul.f32 %v9087_v34, %v8177_v50  ;;  %v9769_v34 = vld [vmem:[%s10735_s8] ss:$0 sm:$0xff] }
 0x408   : > { %v4643_v32 = vmax.f32 %v4579_v6, 0.0  ;;  %v2676_v52 = vmax.f32 %v2598_v60, 0.0 }
 0x409   : > { %v2674_v47 = vmax.f32 %v2590_v20, 0.0  ;;  %v4069_v20 = vmul.f32 %v10887_v18, %v8162_v53 }
 0x40a   : > { %v2710_v29 = vpack.c.bf16 %v2676_v52, %v2675_v8  ;;  %4397 = vperm.xlu1 %7417, %v7511_v51   ;;  %v4683_v44 = vpack.c.bf16 %v4643_v32, %v4642_v42 }
 0x40b   : > { %v2709_v40 = vpack.c.bf16 %v2674_v47, %v2673_v2  ;;  %v3958_v56 = vpop.permute.xlu1 %3957  ;;  %v4133_v2 = vadd.f32 %v4069_v20, %v3749_v9 }
 0x40c   : > { %7128 = vmatmul.mubr.bf16.gmra.mrb[108].mxu0 %v4683_v44  ;;  %v10888_v44 = vlaneseq }
 0x40d   : > { %7059 = vmatprep.mubr.msk.bf16.mxu1 %vm2736_vm1, %v2709_v40  ;;  %v7105_v36 = vpop.f32.mrb[84].mxu0 }
 0x40e   : > { %v4886_v30 = vadd.f32 %v7105_v36, %v9435_v55  ;;  %4401 = vperm.xlu1 %7417, %v6479_v57   ;;  %7060 = vmatmul.mubr.msk.bf16.gmra.mrb[120].mxu1 %vm2736_vm1, %v2710_v29  ;;  %v4877_v62 = vpop.f32.mrb[85].mxu0  ;;  %v4068_v57 = vmul.f32 %v3958_v56, %v8162_v53  ;;  %v9760_v40 = vand.u32 127, %v10888_v44  ;;  %v9762_v56 = vpop.permute.xlu0 %3647 }
 0x40f   : > { %v4878_v22 = vadd.f32 %v9435_v55, %v4877_v62  ;;  %v7106_v43 = vpop.f32.mrb[86].mxu0 }
 0x410   : > { %v4889_v45 = vadd.f32 %v7106_v43, %v9435_v55  ;;  %v3633_v31 = vpop.permute.xlu1 %3632  ;;  %v4880_v13 = vpop.f32.mrb[87].mxu0  ;;  %v5074_v17 = vmax.f32 %v4886_v30, 0.0  ;;  %v4132_v11 = vadd.f32 %v4068_v57, %v3748_v54  ;;  %vm339_vm2 = vcmp.eq.s32.totalorder %v9760_v40, 1 }
 0x411   : > { %v4881_v19 = vadd.f32 %v9435_v55, %v4880_v13  ;;  %v5072_v3 = vmax.f32 %v4878_v22, 0.0  ;;  %v3750_v36 = vmul.f32 %v3633_v31, %v8169_v35  ;;  %v10889_v13 = vld [vmem:[#allocation2_spill] sm:$0xff] }
 0x412   : > { %v5075_v39 = vmax.f32 %v4889_v45, 0.0  ;;  %v4516_v42 = vadd.f32 %v4452_v27, %v4132_v11 }
 0x413   : > { %v5073_v46 = vmax.f32 %v4881_v19, 0.0  ;;  %v4070_v19 = vmul.f32 %v10889_v13, %v8162_v53 }
 0x414   : > { %v9742_v10 = vpack.c.bf16 %v5075_v39, %v5074_v17  ;;  %v3638_v16 = vpop.permute.xlu1 %3637  ;;  %v4580_v45 = vadd.f32 %v9727_v59, %v4516_v42 }
 0x415   : > { %v9744_v24 = vpack.c.bf16 %v5073_v46, %v5072_v3  ;;  %v3751_v25 = vmul.f32 %v3638_v16, %v8169_v35  ;;  %v4134_v54 = vadd.f32 %v4070_v19, %v3750_v36 }
 0x419   : > { %v3970_v0 = vpop.permute.xlu1 %3969  ;;  %v6997_v55 = vpop.f32.mrb[60].mxu1 }
 0x41a   : > { %v4071_v15 = vmul.f32 %v3970_v0, %v8162_v53  ;;  %v2611_v38 = vadd.f32 %v9623_v58, %v6997_v55  ;;  %v2602_v49 = vpop.f32.mrb[61].mxu1 }
 0x41b   : > { %v2603_v6 = vadd.f32 %v9623_v58, %v2602_v49  ;;  %v6998_v60 = vpop.f32.mrb[62].mxu1 }
 0x41c   : > { %v4135_v32 = vadd.f32 %v4071_v15, %v3751_v25  ;;  %v2614_v5 = vadd.f32 %v9623_v58, %v6998_v60  ;;  %v2605_v8 = vpop.f32.mrb[63].mxu1  ;;  %v2679_v47 = vmax.f32 %v2611_v38, 0.0  ;;  %v4644_v25 = vmax.f32 %v4580_v45, 0.0  ;;  %v9790_v38 = vpop.permute.xlu0 %3652 }
 0x41d   : > { %v2606_v52 = vadd.f32 %v9623_v58, %v2605_v8  ;;  %v2677_v30 = vmax.f32 %v2603_v6, 0.0 }
 0x41e   : > { %v2680_v29 = vmax.f32 %v2614_v5, 0.0  ;;  %v4346_v51 = vpop.permute.xlu1 %4345  ;;  %v4519_v58 = vadd.f32 %v4455_v7, %v4135_v32 }
 0x41f   : > { %v2678_v62 = vmax.f32 %v2606_v52, 0.0  ;;  %v4453_v22 = vmul.f32 %v4346_v51, %v8177_v50 }
 0x420   : > { %v2712_v43 = vpack.c.bf16 %v2680_v29, %v2679_v47  ;;  %v4583_v15 = vadd.f32 %v9727_v59, %v4519_v58 }
 0x421   : > { %v2711_v17 = vpack.c.bf16 %v2678_v62, %v2677_v30  ;;  %v4517_v39 = vadd.f32 %v4453_v22, %v4133_v2  ;;  %v7005_v31 = vpop.f32.mrb[64].mxu1  ;;  %v9815_v30 = vpop.permute.xlu0 %3662 }
 0x422   : > { %v2876_v37 = vadd.f32 %v7005_v31, %v9769_v34  ;;  %v4350_v3 = vpop.permute.xlu1 %4349  ;;  %v2867_v46 = vpop.f32.mrb[65].mxu1  ;;  %v4647_v51 = vmax.f32 %v4583_v15, 0.0 }
 0x423   : > { %v4581_v57 = vadd.f32 %v9727_v59, %v4517_v39  ;;  %v4454_v16 = vmul.f32 %v4350_v3, %v8177_v50  ;;  %v2868_v11 = vadd.f32 %v9769_v34, %v2867_v46  ;;  %v7006_v27 = vpop.f32.mrb[66].mxu1  ;;  %7063 = vmatprep.mubr.msk.bf16.mxu1 %vm2736_vm1, %v2711_v17 }
 0x424   : > { %v3124_v0 = vmax.f32 %v2876_v37, 0.0  ;;  %v2879_v55 = vadd.f32 %v7006_v27, %v9769_v34  ;;  %v2870_v9 = vpop.f32.mrb[67].mxu1  ;;  %7064 = vmatmul.mubr.msk.bf16.gmra.mrb[124].mxu1 %vm2736_vm1, %v2712_v43 }
 0x425   : > { %v4645_v49 = vmax.f32 %v4581_v57, 0.0  ;;  %v4518_v6 = vadd.f32 %v4454_v16, %v4134_v54  ;;  %v3122_v60 = vmax.f32 %v2868_v11, 0.0  ;;  %v2871_v18 = vadd.f32 %v9769_v34, %v2870_v9  ;;  %7155 = vmatprep.mubr.msk.bf16.mxu1 %vm2231_vm0, %v9456_v33  ;;  %v9835_v54 = vld [vmem:[%s10731_s4] ss:$0 sm:$0xff] }
 0x426   : > { %v3188_v20 = vsel %vm339_vm2, %v2876_v37, %v3124_v0  ;;  %v3125_v42 = vmax.f32 %v2879_v55, 0.0 }
 0x427   : > { %3253 = vst.msk [vmem:[%s9785_s25 + $0x10] sm:$0xff] %vm3250_vm3, %v3188_v20  ;;  %v4582_v32 = vadd.f32 %v9727_v59, %v4518_v6  ;;  %v3186_v5 = vsel %vm339_vm2, %v2868_v11, %v3122_v60  ;;  %v3123_v8 = vmax.f32 %v2871_v18, 0.0  ;;  %v9802_v7 = vpop.permute.xlu1 %3642  ;;  %v4684_v52 = vpack.c.bf16 %v4645_v49, %v4644_v25  ;;  %v9848_v49 = vpop.permute.xlu0 %3687 }
 0x428   : > { %3251 = vst.msk [vmem:[%s9785_s25] sm:$0xff] %vm3250_vm3, %v3186_v5  ;;  %v3189_v33 = vsel %vm339_vm2, %v2879_v55, %v3125_v42 }
 0x429   : > { %v4646_v2 = vmax.f32 %v4582_v32, 0.0  ;;  %3254 = vst.msk [vmem:[%s9785_s25 + $0x18] sm:$0xff] %vm3250_vm3, %v3189_v33  ;;  %v3187_v47 = vsel %vm339_vm2, %v2871_v18, %v3123_v8  ;;  %v7009_v29 = vpop.f32.mrb[68].mxu1  ;;  %7131 = vmatprep.mubr.bf16.mxu0 %v4684_v52 }
 0x42a   : > { %3252 = vst.msk [vmem:[%s9785_s25 + $0x8] sm:$0xff] %vm3250_vm3, %v3187_v47  ;;  %v2892_v44 = vadd.f32 %v7009_v29, %v9769_v34  ;;  %v2883_v36 = vpop.f32.mrb[69].mxu1 }
 0x42b   : > { %v2884_v62 = vadd.f32 %v9769_v34, %v2883_v36  ;;  %v7010_v22 = vpop.f32.mrb[70].mxu1  ;;  %v4685_v58 = vpack.c.bf16 %v4647_v51, %v4646_v2 }
 0x42c   : > { %v3128_v43 = vmax.f32 %v2892_v44, 0.0  ;;  %v2895_v45 = vadd.f32 %v7010_v22, %v9769_v34  ;;  %v9819_v13 = vpop.permute.xlu1 %3973  ;;  %v2886_v19 = vpop.f32.mrb[71].mxu1  ;;  %7156 = vmatmul.mubr.msk.bf16.vlgmr.msra.gmra.mrb[128].mxu1 %vm2231_vm0, %v9452_v4 }
 0x42d   : > { %v3126_v17 = vmax.f32 %v2884_v62, 0.0  ;;  %v2887_v39 = vadd.f32 %v9769_v34, %v2886_v19  ;;  %7132 = vmatmul.mubr.bf16.gmra.mrb[112].mxu0 %v4685_v58  ;;  %7159 = vmatprep.mubr.msk.bf16.mxu1 %vm2231_vm0, %v9524_v48 }
 0x42e   : > { %v3192_v31 = vsel %vm339_vm2, %v2892_v44, %v3128_v43  ;;  %v3129_v37 = vmax.f32 %v2895_v45, 0.0  ;;  %v7109_v3 = vpop.f32.mrb[88].mxu0  ;;  %v3753_v43 = vmul.f32 %v9762_v56, %v8169_v35 }
 0x42f   : > { %3257 = vst.msk [vmem:[%s9785_s25 + $0x30] sm:$0xff] %vm3250_vm3, %v3192_v31  ;;  %v3190_v46 = vsel %vm339_vm2, %v2884_v62, %v3126_v17  ;;  %v3127_v4 = vmax.f32 %v2887_v39, 0.0  ;;  %v4902_v57 = vadd.f32 %v9835_v54, %v7109_v3  ;;  %v4893_v48 = vpop.f32.mrb[89].mxu0  ;;  %v9876_v17 = vpop.permute.xlu0 %3692 }
 0x430   : > { %3255 = vst.msk [vmem:[%s9785_s25 + $0x20] sm:$0xff] %vm3250_vm3, %v3190_v46  ;;  %v3193_v16 = vsel %vm339_vm2, %v2895_v45, %v3129_v37  ;;  %v4894_v11 = vadd.f32 %v9835_v54, %v4893_v48  ;;  %v3978_v27 = vpop.permute.xlu1 %3977  ;;  %v7110_v0 = vpop.f32.mrb[90].mxu0 }
 0x431   : > { %3258 = vst.msk [vmem:[%s9785_s25 + $0x38] sm:$0xff] %vm3250_vm3, %v3193_v16  ;;  %v3191_v55 = vsel %vm339_vm2, %v2887_v39, %v3127_v4  ;;  %v4905_v9 = vadd.f32 %v9835_v54, %v7110_v0  ;;  %v7013_v25 = vpop.f32.mrb[72].mxu1  ;;  %v4896_v15 = vpop.f32.mrb[91].mxu0  ;;  %v5078_v20 = vmax.f32 %v4902_v57, 0.0  ;;  %v4073_v29 = vmul.f32 %v3978_v27, %v8162_v53 }
 0x432   : > { %3256 = vst.msk [vmem:[%s9785_s25 + $0x28] sm:$0xff] %vm3250_vm3, %v3191_v55  ;;  %v2908_v6 = vadd.f32 %v7013_v25, %v9769_v34  ;;  %v4897_v60 = vadd.f32 %v9835_v54, %v4896_v15  ;;  %v2899_v18 = vpop.f32.mrb[73].mxu1  ;;  %v5076_v8 = vmax.f32 %v4894_v11, 0.0  ;;  %v4457_v4 = vmul.f32 %v9096_v21, %v8177_v50 }
 0x433   : > { %v5079_v42 = vmax.f32 %v4905_v9, 0.0  ;;  %v2900_v32 = vadd.f32 %v9769_v34, %v2899_v18  ;;  %v7014_v5 = vpop.f32.mrb[74].mxu1  ;;  %v4137_v39 = vadd.f32 %v4073_v29, %v3753_v43  ;;  %v4072_v16 = vmul.f32 %v9819_v13, %v8162_v53  ;;  %v3982_v21 = vpop.permute.xlu0 %3981 }
 0x434   : > { %v3132_v52 = vmax.f32 %v2908_v6, 0.0  ;;  %v5077_v33 = vmax.f32 %v4897_v60, 0.0  ;;  %v2911_v2 = vadd.f32 %v7014_v5, %v9769_v34  ;;  %v2902_v47 = vpop.f32.mrb[75].mxu1  ;;  %7160 = vmatmul.mubr.msk.bf16.gmra.mrb[132].mxu1 %vm2231_vm0, %v9522_v41  ;;  %v3752_v13 = vmul.f32 %v9802_v7, %v8169_v35 }
 0x435   : > { %v9859_v51 = vpack.c.bf16 %v5079_v42, %v5078_v20  ;;  %v3130_v44 = vmax.f32 %v2900_v32, 0.0  ;;  %v2903_v36 = vadd.f32 %v9769_v34, %v2902_v47  ;;  %v9862_v62 = vpop.permute.xlu1 %3657  ;;  %7163 = vmatprep.mubr.msk.bf16.mxu1 %vm2231_vm0, %v9587_v61  ;;  %v4521_v55 = vadd.f32 %v4457_v4, %v4137_v39 }
 0x436   : > { %v3196_v22 = vsel %vm339_vm2, %v2908_v6, %v3132_v52  ;;  %v9868_v58 = vpack.c.bf16 %v5077_v33, %v5076_v8  ;;  %v3133_v41 = vmax.f32 %v2911_v2, 0.0  ;;  %v4074_v60 = vmul.f32 %v3982_v21, %v8162_v53 }
 0x437   : > { %3261 = vst.msk [vmem:[%s9785_s25 + $0x50] sm:$0xff] %vm3250_vm3, %v3196_v22  ;;  %v3194_v45 = vsel %vm339_vm2, %v2900_v32, %v3130_v44  ;;  %v3131_v19 = vmax.f32 %v2903_v36, 0.0  ;;  %v4136_v42 = vadd.f32 %v4072_v16, %v3752_v13  ;;  %v4585_v8 = vadd.f32 %v9727_v59, %v4521_v55 }
 0x438   : > { %3259 = vst.msk [vmem:[%s9785_s25 + $0x40] sm:$0xff] %vm3250_vm3, %v3194_v45  ;;  %v3197_v61 = vsel %vm339_vm2, %v2911_v2, %v3133_v41  ;;  %v3755_v39 = vmul.f32 %v9862_v62, %v8169_v35 }
 0x439   : > { %3262 = vst.msk [vmem:[%s9785_s25 + $0x58] sm:$0xff] %vm3250_vm3, %v3197_v61  ;;  %v3195_v31 = vsel %vm339_vm2, %v2903_v36, %v3131_v19  ;;  %v7017_v56 = vpop.f32.mrb[76].mxu1 }
 0x43a   : > { %3260 = vst.msk [vmem:[%s9785_s25 + $0x48] sm:$0xff] %vm3250_vm3, %v3195_v31  ;;  %v2924_v37 = vadd.f32 %v7017_v56, %v9769_v34  ;;  %v3986_v3 = vpop.permute.xlu1 %3985  ;;  %v2915_v46 = vpop.f32.mrb[77].mxu1 }
 0x43b   : > { %v2916_v57 = vadd.f32 %v9769_v34, %v2915_v46  ;;  %v7018_v48 = vpop.f32.mrb[78].mxu1  ;;  %v4075_v29 = vmul.f32 %v3986_v3, %v8162_v53 }
 0x43c   : > { %v3136_v11 = vmax.f32 %v2924_v37, 0.0  ;;  %v2927_v27 = vadd.f32 %v7018_v48, %v9769_v34  ;;  %v2918_v0 = vpop.f32.mrb[79].mxu1  ;;  %7164 = vmatmul.mubr.msk.bf16.gmra.mrb[136].mxu1 %vm2231_vm0, %v9583_v14  ;;  %v3754_v14 = vmul.f32 %v9790_v38, %v8169_v35 }
 0x43d   : > { %v3134_v9 = vmax.f32 %v2916_v57, 0.0  ;;  %v2919_v25 = vadd.f32 %v9769_v34, %v2918_v0  ;;  %7167 = vmatprep.mubr.msk.bf16.mxu1 %vm2231_vm0, %v9645_v28  ;;  %v4139_v16 = vadd.f32 %v4075_v29, %v3755_v39 }
 0x43e   : > { %v3200_v15 = vsel %vm339_vm2, %v2924_v37, %v3136_v11  ;;  %v3137_v6 = vmax.f32 %v2927_v27, 0.0  ;;  %v4138_v47 = vadd.f32 %v4074_v60, %v3754_v14  ;;  %v4649_v37 = vmax.f32 %v4585_v8, 0.0 }
 0x43f   : > { %3265 = vst.msk [vmem:[%s9785_s25 + $0x70] sm:$0xff] %vm3250_vm3, %v3200_v15  ;;  %v3198_v18 = vsel %vm339_vm2, %v2916_v57, %v3134_v9  ;;  %v3135_v28 = vmax.f32 %v2919_v25, 0.0  ;;  %v4358_v20 = vpop.permute.xlu1 %4357 }
 0x440   : > { %3263 = vst.msk [vmem:[%s9785_s25 + $0x60] sm:$0xff] %vm3250_vm3, %v3198_v18  ;;  %v3201_v7 = vsel %vm339_vm2, %v2927_v27, %v3137_v6  ;;  %v4456_v32 = vmul.f32 %v4358_v20, %v8177_v50 }
 0x441   : > { %3266 = vst.msk [vmem:[%s9785_s25 + $0x78] sm:$0xff] %vm3250_vm3, %v3201_v7  ;;  %v3199_v38 = vsel %vm339_vm2, %v2919_v25, %v3135_v28  ;;  %v7021_v5 = vpop.f32.mrb[80].mxu1 }
 0x442   : > { %3264 = vst.msk [vmem:[%s9785_s25 + $0x68] sm:$0xff] %vm3250_vm3, %v3199_v38  ;;  %v4520_v52 = vadd.f32 %v4456_v32, %v4136_v42  ;;  %v2940_v33 = vadd.f32 %v7021_v5, %v9769_v34  ;;  %v2931_v2 = vpop.f32.mrb[81].mxu1 }
 0x443   : > { %v2932_v44 = vadd.f32 %v9769_v34, %v2931_v2  ;;  %v4366_v36 = vpop.permute.xlu1 %4365  ;;  %v7022_v22 = vpop.f32.mrb[82].mxu1 }
 0x444   : > { %v4584_v41 = vadd.f32 %v9727_v59, %v4520_v52  ;;  %v3140_v43 = vmax.f32 %v2940_v33, 0.0  ;;  %v4458_v45 = vmul.f32 %v4366_v36, %v8177_v50  ;;  %v2943_v19 = vadd.f32 %v7022_v22, %v9769_v34  ;;  %v2934_v61 = vpop.f32.mrb[83].mxu1  ;;  %7168 = vmatmul.mubr.msk.bf16.gmra.mrb[140].mxu1 %vm2231_vm0, %v9643_v1 }
 0x445   : > { %v3138_v31 = vmax.f32 %v2932_v44, 0.0  ;;  %v2935_v56 = vadd.f32 %v9769_v34, %v2934_v61  ;;  %7171 = vmatprep.mubr.msk.bf16.mxu1 %vm2231_vm0, %v9694_v26 }
 0x446   : > { %v4648_v3 = vmax.f32 %v4584_v41, 0.0  ;;  %v3204_v46 = vsel %vm339_vm2, %v2940_v33, %v3140_v43  ;;  %v4522_v4 = vadd.f32 %v4458_v45, %v4138_v47  ;;  %v3141_v57 = vmax.f32 %v2943_v19, 0.0 }
 0x447   : > { %3269 = vst.msk [vmem:[%s9785_s25 + $0x90] sm:$0xff] %vm3250_vm3, %v3204_v46  ;;  %v3202_v1 = vsel %vm339_vm2, %v2932_v44, %v3138_v31  ;;  %v3139_v62 = vmax.f32 %v2935_v56, 0.0  ;;  %v4370_v48 = vpop.permute.xlu1 %4369 }
 0x448   : > { %3267 = vst.msk [vmem:[%s9785_s25 + $0x80] sm:$0xff] %vm3250_vm3, %v3202_v1  ;;  %v3205_v26 = vsel %vm339_vm2, %v2943_v19, %v3141_v57  ;;  %v4459_v11 = vmul.f32 %v4370_v48, %v8177_v50  ;;  %v4686_v27 = vpack.c.bf16 %v4649_v37, %v4648_v3  ;;  %v4586_v9 = vadd.f32 %v9727_v59, %v4522_v4 }
 0x449   : > { %3270 = vst.msk [vmem:[%s9785_s25 + $0x98] sm:$0xff] %vm3250_vm3, %v3205_v26  ;;  %v3203_v0 = vsel %vm339_vm2, %v2935_v56, %v3139_v62  ;;  %v7025_v55 = vpop.f32.mrb[84].mxu1 }
 0x44a   : > { %3268 = vst.msk [vmem:[%s9785_s25 + $0x88] sm:$0xff] %vm3250_vm3, %v3203_v0  ;;  %v4523_v25 = vadd.f32 %v4459_v11, %v4139_v16  ;;  %v2956_v21 = vadd.f32 %v7025_v55, %v9769_v34  ;;  %v2947_v13 = vpop.f32.mrb[85].mxu1  ;;  %7135 = vmatprep.mubr.bf16.mxu0 %v4686_v27  ;;  %v4650_v32 = vmax.f32 %v4586_v9, 0.0 }
 0x44b   : > { %v2948_v15 = vadd.f32 %v9769_v34, %v2947_v13  ;;  %v7026_v6 = vpop.f32.mrb[86].mxu1 }
 0x44c   : > { %v4587_v14 = vadd.f32 %v9727_v59, %v4523_v25  ;;  %v3144_v60 = vmax.f32 %v2956_v21, 0.0  ;;  %v2959_v18 = vadd.f32 %v7026_v6, %v9769_v34  ;;  %v9958_v28 = vpop.permute.xlu1 %3667  ;;  %v2950_v20 = vpop.f32.mrb[87].mxu1  ;;  %7172 = vmatmul.mubr.msk.bf16.gmra.mrb[144].mxu1 %vm2231_vm0, %v9689_v12 }
 0x44d   : > { %v3142_v42 = vmax.f32 %v2948_v15, 0.0  ;;  %v2951_v7 = vadd.f32 %v9769_v34, %v2950_v20  ;;  %7175 = vmatprep.mubr.msk.bf16.mxu1 %vm2231_vm0, %v9744_v24  ;;  %v3756_v20 = vmul.f32 %v9815_v30, %v8169_v35  ;;  %v4460_v30 = vmul.f32 %v9106_v63, %v8177_v50 }
 0x44e   : > { %v4651_v38 = vmax.f32 %v4587_v14, 0.0  ;;  %v3208_v5 = vsel %vm339_vm2, %v2956_v21, %v3144_v60  ;;  %v3145_v8 = vmax.f32 %v2959_v18, 0.0 }
 0x44f   : > { %3273 = vst.msk [vmem:[%s9785_s25 + $0xb0] sm:$0xff] %vm3250_vm3, %v3208_v5  ;;  %v3206_v52 = vsel %vm339_vm2, %v2948_v15, %v3142_v42  ;;  %v3143_v33 = vmax.f32 %v2951_v7, 0.0  ;;  %v3994_v5 = vpop.permute.xlu0 %3993 }
 0x450   : > { %3271 = vst.msk [vmem:[%s9785_s25 + $0xa0] sm:$0xff] %vm3250_vm3, %v3206_v52  ;;  %v3209_v12 = vsel %vm339_vm2, %v2959_v18, %v3145_v8  ;;  %v4687_v2 = vpack.c.bf16 %v4651_v38, %v4650_v32 }
 0x451   : > { %3274 = vst.msk [vmem:[%s9785_s25 + $0xb8] sm:$0xff] %vm3250_vm3, %v3209_v12  ;;  %v3207_v24 = vsel %vm339_vm2, %v2951_v7, %v3143_v33  ;;  %v3990_v47 = vpop.permute.xlu1 %3989  ;;  %v7029_v29 = vpop.f32.mrb[88].mxu1 }
 0x452   : > { %3272 = vst.msk [vmem:[%s9785_s25 + $0xa8] sm:$0xff] %vm3250_vm3, %v3207_v24  ;;  %v2972_v44 = vadd.f32 %v7029_v29, %v9769_v34  ;;  %v2963_v36 = vpop.f32.mrb[89].mxu1  ;;  %7136 = vmatmul.mubr.bf16.gmra.mrb[116].mxu0 %v4687_v2  ;;  %v4076_v9 = vmul.f32 %v3990_v47, %v8162_v53  ;;  %v4077_v29 = vmul.f32 %v3994_v5, %v8162_v53 }
 0x453   : > { %v2964_v22 = vadd.f32 %v9769_v34, %v2963_v36  ;;  %v7030_v41 = vpop.f32.mrb[90].mxu1  ;;  %v7113_v43 = vpop.f32.mrb[92].mxu0 }
 0x454   : > { %v3148_v45 = vmax.f32 %v2972_v44, 0.0  ;;  %v2975_v19 = vadd.f32 %v7030_v41, %v9769_v34  ;;  %v2966_v61 = vpop.f32.mrb[91].mxu1  ;;  %v4909_v39 = vpop.f32.mrb[93].mxu0  ;;  %7176 = vmatmul.mubr.msk.bf16.gmra.mrb[148].mxu1 %vm2231_vm0, %v9742_v10  ;;  %v4918_v56 = vadd.f32 %v9835_v54, %v7113_v43  ;;  %v4140_v33 = vadd.f32 %v4076_v9, %v3756_v20 }
 0x455   : > { %v3146_v31 = vmax.f32 %v2964_v22, 0.0  ;;  %v2967_v37 = vadd.f32 %v9769_v34, %v2966_v61  ;;  %v7114_v3 = vpop.f32.mrb[94].mxu0  ;;  %7179 = vmatprep.mubr.msk.bf16.mxu1 %vm2231_vm0, %v9868_v58  ;;  %v4910_v57 = vadd.f32 %v9835_v54, %v4909_v39  ;;  %v4463_v61 = vmul.f32 %v9112_v23, %v8177_v50  ;;  %v3998_v39 = vpop.permute.xlu0 %3997 }
 0x456   : > { %v3212_v46 = vsel %vm339_vm2, %v2972_v44, %v3148_v45  ;;  %v3149_v4 = vmax.f32 %v2975_v19, 0.0  ;;  %v9993_v1 = vpop.permute.xlu1 %3672  ;;  %v4912_v10 = vpop.f32.mrb[95].mxu0  ;;  %v4921_v16 = vadd.f32 %v9835_v54, %v7114_v3  ;;  %v5082_v11 = vmax.f32 %v4918_v56, 0.0 }
 0x457   : > { %3277 = vst.msk [vmem:[%s9785_s25 + $0xd0] sm:$0xff] %vm3250_vm3, %v3212_v46  ;;  %v3210_v62 = vsel %vm339_vm2, %v2964_v22, %v3146_v31  ;;  %v3147_v48 = vmax.f32 %v2967_v37, 0.0  ;;  %v4913_v26 = vadd.f32 %v9835_v54, %v4912_v10  ;;  %v5080_v25 = vmax.f32 %v4910_v57, 0.0 }
 0x458   : > { %3275 = vst.msk [vmem:[%s9785_s25 + $0xc0] sm:$0xff] %vm3250_vm3, %v3210_v62  ;;  %v3213_v58 = vsel %vm339_vm2, %v2975_v19, %v3149_v4  ;;  %v5083_v0 = vmax.f32 %v4921_v16, 0.0  ;;  %v3757_v44 = vmul.f32 %v9958_v28, %v8169_v35  ;;  %v4524_v45 = vadd.f32 %v4460_v30, %v4140_v33 }
 0x459   : > { %3278 = vst.msk [vmem:[%s9785_s25 + $0xd8] sm:$0xff] %vm3250_vm3, %v3213_v58  ;;  %v3211_v27 = vsel %vm339_vm2, %v2967_v37, %v3147_v48  ;;  %v7033_v55 = vpop.f32.mrb[92].mxu1  ;;  %v5081_v21 = vmax.f32 %v4913_v26, 0.0  ;;  %v4078_v3 = vmul.f32 %v3998_v39, %v8162_v53  ;;  %v3758_v23 = vmul.f32 %v9993_v1, %v8169_v35 }
 0x45a   : > { %3276 = vst.msk [vmem:[%s9785_s25 + $0xc8] sm:$0xff] %vm3250_vm3, %v3211_v27  ;;  %v2988_v13 = vadd.f32 %v7033_v55, %v9769_v34  ;;  %v3678_v15 = vpop.permute.xlu1 %3677  ;;  %v2979_v6 = vpop.f32.mrb[93].mxu1  ;;  %v5131_v14 = vpack.c.bf16 %v5083_v0, %v5082_v11  ;;  %v4141_v46 = vadd.f32 %v4077_v29, %v3757_v44  ;;  %v4588_v27 = vadd.f32 %v9727_v59, %v4524_v45 }
 0x45b   : > { %v2980_v60 = vadd.f32 %v9769_v34, %v2979_v6  ;;  %v7034_v18 = vpop.f32.mrb[94].mxu1  ;;  %v5130_v42 = vpack.c.bf16 %v5081_v21, %v5080_v25  ;;  %v3759_v63 = vmul.f32 %v3678_v15, %v8169_v35 }
 0x45c   : > { %v3152_v7 = vmax.f32 %v2988_v13, 0.0  ;;  %v2991_v32 = vadd.f32 %v7034_v18, %v9769_v34  ;;  %v2982_v38 = vpop.f32.mrb[95].mxu1  ;;  %7180 = vmatmul.mubr.msk.bf16.gmra.mrb[152].mxu1 %vm2231_vm0, %v9859_v51  ;;  %v4652_v20 = vmax.f32 %v4588_v27, 0.0 }
 0x45d   : > { %v3150_v8 = vmax.f32 %v2980_v60, 0.0  ;;  %v2983_v52 = vadd.f32 %v9769_v34, %v2982_v38  ;;  %7183 = vmatprep.mubr.msk.bf16.mxu1 %vm2231_vm0, %v5130_v42 }
 0x45e   : > { %v3216_v12 = vsel %vm339_vm2, %v2988_v13, %v3152_v7  ;;  %v3153_v2 = vmax.f32 %v2991_v32, 0.0  ;;  %v4142_v13 = vadd.f32 %v4078_v3, %v3758_v23 }
 0x45f   : > { %3281 = vst.msk [vmem:[%s9785_s25 + $0xf0] sm:$0xff] %vm3250_vm3, %v3216_v12  ;;  %v3214_v51 = vsel %vm339_vm2, %v2980_v60, %v3150_v8  ;;  %v3151_v24 = vmax.f32 %v2983_v52, 0.0  ;;  %v4002_v47 = vpop.permute.xlu1 %4001 }
 0x460   : > { %3279 = vst.msk [vmem:[%s9785_s25 + $0xe0] sm:$0xff] %vm3250_vm3, %v3214_v51  ;;  %v3217_v36 = vsel %vm339_vm2, %v2991_v32, %v3153_v2  ;;  %v4079_v22 = vmul.f32 %v4002_v47, %v8162_v53 }
 0x461   : > { %3282 = vst.msk [vmem:[%s9785_s25 + $0xf8] sm:$0xff] %vm3250_vm3, %v3217_v36  ;;  %v3215_v41 = vsel %vm339_vm2, %v2983_v52, %v3151_v24  ;;  %v7037_v43 = vpop.f32.mrb[96].mxu1 }
 0x462   : > { %3280 = vst.msk [vmem:[%s9785_s25 + $0xe8] sm:$0xff] %vm3250_vm3, %v3215_v41  ;;  %v3004_v28 = vadd.f32 %v7037_v43, %v9769_v34  ;;  %v2995_v19 = vpop.f32.mrb[97].mxu1  ;;  %v4143_v31 = vadd.f32 %v4079_v22, %v3759_v63 }
 0x463   : > { %v2996_v56 = vadd.f32 %v9769_v34, %v2995_v19  ;;  %v7038_v37 = vpop.f32.mrb[98].mxu1 }
 0x464   : > { %v3156_v4 = vmax.f32 %v3004_v28, 0.0  ;;  %v3007_v57 = vadd.f32 %v7038_v37, %v9769_v34  ;;  %v4378_v10 = vpop.permute.xlu1 %4377  ;;  %v2998_v62 = vpop.f32.mrb[99].mxu1  ;;  %7184 = vmatmul.mubr.msk.bf16.gmra.mrb[156].mxu1 %vm2231_vm0, %v5131_v14  ;;  %v4527_v0 = vadd.f32 %v4463_v61, %v4143_v31 }
 0x465   : > { %v3154_v48 = vmax.f32 %v2996_v56, 0.0  ;;  %v4461_v16 = vmul.f32 %v4378_v10, %v8177_v50  ;;  %v2999_v58 = vadd.f32 %v9769_v34, %v2998_v62 }
 0x466   : > { %v3220_v26 = vsel %vm339_vm2, %v3004_v28, %v3156_v4  ;;  %v3157_v11 = vmax.f32 %v3007_v57, 0.0  ;;  %v4591_v42 = vadd.f32 %v9727_v59, %v4527_v0  ;;  %v4014_v4 = vpop.permute.xlu0 %4013 }
 0x467   : > { %3285 = vst.msk [vmem:[%s9785_s25 + $0x110] sm:$0xff] %vm3250_vm3, %v3220_v26  ;;  %v3218_v55 = vsel %vm339_vm2, %v2996_v56, %v3154_v48  ;;  %v4525_v1 = vadd.f32 %v4461_v16, %v4141_v46  ;;  %v3155_v9 = vmax.f32 %v2999_v58, 0.0 }
 0x468   : > { %3283 = vst.msk [vmem:[%s9785_s25 + $0x100] sm:$0xff] %vm3250_vm3, %v3218_v55  ;;  %v3221_v25 = vsel %vm339_vm2, %v3007_v57, %v3157_v11  ;;  %v4382_v21 = vpop.permute.xlu1 %4381  ;;  %v4655_v8 = vmax.f32 %v4591_v42, 0.0  ;;  %v3761_v55 = vmul.f32 %v9848_v49, %v8169_v35  ;;  %v3762_v49 = vmul.f32 %v9876_v17, %v8169_v35 }
 0x469   : > { %3286 = vst.msk [vmem:[%s9785_s25 + $0x118] sm:$0xff] %vm3250_vm3, %v3221_v25  ;;  %v4589_v15 = vadd.f32 %v9727_v59, %v4525_v1  ;;  %v3219_v6 = vsel %vm339_vm2, %v2999_v58, %v3155_v9  ;;  %v4462_v14 = vmul.f32 %v4382_v21, %v8177_v50  ;;  %v7445_v21 = vld [vmem:[%s10734_s7] sm:$0xff]  }
 0x46a   : > { %3284 = vst.msk [vmem:[%s9785_s25 + $0x108] sm:$0xff] %vm3250_vm3, %v3219_v6  ;;  %v4394_v0 = vpop.permute.xlu0 %4393  ;;  %7219 = vmatprep.subr.bf16.mxu0 %v7445_v21  ;;  %7287 = vmatprep.subr.bf16.mxu1 %v7445_v21  ;;  %v4082_v6 = vmul.f32 %v4014_v4, %v8162_v53 }
 0x46b   : > { %v4653_v60 = vmax.f32 %v4589_v15, 0.0  ;;  %v4526_v18 = vadd.f32 %v4462_v14, %v4142_v13  ;;  %v4465_v25 = vmul.f32 %v4394_v0, %v8177_v50  ;;  %7220 = vmatpush3.bf16.msra.mxu0 %v7445_v21  ;;  %7289 = vmatpush3.bf16.msra.mxu1 %v7445_v21 }
 0x46d   : > { %v4590_v7 = vadd.f32 %v9727_v59, %v4526_v18  ;;  %v3683_v32 = vpop.permute.xlu1 %3682  ;;  %v4688_v38 = vpack.c.bf16 %v4653_v60, %v4652_v20  ;;  %v7446_v18 = vld [vmem:[%s10734_s7 + $0x8] sm:$0xff]  }
 0x46e   : > { %v3760_v15 = vmul.f32 %v3683_v32, %v8169_v35  ;;  %7221 = vmatprep.subr.bf16.mxu0 %v7446_v18  ;;  %7288 = vmatprep.subr.bf16.mxu1 %v7446_v18  ;;  %v4146_v32 = vadd.f32 %v4082_v6, %v3762_v49 }
 0x46f   : > { %v4654_v5 = vmax.f32 %v4590_v7, 0.0  ;;  %7139 = vmatprep.mubr.bf16.mxu0 %v4688_v38  ;;  %7222 = vmatpush3.bf16.msra.mxu0 %v7446_v18 }
 0x470   : > { %7290 = vmatpush3.bf16.msra.mxu1 %v7446_v18 }
 0x471   : > { %v4689_v52 = vpack.c.bf16 %v4655_v8, %v4654_v5 }
 0x472   : > { %v4006_v33 = vpop.permute.xlu1 %4005 }
 0x473   : > { %v7041_v12 = vpop.f32.mrb[100].mxu1  ;;  %7140 = vmatmul.mubr.bf16.gmra.mrb[120].mxu0 %v4689_v52  ;;  %v4080_v13 = vmul.f32 %v4006_v33, %v8162_v53 }
 0x474   : > { %v3020_v2 = vadd.f32 %v7041_v12, %v9769_v34  ;;  %v3011_v30 = vpop.f32.mrb[101].mxu1  ;;  %v7117_v51 = vpop.f32.mrb[96].mxu0 }
 0x475   : > { %v3012_v24 = vadd.f32 %v9769_v34, %v3011_v30  ;;  %v7042_v47 = vpop.f32.mrb[102].mxu1  ;;  %v4925_v29 = vpop.f32.mrb[97].mxu0  ;;  %v4934_v36 = vadd.f32 %v9835_v54, %v7117_v51  ;;  %v4144_v20 = vadd.f32 %v4080_v13, %v3760_v15 }
 0x476   : > { %v3160_v44 = vmax.f32 %v3020_v2, 0.0  ;;  %v3023_v22 = vadd.f32 %v7042_v47, %v9769_v34  ;;  %v4010_v63 = vpop.permute.xlu1 %4009  ;;  %v3014_v41 = vpop.f32.mrb[103].mxu1  ;;  %v4926_v45 = vadd.f32 %v9835_v54, %v4925_v29 }
 0x477   : > { %v3158_v43 = vmax.f32 %v3012_v24, 0.0  ;;  %v3015_v28 = vadd.f32 %v9769_v34, %v3014_v41  ;;  %v7118_v19 = vpop.f32.mrb[98].mxu0  ;;  %v5086_v57 = vmax.f32 %v4934_v36, 0.0  ;;  %v4081_v11 = vmul.f32 %v4010_v63, %v8162_v53 }
 0x478   : > { %v3224_v61 = vsel %vm339_vm2, %v3020_v2, %v3160_v44  ;;  %v3161_v39 = vmax.f32 %v3023_v22, 0.0  ;;  %v4937_v31 = vadd.f32 %v9835_v54, %v7118_v19  ;;  %v4928_v56 = vpop.f32.mrb[99].mxu0  ;;  %v5084_v23 = vmax.f32 %v4926_v45, 0.0 }
 0x479   : > { %3289 = vst.msk [vmem:[%s9785_s25 + $0x130] sm:$0xff] %vm3250_vm3, %v3224_v61  ;;  %v3222_v37 = vsel %vm339_vm2, %v3012_v24, %v3158_v43  ;;  %v3159_v3 = vmax.f32 %v3015_v28, 0.0  ;;  %v4929_v46 = vadd.f32 %v9835_v54, %v4928_v56  ;;  %v4145_v9 = vadd.f32 %v4081_v11, %v3761_v55 }
 0x47a   : > { %3287 = vst.msk [vmem:[%s9785_s25 + $0x120] sm:$0xff] %vm3250_vm3, %v3222_v37  ;;  %v3225_v10 = vsel %vm339_vm2, %v3023_v22, %v3161_v39  ;;  %v5087_v62 = vmax.f32 %v4937_v31, 0.0 }
 0x47b   : > { %3290 = vst.msk [vmem:[%s9785_s25 + $0x138] sm:$0xff] %vm3250_vm3, %v3225_v10  ;;  %v3223_v48 = vsel %vm339_vm2, %v3015_v28, %v3159_v3  ;;  %v5085_v16 = vmax.f32 %v4929_v46, 0.0  ;;  %v3698_v58 = vpop.permute.xlu1 %3697  ;;  %v4529_v14 = vadd.f32 %v4465_v25, %v4145_v9 }
 0x47c   : > { %3288 = vst.msk [vmem:[%s9785_s25 + $0x128] sm:$0xff] %vm3250_vm3, %v3223_v48  ;;  %v5133_v26 = vpack.c.bf16 %v5087_v62, %v5086_v57  ;;  %v3763_v30 = vmul.f32 %v3698_v58, %v8169_v35 }
 0x47d   : > { %v5132_v27 = vpack.c.bf16 %v5085_v16, %v5084_v23  ;;  %v4593_v38 = vadd.f32 %v9727_v59, %v4529_v14 }
 0x47f   : > { %7187 = vmatprep.mubr.msk.bf16.mxu1 %vm2231_vm0, %v5132_v27  ;;  %v4657_v22 = vmax.f32 %v4593_v38, 0.0 }
 0x480   : > { %7188 = vmatmul.mubr.msk.bf16.gmra.mrb[160].mxu1 %vm2231_vm0, %v5133_v26  ;;  %v4018_v1 = vpop.permute.xlu1 %4017 }
 0x481   : > { %v4083_v8 = vmul.f32 %v4018_v1, %v8162_v53 }
 0x483   : > { %v4147_v45 = vadd.f32 %v4083_v8, %v3763_v30 }
 0x485   : > { %v4390_v60 = vpop.permute.xlu1 %4389 }
 0x486   : > { %v4464_v42 = vmul.f32 %v4390_v60, %v8177_v50 }
 0x488   : > { %v4528_v7 = vadd.f32 %v4464_v42, %v4144_v20 }
 0x489   : > { %v4398_v17 = vpop.permute.xlu1 %4397  ;;  %v7045_v5 = vpop.f32.mrb[104].mxu1 }
 0x48a   : > { %v4592_v52 = vadd.f32 %v9727_v59, %v4528_v7  ;;  %v4466_v33 = vmul.f32 %v4398_v17, %v8177_v50  ;;  %v3036_v12 = vadd.f32 %v7045_v5, %v9769_v34  ;;  %v3027_v2 = vpop.f32.mrb[105].mxu1 }
 0x48b   : > { %v3028_v51 = vadd.f32 %v9769_v34, %v3027_v2  ;;  %v7046_v24 = vpop.f32.mrb[106].mxu1 }
 0x48c   : > { %v4656_v47 = vmax.f32 %v4592_v52, 0.0  ;;  %v4530_v29 = vadd.f32 %v4466_v33, %v4146_v32  ;;  %v3164_v44 = vmax.f32 %v3036_v12, 0.0  ;;  %v3039_v36 = vadd.f32 %v7046_v24, %v9769_v34  ;;  %v3030_v53 = vpop.f32.mrb[107].mxu1 }
 0x48d   : > { %v3162_v63 = vmax.f32 %v3028_v51, 0.0  ;;  %v3031_v41 = vadd.f32 %v9769_v34, %v3030_v53  ;;  %v4402_v43 = vpop.permute.xlu1 %4401 }
 0x48e   : > { %v3228_v35 = vsel %vm339_vm2, %v3036_v12, %v3164_v44  ;;  %v3165_v28 = vmax.f32 %v3039_v36, 0.0  ;;  %v4467_v19 = vmul.f32 %v4402_v43, %v8177_v50  ;;  %v4690_v31 = vpack.c.bf16 %v4657_v22, %v4656_v47 }
 0x48f   : > { %3293 = vst.msk [vmem:[%s9785_s25 + $0x150] sm:$0xff] %vm3250_vm3, %v3228_v35  ;;  %v3226_v61 = vsel %vm339_vm2, %v3028_v51, %v3162_v63  ;;  %v3163_v39 = vmax.f32 %v3031_v41, 0.0  ;;  %v4594_v56 = vadd.f32 %v9727_v59, %v4530_v29 }
 0x490   : > { %3291 = vst.msk [vmem:[%s9785_s25 + $0x140] sm:$0xff] %vm3250_vm3, %v3226_v61  ;;  %v3229_v37 = vsel %vm339_vm2, %v3039_v36, %v3165_v28  ;;  %v4531_v3 = vadd.f32 %v4467_v19, %v4147_v45  ;;  %7143 = vmatprep.mubr.bf16.mxu0 %v4690_v31 }
 0x491   : > { %3294 = vst.msk [vmem:[%s9785_s25 + $0x158] sm:$0xff] %vm3250_vm3, %v3229_v37  ;;  %v3227_v50 = vsel %vm339_vm2, %v3031_v41, %v3163_v39  ;;  %v4658_v4 = vmax.f32 %v4594_v56, 0.0 }
 0x492   : > { %3292 = vst.msk [vmem:[%s9785_s25 + $0x148] sm:$0xff] %vm3250_vm3, %v3227_v50  ;;  %v4595_v46 = vadd.f32 %v9727_v59, %v4531_v3 }
 0x494   : > { %v4659_v57 = vmax.f32 %v4595_v46, 0.0 }
 0x496   : > { %v4691_v10 = vpack.c.bf16 %v4659_v57, %v4658_v4 }
 0x498   : > { %7144 = vmatmul.mubr.bf16.gmra.mrb[124].mxu0 %v4691_v10  ;;  %v10201_v10 = vld [vmem:[%s10735_s8] ss:$0 sm:$0xff] }
 0x499   : > { %v7121_v62 = vpop.f32.mrb[100].mxu0 }
 0x49a   : > { %v4950_v23 = vadd.f32 %v9835_v54, %v7121_v62  ;;  %v4941_v48 = vpop.f32.mrb[101].mxu0 }
 0x49b   : > { %v4942_v16 = vadd.f32 %v9835_v54, %v4941_v48  ;;  %v7122_v58 = vpop.f32.mrb[102].mxu0 }
 0x49c   : > { %v4953_v26 = vadd.f32 %v9835_v54, %v7122_v58  ;;  %v4944_v11 = vpop.f32.mrb[103].mxu0  ;;  %v5090_v0 = vmax.f32 %v4950_v23, 0.0 }
 0x49d   : > { %v4945_v27 = vadd.f32 %v9835_v54, %v4944_v11  ;;  %v5088_v1 = vmax.f32 %v4942_v16, 0.0 }
 0x49e   : > { %v5091_v55 = vmax.f32 %v4953_v26, 0.0 }
 0x49f   : > { %v5089_v59 = vmax.f32 %v4945_v27, 0.0  ;;  %v7049_v9 = vpop.f32.mrb[108].mxu1 }
 0x4a0   : > { %v5135_v25 = vpack.c.bf16 %v5091_v55, %v5090_v0  ;;  %v3052_v21 = vadd.f32 %v7049_v9, %v9769_v34  ;;  %v3043_v13 = vpop.f32.mrb[109].mxu1 }
 0x4a1   : > { %v5134_v15 = vpack.c.bf16 %v5089_v59, %v5088_v1  ;;  %v3044_v49 = vadd.f32 %v9769_v34, %v3043_v13  ;;  %v7050_v6 = vpop.f32.mrb[110].mxu1 }
 0x4a2   : > { %v3168_v14 = vmax.f32 %v3052_v21, 0.0  ;;  %v3055_v60 = vadd.f32 %v7050_v6, %v9769_v34  ;;  %v3046_v18 = vpop.f32.mrb[111].mxu1 }
 0x4a3   : > { %v3166_v20 = vmax.f32 %v3044_v49, 0.0  ;;  %v3047_v42 = vadd.f32 %v9769_v34, %v3046_v18  ;;  %7191 = vmatprep.mubr.msk.bf16.mxu1 %vm2231_vm0, %v5134_v15 }
 0x4a4   : > { %v3232_v7 = vsel %vm339_vm2, %v3052_v21, %v3168_v14  ;;  %v3169_v32 = vmax.f32 %v3055_v60, 0.0  ;;  %7192 = vmatmul.mubr.msk.bf16.gmra.mrb[164].mxu1 %vm2231_vm0, %v5135_v25 }
 0x4a5   : > { %3297 = vst.msk [vmem:[%s9785_s25 + $0x170] sm:$0xff] %vm3250_vm3, %v3232_v7  ;;  %v3230_v38 = vsel %vm339_vm2, %v3044_v49, %v3166_v20  ;;  %v3167_v17 = vmax.f32 %v3047_v42, 0.0 }
 0x4a6   : > { %3295 = vst.msk [vmem:[%s9785_s25 + $0x160] sm:$0xff] %vm3250_vm3, %v3230_v38  ;;  %v3233_v5 = vsel %vm339_vm2, %v3055_v60, %v3169_v32 }
 0x4a7   : > { %3298 = vst.msk [vmem:[%s9785_s25 + $0x178] sm:$0xff] %vm3250_vm3, %v3233_v5  ;;  %v3231_v8 = vsel %vm339_vm2, %v3047_v42, %v3167_v17 }
 0x4a8   : > { %3296 = vst.msk [vmem:[%s9785_s25 + $0x168] sm:$0xff] %vm3250_vm3, %v3231_v8 }
 0x4b5   : > { %v7053_v52 = vpop.f32.mrb[112].mxu1 }
 0x4b6   : > { %v3068_v33 = vadd.f32 %v7053_v52, %v9769_v34  ;;  %v3059_v12 = vpop.f32.mrb[113].mxu1 }
 0x4b7   : > { %v3060_v2 = vadd.f32 %v9769_v34, %v3059_v12  ;;  %v7054_v30 = vpop.f32.mrb[114].mxu1 }
 0x4b8   : > { %v3172_v51 = vmax.f32 %v3068_v33, 0.0  ;;  %v3071_v24 = vadd.f32 %v7054_v30, %v9769_v34  ;;  %v3062_v47 = vpop.f32.mrb[115].mxu1 }
 0x4b9   : > { %v3170_v29 = vmax.f32 %v3060_v2, 0.0  ;;  %v3063_v44 = vadd.f32 %v9769_v34, %v3062_v47 }
 0x4ba   : > { %v3236_v36 = vsel %vm339_vm2, %v3068_v33, %v3172_v51  ;;  %v3173_v53 = vmax.f32 %v3071_v24, 0.0  ;;  %v7125_v22 = vpop.f32.mrb[104].mxu0 }
 0x4bb   : > { %3301 = vst.msk [vmem:[%s9785_s25 + $0x190] sm:$0xff] %vm3250_vm3, %v3236_v36  ;;  %v3234_v63 = vsel %vm339_vm2, %v3060_v2, %v3170_v29  ;;  %v3171_v41 = vmax.f32 %v3063_v44, 0.0  ;;  %v4966_v43 = vadd.f32 %v9835_v54, %v7125_v22  ;;  %v4957_v45 = vpop.f32.mrb[105].mxu0 }
 0x4bc   : > { %3299 = vst.msk [vmem:[%s9785_s25 + $0x180] sm:$0xff] %vm3250_vm3, %v3234_v63  ;;  %v3237_v34 = vsel %vm339_vm2, %v3071_v24, %v3173_v53  ;;  %v4958_v35 = vadd.f32 %v9835_v54, %v4957_v45  ;;  %v7126_v28 = vpop.f32.mrb[106].mxu0 }
 0x4bd   : > { %3302 = vst.msk [vmem:[%s9785_s25 + $0x198] sm:$0xff] %vm3250_vm3, %v3237_v34  ;;  %v3235_v19 = vsel %vm339_vm2, %v3063_v44, %v3171_v41  ;;  %v4969_v61 = vadd.f32 %v9835_v54, %v7126_v28  ;;  %v4960_v39 = vpop.f32.mrb[107].mxu0  ;;  %v5094_v56 = vmax.f32 %v4966_v43, 0.0 }
 0x4be   : > { %3300 = vst.msk [vmem:[%s9785_s25 + $0x188] sm:$0xff] %vm3250_vm3, %v3235_v19  ;;  %v4961_v31 = vadd.f32 %v9835_v54, %v4960_v39  ;;  %v5092_v3 = vmax.f32 %v4958_v35, 0.0 }
 0x4bf   : > { %v5095_v37 = vmax.f32 %v4969_v61, 0.0 }
 0x4c0   : > { %v5093_v50 = vmax.f32 %v4961_v31, 0.0 }
 0x4c1   : > { %v5137_v46 = vpack.c.bf16 %v5095_v37, %v5094_v56 }
 0x4c2   : > { %v5136_v4 = vpack.c.bf16 %v5093_v50, %v5092_v3 }
 0x4c4   : > { %7195 = vmatprep.mubr.msk.bf16.mxu1 %vm2231_vm0, %v5136_v4 }
 0x4c5   : > { %7196 = vmatmul.mubr.msk.bf16.gmra.mrb[168].mxu1 %vm2231_vm0, %v5137_v46  ;;  %v10262_v46 = vld [vmem:[%s10733_s6] ss:$0 sm:$0xff] }
 0x4cb   : > { %v7057_v57 = vpop.f32.mrb[116].mxu1 }
 0x4cc   : > { %v3084_v62 = vadd.f32 %v10201_v10, %v7057_v57  ;;  %v3075_v23 = vpop.f32.mrb[117].mxu1 }
 0x4cd   : > { %v3076_v48 = vadd.f32 %v10201_v10, %v3075_v23  ;;  %v7058_v16 = vpop.f32.mrb[118].mxu1 }
 0x4ce   : > { %v3176_v58 = vmax.f32 %v3084_v62, 0.0  ;;  %v3087_v26 = vadd.f32 %v10201_v10, %v7058_v16  ;;  %v3078_v11 = vpop.f32.mrb[119].mxu1  ;;  %v10278_v16 = vld [vmem:[%s10731_s4] ss:$0 sm:$0xff] }
 0x4cf   : > { %v3174_v27 = vmax.f32 %v3076_v48, 0.0  ;;  %v3079_v0 = vadd.f32 %v10201_v10, %v3078_v11 }
 0x4d0   : > { %v3240_v55 = vsel %vm339_vm2, %v3084_v62, %v3176_v58  ;;  %v3177_v1 = vmax.f32 %v3087_v26, 0.0 }
 0x4d1   : > { %3305 = vst.msk [vmem:[%s9785_s25 + $0x1b0] sm:$0xff] %vm3250_vm3, %v3240_v55  ;;  %v3238_v59 = vsel %vm339_vm2, %v3076_v48, %v3174_v27  ;;  %v3175_v9 = vmax.f32 %v3079_v0, 0.0 }
 0x4d2   : > { %3303 = vst.msk [vmem:[%s9785_s25 + $0x1a0] sm:$0xff] %vm3250_vm3, %v3238_v59  ;;  %v3241_v25 = vsel %vm339_vm2, %v3087_v26, %v3177_v1 }
 0x4d3   : > { %3306 = vst.msk [vmem:[%s9785_s25 + $0x1b8] sm:$0xff] %vm3250_vm3, %v3241_v25  ;;  %v3239_v21 = vsel %vm339_vm2, %v3079_v0, %v3175_v9 }
 0x4d4   : > { %3304 = vst.msk [vmem:[%s9785_s25 + $0x1a8] sm:$0xff] %vm3250_vm3, %v3239_v21 }
 0x4df   : > { %v7129_v13 = vpop.f32.mrb[108].mxu0 }
 0x4e0   : > { %v4982_v15 = vadd.f32 %v9835_v54, %v7129_v13  ;;  %v4973_v49 = vpop.f32.mrb[109].mxu0 }
 0x4e1   : > { %v4974_v6 = vadd.f32 %v9835_v54, %v4973_v49  ;;  %v7061_v14 = vpop.f32.mrb[120].mxu1  ;;  %v7130_v60 = vpop.f32.mrb[110].mxu0 }
 0x4e2   : > { %v3100_v18 = vadd.f32 %v10201_v10, %v7061_v14  ;;  %v4985_v20 = vadd.f32 %v9835_v54, %v7130_v60  ;;  %v3091_v42 = vpop.f32.mrb[121].mxu1  ;;  %v4976_v7 = vpop.f32.mrb[111].mxu0  ;;  %v5098_v5 = vmax.f32 %v4982_v15, 0.0 }
 0x4e3   : > { %v3092_v32 = vadd.f32 %v10201_v10, %v3091_v42  ;;  %v4977_v38 = vadd.f32 %v9835_v54, %v4976_v7  ;;  %v7062_v17 = vpop.f32.mrb[122].mxu1  ;;  %v5096_v2 = vmax.f32 %v4974_v6, 0.0 }
 0x4e4   : > { %v3180_v8 = vmax.f32 %v3100_v18, 0.0  ;;  %v5099_v52 = vmax.f32 %v4985_v20, 0.0  ;;  %v3103_v33 = vadd.f32 %v10201_v10, %v7062_v17  ;;  %v3094_v12 = vpop.f32.mrb[123].mxu1 }
 0x4e5   : > { %v3178_v30 = vmax.f32 %v3092_v32, 0.0  ;;  %v5097_v51 = vmax.f32 %v4977_v38, 0.0  ;;  %v3095_v24 = vadd.f32 %v10201_v10, %v3094_v12 }
 0x4e6   : > { %v3244_v47 = vsel %vm339_vm2, %v3100_v18, %v3180_v8  ;;  %v5139_v29 = vpack.c.bf16 %v5099_v52, %v5098_v5  ;;  %v3181_v54 = vmax.f32 %v3103_v33, 0.0 }
 0x4e7   : > { %3309 = vst.msk [vmem:[%s9785_s25 + $0x1d0] sm:$0xff] %vm3250_vm3, %v3244_v47  ;;  %v3242_v44 = vsel %vm339_vm2, %v3092_v32, %v3178_v30  ;;  %v5138_v36 = vpack.c.bf16 %v5097_v51, %v5096_v2  ;;  %v3179_v53 = vmax.f32 %v3095_v24, 0.0 }
 0x4e8   : > { %3307 = vst.msk [vmem:[%s9785_s25 + $0x1c0] sm:$0xff] %vm3250_vm3, %v3242_v44  ;;  %v3245_v22 = vsel %vm339_vm2, %v3103_v33, %v3181_v54 }
 0x4e9   : > { %3310 = vst.msk [vmem:[%s9785_s25 + $0x1d8] sm:$0xff] %vm3250_vm3, %v3245_v22  ;;  %v3243_v63 = vsel %vm339_vm2, %v3095_v24, %v3179_v53  ;;  %7199 = vmatprep.mubr.msk.bf16.mxu1 %vm2231_vm0, %v5138_v36 }
 0x4ea   : > { %3308 = vst.msk [vmem:[%s9785_s25 + $0x1c8] sm:$0xff] %vm3250_vm3, %v3243_v63  ;;  %7200 = vmatmul.mubr.msk.bf16.gmra.mrb[172].mxu1 %vm2231_vm0, %v5139_v29 }
 0x4f7   : > { %v7065_v41 = vpop.f32.mrb[124].mxu1 }
 0x4f8   : > { %v3116_v43 = vadd.f32 %v10201_v10, %v7065_v41  ;;  %v3107_v45 = vpop.f32.mrb[125].mxu1 }
 0x4f9   : > { %v3108_v34 = vadd.f32 %v10201_v10, %v3107_v45  ;;  %v7066_v35 = vpop.f32.mrb[126].mxu1 }
 0x4fa   : > { %v3184_v28 = vmax.f32 %v3116_v43, 0.0  ;;  %v3119_v19 = vadd.f32 %v10201_v10, %v7066_v35  ;;  %v3110_v61 = vpop.f32.mrb[127].mxu1 }
 0x4fb   : > { %v3182_v39 = vmax.f32 %v3108_v34, 0.0  ;;  %v3111_v31 = vadd.f32 %v10201_v10, %v3110_v61 }
 0x4fc   : > { %v3248_v56 = vsel %vm339_vm2, %v3116_v43, %v3184_v28  ;;  %v3185_v37 = vmax.f32 %v3119_v19, 0.0 }
 0x4fd   : > { %3313 = vst.msk [vmem:[%s9785_s25 + $0x1f0] sm:$0xff] %vm3250_vm3, %v3248_v56  ;;  %v3246_v3 = vsel %vm339_vm2, %v3108_v34, %v3182_v39  ;;  %v3183_v50 = vmax.f32 %v3111_v31, 0.0 }
 0x4fe   : > { %3311 = vst.msk [vmem:[%s9785_s25 + $0x1e0] sm:$0xff] %vm3250_vm3, %v3246_v3  ;;  %v3249_v4 = vsel %vm339_vm2, %v3119_v19, %v3185_v37 }
 0x4ff   : > { %3314 = vst.msk [vmem:[%s9785_s25 + $0x1f8] sm:$0xff] %vm3250_vm3, %v3249_v4  ;;  %v3247_v57 = vsel %vm339_vm2, %v3111_v31, %v3183_v50  ;;  %v7157_v10 = vpop.f32.mrb[128].mxu1 }
 0x500   : > { %3312 = vst.msk [vmem:[%s9785_s25 + $0x1e8] sm:$0xff] %vm3250_vm3, %v3247_v57  ;;  %v5326_v62 = vadd.f32 %v7157_v10, %v10262_v46  ;;  %v7133_v23 = vpop.f32.mrb[112].mxu0  ;;  %v5317_v48 = vpop.f32.mrb[129].mxu1 }
 0x501   : > { %v4998_v58 = vadd.f32 %v10278_v16, %v7133_v23  ;;  %v5318_v26 = vadd.f32 %v10262_v46, %v5317_v48  ;;  %v4989_v11 = vpop.f32.mrb[113].mxu0  ;;  %v7158_v27 = vpop.f32.mrb[130].mxu1 }
 0x502   : > { %v4990_v0 = vadd.f32 %v10278_v16, %v4989_v11  ;;  %v5329_v55 = vadd.f32 %v7158_v27, %v10262_v46  ;;  %v7134_v1 = vpop.f32.mrb[114].mxu0  ;;  %v5320_v59 = vpop.f32.mrb[131].mxu1  ;;  %v5574_v13 = vmax.f32 %v5326_v62, 0.0 }
 0x503   : > { %v5001_v9 = vadd.f32 %v10278_v16, %v7134_v1  ;;  %v5321_v25 = vadd.f32 %v10262_v46, %v5320_v59  ;;  %v4992_v21 = vpop.f32.mrb[115].mxu0  ;;  %v5102_v6 = vmax.f32 %v4998_v58, 0.0  ;;  %v5572_v14 = vmax.f32 %v5318_v26, 0.0 }
 0x504   : > { %v5575_v15 = vmax.f32 %v5329_v55, 0.0  ;;  %v4993_v49 = vadd.f32 %v10278_v16, %v4992_v21  ;;  %v5100_v20 = vmax.f32 %v4990_v0, 0.0 }
 0x505   : > { %v5103_v60 = vmax.f32 %v5001_v9, 0.0  ;;  %v5573_v18 = vmax.f32 %v5321_v25, 0.0 }
 0x506   : > { %v5637_v42 = vpack.c.bf16 %v5575_v15, %v5574_v13  ;;  %v5101_v7 = vmax.f32 %v4993_v49, 0.0 }
 0x507   : > { %v5141_v32 = vpack.c.bf16 %v5103_v60, %v5102_v6  ;;  %v5636_v38 = vpack.c.bf16 %v5573_v18, %v5572_v14  ;;  %v7161_v17 = vpop.f32.mrb[132].mxu1 }
 0x508   : > { %v5140_v5 = vpack.c.bf16 %v5101_v7, %v5100_v20  ;;  %v5342_v8 = vadd.f32 %v7161_v17, %v10262_v46  ;;  %v5333_v52 = vpop.f32.mrb[133].mxu1 }
 0x509   : > { %v5334_v33 = vadd.f32 %v10262_v46, %v5333_v52  ;;  %v7162_v12 = vpop.f32.mrb[134].mxu1  ;;  %7223 = vmatprep.mubr.msk.bf16.mxu0 %vm2736_vm1, %v5636_v38 }
 0x50a   : > { %v5345_v2 = vadd.f32 %v7162_v12, %v10262_v46  ;;  %v5336_v30 = vpop.f32.mrb[135].mxu1  ;;  %7203 = vmatprep.mubr.msk.bf16.mxu1 %vm2231_vm0, %v5140_v5  ;;  %7224 = vmatmul.mubr.msk.bf16.vlgmr.msra.gmra.mrb[128].mxu0 %vm2736_vm1, %v5637_v42  ;;  %v5578_v24 = vmax.f32 %v5342_v8, 0.0 }
 0x50b   : > { %v5337_v51 = vadd.f32 %v10262_v46, %v5336_v30  ;;  %7204 = vmatmul.mubr.msk.bf16.gmra.mrb[176].mxu1 %vm2231_vm0, %v5141_v32  ;;  %v5576_v29 = vmax.f32 %v5334_v33, 0.0 }
 0x50c   : > { %v5579_v47 = vmax.f32 %v5345_v2, 0.0 }
 0x50d   : > { %v5577_v54 = vmax.f32 %v5337_v51, 0.0 }
 0x50e   : > { %v5639_v44 = vpack.c.bf16 %v5579_v47, %v5578_v24 }
 0x50f   : > { %v5638_v36 = vpack.c.bf16 %v5577_v54, %v5576_v29  ;;  %v7165_v53 = vpop.f32.mrb[136].mxu1 }
 0x510   : > { %v5358_v22 = vadd.f32 %v7165_v53, %v10262_v46  ;;  %v5349_v63 = vpop.f32.mrb[137].mxu1 }
 0x511   : > { %v5350_v41 = vadd.f32 %v10262_v46, %v5349_v63  ;;  %v7166_v43 = vpop.f32.mrb[138].mxu1  ;;  %7227 = vmatprep.mubr.msk.bf16.mxu0 %vm2736_vm1, %v5638_v36 }
 0x512   : > { %v5361_v45 = vadd.f32 %v7166_v43, %v10262_v46  ;;  %v5352_v34 = vpop.f32.mrb[139].mxu1  ;;  %7228 = vmatmul.mubr.msk.bf16.gmra.mrb[132].mxu0 %vm2736_vm1, %v5639_v44  ;;  %v5582_v28 = vmax.f32 %v5358_v22, 0.0 }
 0x513   : > { %v5353_v35 = vadd.f32 %v10262_v46, %v5352_v34  ;;  %v5580_v61 = vmax.f32 %v5350_v41, 0.0 }
 0x514   : > { %v5583_v19 = vmax.f32 %v5361_v45, 0.0 }
 0x515   : > { %v5581_v39 = vmax.f32 %v5353_v35, 0.0 }
 0x516   : > { %v5641_v31 = vpack.c.bf16 %v5583_v19, %v5582_v28 }
 0x517   : > { %v5640_v56 = vpack.c.bf16 %v5581_v39, %v5580_v61  ;;  %v7169_v37 = vpop.f32.mrb[140].mxu1 }
 0x518   : > { %v5374_v3 = vadd.f32 %v7169_v37, %v10262_v46  ;;  %v5365_v50 = vpop.f32.mrb[141].mxu1 }
 0x519   : > { %v5366_v4 = vadd.f32 %v10262_v46, %v5365_v50  ;;  %v7170_v57 = vpop.f32.mrb[142].mxu1  ;;  %7231 = vmatprep.mubr.msk.bf16.mxu0 %vm2736_vm1, %v5640_v56 }
 0x51a   : > { %v5377_v10 = vadd.f32 %v7170_v57, %v10262_v46  ;;  %v5368_v62 = vpop.f32.mrb[143].mxu1  ;;  %7232 = vmatmul.mubr.msk.bf16.gmra.mrb[136].mxu0 %vm2736_vm1, %v5641_v31  ;;  %v5586_v48 = vmax.f32 %v5374_v3, 0.0 }
 0x51b   : > { %v5369_v23 = vadd.f32 %v10262_v46, %v5368_v62  ;;  %v5584_v26 = vmax.f32 %v5366_v4, 0.0 }
 0x51c   : > { %v5587_v58 = vmax.f32 %v5377_v10, 0.0 }
 0x51d   : > { %v5585_v11 = vmax.f32 %v5369_v23, 0.0 }
 0x51e   : > { %v5643_v27 = vpack.c.bf16 %v5587_v58, %v5586_v48 }
 0x51f   : > { %v5642_v0 = vpack.c.bf16 %v5585_v11, %v5584_v26  ;;  %v7173_v55 = vpop.f32.mrb[144].mxu1 }
 0x520   : > { %v5390_v1 = vadd.f32 %v7173_v55, %v10262_v46  ;;  %v5381_v59 = vpop.f32.mrb[145].mxu1 }
 0x521   : > { %v5382_v9 = vadd.f32 %v10262_v46, %v5381_v59  ;;  %v7174_v25 = vpop.f32.mrb[146].mxu1  ;;  %7235 = vmatprep.mubr.msk.bf16.mxu0 %vm2736_vm1, %v5642_v0 }
 0x522   : > { %v5393_v21 = vadd.f32 %v7174_v25, %v10262_v46  ;;  %v5384_v13 = vpop.f32.mrb[147].mxu1  ;;  %7236 = vmatmul.mubr.msk.bf16.gmra.mrb[140].mxu0 %vm2736_vm1, %v5643_v27  ;;  %v5590_v49 = vmax.f32 %v5390_v1, 0.0 }
 0x523   : > { %v5385_v15 = vadd.f32 %v10262_v46, %v5384_v13  ;;  %v5588_v14 = vmax.f32 %v5382_v9, 0.0 }
 0x524   : > { %v5591_v6 = vmax.f32 %v5393_v21, 0.0 }
 0x525   : > { %v5589_v60 = vmax.f32 %v5385_v15, 0.0  ;;  %v7137_v18 = vpop.f32.mrb[116].mxu0 }
 0x526   : > { %v5645_v20 = vpack.c.bf16 %v5591_v6, %v5590_v49  ;;  %v5014_v42 = vadd.f32 %v10278_v16, %v7137_v18  ;;  %v5005_v7 = vpop.f32.mrb[117].mxu0 }
 0x527   : > { %v5644_v32 = vpack.c.bf16 %v5589_v60, %v5588_v14  ;;  %v5006_v38 = vadd.f32 %v10278_v16, %v5005_v7  ;;  %v7138_v17 = vpop.f32.mrb[118].mxu0  ;;  %v7177_v5 = vpop.f32.mrb[148].mxu1 }
 0x528   : > { %v5017_v8 = vadd.f32 %v10278_v16, %v7138_v17  ;;  %v5406_v52 = vadd.f32 %v7177_v5, %v10262_v46  ;;  %v5008_v33 = vpop.f32.mrb[119].mxu0  ;;  %v5397_v12 = vpop.f32.mrb[149].mxu1  ;;  %v5106_v24 = vmax.f32 %v5014_v42, 0.0 }
 0x529   : > { %v5009_v2 = vadd.f32 %v10278_v16, %v5008_v33  ;;  %v5398_v30 = vadd.f32 %v10262_v46, %v5397_v12  ;;  %v7178_v51 = vpop.f32.mrb[150].mxu1  ;;  %7239 = vmatprep.mubr.msk.bf16.mxu0 %vm2736_vm1, %v5644_v32  ;;  %v5104_v44 = vmax.f32 %v5006_v38, 0.0 }
 0x52a   : > { %v5107_v47 = vmax.f32 %v5017_v8, 0.0  ;;  %v5409_v29 = vadd.f32 %v7178_v51, %v10262_v46  ;;  %v5400_v54 = vpop.f32.mrb[151].mxu1  ;;  %7240 = vmatmul.mubr.msk.bf16.gmra.mrb[144].mxu0 %vm2736_vm1, %v5645_v20  ;;  %v5594_v63 = vmax.f32 %v5406_v52, 0.0 }
 0x52b   : > { %v5105_v36 = vmax.f32 %v5009_v2, 0.0  ;;  %v5401_v53 = vadd.f32 %v10262_v46, %v5400_v54  ;;  %v5592_v45 = vmax.f32 %v5398_v30, 0.0 }
 0x52c   : > { %v5143_v22 = vpack.c.bf16 %v5107_v47, %v5106_v24  ;;  %v5595_v41 = vmax.f32 %v5409_v29, 0.0 }
 0x52d   : > { %v5142_v43 = vpack.c.bf16 %v5105_v36, %v5104_v44  ;;  %v5593_v34 = vmax.f32 %v5401_v53, 0.0 }
 0x52e   : > { %v5647_v35 = vpack.c.bf16 %v5595_v41, %v5594_v63 }
 0x52f   : > { %v5646_v28 = vpack.c.bf16 %v5593_v34, %v5592_v45  ;;  %v7181_v19 = vpop.f32.mrb[152].mxu1  ;;  %7207 = vmatprep.mubr.msk.bf16.mxu1 %vm2231_vm0, %v5142_v43 }
 0x530   : > { %v5422_v61 = vadd.f32 %v7181_v19, %v10262_v46  ;;  %v5413_v39 = vpop.f32.mrb[153].mxu1  ;;  %7208 = vmatmul.mubr.msk.bf16.gmra.mrb[180].mxu1 %vm2231_vm0, %v5143_v22 }
 0x531   : > { %v5414_v31 = vadd.f32 %v10262_v46, %v5413_v39  ;;  %v7182_v56 = vpop.f32.mrb[154].mxu1  ;;  %7243 = vmatprep.mubr.msk.bf16.mxu0 %vm2736_vm1, %v5646_v28 }
 0x532   : > { %v5425_v37 = vadd.f32 %v7182_v56, %v10262_v46  ;;  %v5416_v3 = vpop.f32.mrb[155].mxu1  ;;  %7244 = vmatmul.mubr.msk.bf16.gmra.mrb[148].mxu0 %vm2736_vm1, %v5647_v35  ;;  %v5598_v4 = vmax.f32 %v5422_v61, 0.0 }
 0x533   : > { %v5417_v50 = vadd.f32 %v10262_v46, %v5416_v3  ;;  %v5596_v10 = vmax.f32 %v5414_v31, 0.0 }
 0x534   : > { %v5599_v57 = vmax.f32 %v5425_v37, 0.0 }
 0x535   : > { %v5597_v62 = vmax.f32 %v5417_v50, 0.0 }
 0x536   : > { %v5649_v23 = vpack.c.bf16 %v5599_v57, %v5598_v4 }
 0x537   : > { %v5648_v48 = vpack.c.bf16 %v5597_v62, %v5596_v10  ;;  %v7185_v58 = vpop.f32.mrb[156].mxu1 }
 0x538   : > { %v5438_v26 = vadd.f32 %v7185_v58, %v10262_v46  ;;  %v5429_v11 = vpop.f32.mrb[157].mxu1 }
 0x539   : > { %v5430_v27 = vadd.f32 %v10262_v46, %v5429_v11  ;;  %v7186_v0 = vpop.f32.mrb[158].mxu1  ;;  %7247 = vmatprep.mubr.msk.bf16.mxu0 %vm2736_vm1, %v5648_v48 }
 0x53a   : > { %v5441_v55 = vadd.f32 %v7186_v0, %v10262_v46  ;;  %v5432_v1 = vpop.f32.mrb[159].mxu1  ;;  %7248 = vmatmul.mubr.msk.bf16.gmra.mrb[152].mxu0 %vm2736_vm1, %v5649_v23  ;;  %v5602_v9 = vmax.f32 %v5438_v26, 0.0 }
 0x53b   : > { %v5433_v59 = vadd.f32 %v10262_v46, %v5432_v1  ;;  %v5600_v21 = vmax.f32 %v5430_v27, 0.0 }
 0x53c   : > { %v5603_v25 = vmax.f32 %v5441_v55, 0.0 }
 0x53d   : > { %v5601_v13 = vmax.f32 %v5433_v59, 0.0 }
 0x53e   : > { %v5651_v15 = vpack.c.bf16 %v5603_v25, %v5602_v9 }
 0x53f   : > { %v5650_v49 = vpack.c.bf16 %v5601_v13, %v5600_v21 }
 0x541   : > { %7251 = vmatprep.mubr.msk.bf16.mxu0 %vm2736_vm1, %v5650_v49 }
 0x542   : > { %7252 = vmatmul.mubr.msk.bf16.gmra.mrb[156].mxu0 %vm2736_vm1, %v5651_v15 }
 0x546   : > { %v7141_v6 = vpop.f32.mrb[120].mxu0 }
 0x547   : > { %v5030_v14 = vadd.f32 %v10278_v16, %v7141_v6  ;;  %v5021_v60 = vpop.f32.mrb[121].mxu0 }
 0x548   : > { %v5022_v18 = vadd.f32 %v10278_v16, %v5021_v60  ;;  %v7142_v20 = vpop.f32.mrb[122].mxu0 }
 0x549   : > { %v5033_v42 = vadd.f32 %v10278_v16, %v7142_v20  ;;  %v5024_v7 = vpop.f32.mrb[123].mxu0  ;;  %v5110_v38 = vmax.f32 %v5030_v14, 0.0 }
 0x54a   : > { %v5025_v32 = vadd.f32 %v10278_v16, %v5024_v7  ;;  %v5108_v5 = vmax.f32 %v5022_v18, 0.0 }
 0x54b   : > { %v5111_v17 = vmax.f32 %v5033_v42, 0.0 }
 0x54c   : > { %v5109_v8 = vmax.f32 %v5025_v32, 0.0 }
 0x54d   : > { %v5145_v52 = vpack.c.bf16 %v5111_v17, %v5110_v38 }
 0x54e   : > { %v5144_v33 = vpack.c.bf16 %v5109_v8, %v5108_v5 }
 0x550   : > { %7211 = vmatprep.mubr.msk.bf16.mxu1 %vm2231_vm0, %v5144_v33 }
 0x551   : > { %7212 = vmatmul.mubr.msk.bf16.gmra.mrb[184].mxu1 %vm2231_vm0, %v5145_v52 }
 0x553   : > { %v7189_v12 = vpop.f32.mrb[160].mxu1 }
 0x554   : > { %v5454_v2 = vadd.f32 %v7189_v12, %v10262_v46  ;;  %v5445_v30 = vpop.f32.mrb[161].mxu1 }
 0x555   : > { %v5446_v51 = vadd.f32 %v10262_v46, %v5445_v30  ;;  %v7190_v24 = vpop.f32.mrb[162].mxu1 }
 0x556   : > { %v5457_v47 = vadd.f32 %v7190_v24, %v10262_v46  ;;  %v5448_v29 = vpop.f32.mrb[163].mxu1  ;;  %v5606_v44 = vmax.f32 %v5454_v2, 0.0 }
 0x557   : > { %v5449_v54 = vadd.f32 %v10262_v46, %v5448_v29  ;;  %v5604_v53 = vmax.f32 %v5446_v51, 0.0 }
 0x558   : > { %v5607_v36 = vmax.f32 %v5457_v47, 0.0 }
 0x559   : > { %v5605_v22 = vmax.f32 %v5449_v54, 0.0 }
 0x55a   : > { %v5653_v63 = vpack.c.bf16 %v5607_v36, %v5606_v44  ;;  %v10378_v44 = vld [vmem:[%s10735_s8] ss:$0 sm:$0xff] }
 0x55b   : > { %v5652_v41 = vpack.c.bf16 %v5605_v22, %v5604_v53 }
 0x55d   : > { %7255 = vmatprep.mubr.msk.bf16.mxu0 %vm2736_vm1, %v5652_v41 }
 0x55e   : > { %7256 = vmatmul.mubr.msk.bf16.gmra.mrb[160].mxu0 %vm2736_vm1, %v5653_v63 }
 0x56b   : > { %v7145_v43 = vpop.f32.mrb[124].mxu0 }
 0x56c   : > { %v5046_v45 = vadd.f32 %v10278_v16, %v7145_v43  ;;  %v5037_v34 = vpop.f32.mrb[125].mxu0 }
 0x56d   : > { %v5038_v35 = vadd.f32 %v10278_v16, %v5037_v34  ;;  %v7146_v28 = vpop.f32.mrb[126].mxu0 }
 0x56e   : > { %v5049_v19 = vadd.f32 %v10278_v16, %v7146_v28  ;;  %v5040_v61 = vpop.f32.mrb[127].mxu0  ;;  %v5114_v31 = vmax.f32 %v5046_v45, 0.0 }
 0x56f   : > { %v5041_v39 = vadd.f32 %v10278_v16, %v5040_v61  ;;  %v5112_v37 = vmax.f32 %v5038_v35, 0.0 }
 0x570   : > { %v5115_v56 = vmax.f32 %v5049_v19, 0.0 }
 0x571   : > { %v5113_v3 = vmax.f32 %v5041_v39, 0.0 }
 0x572   : > { %v5147_v50 = vpack.c.bf16 %v5115_v56, %v5114_v31 }
 0x573   : > { %v5146_v4 = vpack.c.bf16 %v5113_v3, %v5112_v37 }
 0x575   : > { %7215 = vmatprep.mubr.msk.bf16.mxu1 %vm2231_vm0, %v5146_v4 }
 0x576   : > { %7216 = vmatmul.mubr.msk.bf16.gmra.mrb[188].mxu1 %vm2231_vm0, %v5147_v50 }
 0x577   : > { %v7193_v57 = vpop.f32.mrb[164].mxu1 }
 0x578   : > { %v5470_v10 = vadd.f32 %v7193_v57, %v10262_v46  ;;  %v5461_v62 = vpop.f32.mrb[165].mxu1 }
 0x579   : > { %v5462_v23 = vadd.f32 %v10262_v46, %v5461_v62  ;;  %v7194_v48 = vpop.f32.mrb[166].mxu1 }
 0x57a   : > { %v5473_v58 = vadd.f32 %v7194_v48, %v10262_v46  ;;  %v5464_v16 = vpop.f32.mrb[167].mxu1  ;;  %v5610_v11 = vmax.f32 %v5470_v10, 0.0 }
 0x57b   : > { %v5465_v26 = vadd.f32 %v10262_v46, %v5464_v16  ;;  %v5608_v0 = vmax.f32 %v5462_v23, 0.0 }
 0x57c   : > { %v5611_v27 = vmax.f32 %v5473_v58, 0.0 }
 0x57d   : > { %v5609_v55 = vmax.f32 %v5465_v26, 0.0 }
 0x57e   : > { %v5655_v1 = vpack.c.bf16 %v5611_v27, %v5610_v11 }
 0x57f   : > { %v5654_v59 = vpack.c.bf16 %v5609_v55, %v5608_v0 }
 0x581   : > { %7259 = vmatprep.mubr.msk.bf16.mxu0 %vm2736_vm1, %v5654_v59 }
 0x582   : > { %7260 = vmatmul.mubr.msk.bf16.gmra.mrb[164].mxu0 %vm2736_vm1, %v5655_v1 }
 0x598   : > { %v7197_v9 = vpop.f32.mrb[168].mxu1 }
 0x599   : > { %v5486_v25 = vadd.f32 %v7197_v9, %v10262_v46  ;;  %v5477_v21 = vpop.f32.mrb[169].mxu1 }
 0x59a   : > { %v5478_v13 = vadd.f32 %v10262_v46, %v5477_v21  ;;  %v7198_v15 = vpop.f32.mrb[170].mxu1 }
 0x59b   : > { %v5489_v49 = vadd.f32 %v7198_v15, %v10262_v46  ;;  %v5480_v6 = vpop.f32.mrb[171].mxu1  ;;  %v5614_v60 = vmax.f32 %v5486_v25, 0.0 }
 0x59c   : > { %v5481_v14 = vadd.f32 %v10262_v46, %v5480_v6  ;;  %v5612_v20 = vmax.f32 %v5478_v13, 0.0 }
 0x59d   : > { %v5615_v18 = vmax.f32 %v5489_v49, 0.0 }
 0x59e   : > { %v5613_v42 = vmax.f32 %v5481_v14, 0.0 }
 0x59f   : > { %v5657_v7 = vpack.c.bf16 %v5615_v18, %v5614_v60 }
 0x5a0   : > { %v5656_v32 = vpack.c.bf16 %v5613_v42, %v5612_v20 }
 0x5a2   : > { %7263 = vmatprep.mubr.msk.bf16.mxu0 %vm2736_vm1, %v5656_v32 }
 0x5a3   : > { %7264 = vmatmul.mubr.msk.bf16.gmra.mrb[168].mxu0 %vm2736_vm1, %v5657_v7 }
 0x5bd   : > { %v7201_v38 = vpop.f32.mrb[172].mxu1 }
 0x5be   : > { %v5502_v17 = vadd.f32 %v7201_v38, %v10262_v46  ;;  %v5493_v5 = vpop.f32.mrb[173].mxu1 }
 0x5bf   : > { %v5494_v8 = vadd.f32 %v10262_v46, %v5493_v5  ;;  %v7202_v52 = vpop.f32.mrb[174].mxu1 }
 0x5c0   : > { %v5505_v33 = vadd.f32 %v7202_v52, %v10262_v46  ;;  %v5496_v12 = vpop.f32.mrb[175].mxu1  ;;  %v5618_v30 = vmax.f32 %v5502_v17, 0.0 }
 0x5c1   : > { %v5497_v2 = vadd.f32 %v10262_v46, %v5496_v12  ;;  %v5616_v24 = vmax.f32 %v5494_v8, 0.0 }
 0x5c2   : > { %v5619_v51 = vmax.f32 %v5505_v33, 0.0 }
 0x5c3   : > { %v5617_v47 = vmax.f32 %v5497_v2, 0.0 }
 0x5c4   : > { %v5659_v29 = vpack.c.bf16 %v5619_v51, %v5618_v30 }
 0x5c5   : > { %v5658_v54 = vpack.c.bf16 %v5617_v47, %v5616_v24 }
 0x5c7   : > { %7267 = vmatprep.mubr.msk.bf16.mxu0 %vm2736_vm1, %v5658_v54 }
 0x5c8   : > { %7268 = vmatmul.mubr.msk.bf16.gmra.mrb[172].mxu0 %vm2736_vm1, %v5659_v29 }
 0x5dd   : > { %v7225_v36 = vpop.f32.mrb[128].mxu0 }
 0x5de   : > { %v5830_v53 = vadd.f32 %v7225_v36, %v10378_v44  ;;  %v7205_v22 = vpop.f32.mrb[176].mxu1  ;;  %v5821_v63 = vpop.f32.mrb[129].mxu0 }
 0x5df   : > { %v5518_v41 = vadd.f32 %v7205_v22, %v10262_v46  ;;  %v5822_v43 = vadd.f32 %v10378_v44, %v5821_v63  ;;  %v5509_v45 = vpop.f32.mrb[177].mxu1  ;;  %v7226_v34 = vpop.f32.mrb[130].mxu0 }
 0x5e0   : > { %v6078_v35 = vmax.f32 %v5830_v53, 0.0  ;;  %v5510_v28 = vadd.f32 %v10262_v46, %v5509_v45  ;;  %v5833_v19 = vadd.f32 %v7226_v34, %v10378_v44  ;;  %v7206_v61 = vpop.f32.mrb[178].mxu1  ;;  %v5824_v39 = vpop.f32.mrb[131].mxu0 }
 0x5e1   : > { %v6076_v31 = vmax.f32 %v5822_v43, 0.0  ;;  %v5521_v56 = vadd.f32 %v7206_v61, %v10262_v46  ;;  %v5825_v37 = vadd.f32 %v10378_v44, %v5824_v39  ;;  %v5512_v3 = vpop.f32.mrb[179].mxu1  ;;  %v5622_v10 = vmax.f32 %v5518_v41, 0.0 }
 0x5e2   : > { %v6142_v50 = vsel %vm339_vm2, %v5830_v53, %v6078_v35  ;;  %v6079_v4 = vmax.f32 %v5833_v19, 0.0  ;;  %v5513_v57 = vadd.f32 %v10262_v46, %v5512_v3  ;;  %v5620_v58 = vmax.f32 %v5510_v28, 0.0 }
 0x5e3   : > { %6563 = vst.msk [vmem:[%s9785_s25 + $0x210] sm:$0xff] %vm3250_vm3, %v6142_v50  ;;  %v6140_v62 = vsel %vm339_vm2, %v5822_v43, %v6076_v31  ;;  %v5623_v23 = vmax.f32 %v5521_v56, 0.0  ;;  %v6077_v48 = vmax.f32 %v5825_v37, 0.0 }
 0x5e4   : > { %6561 = vst.msk [vmem:[%s9785_s25 + $0x200] sm:$0xff] %vm3250_vm3, %v6140_v62  ;;  %v6143_v16 = vsel %vm339_vm2, %v5833_v19, %v6079_v4  ;;  %v5621_v26 = vmax.f32 %v5513_v57, 0.0 }
 0x5e5   : > { %6564 = vst.msk [vmem:[%s9785_s25 + $0x218] sm:$0xff] %vm3250_vm3, %v6143_v16  ;;  %v5661_v11 = vpack.c.bf16 %v5623_v23, %v5622_v10  ;;  %v6141_v27 = vsel %vm339_vm2, %v5825_v37, %v6077_v48  ;;  %v7229_v0 = vpop.f32.mrb[132].mxu0 }
 0x5e6   : > { %6562 = vst.msk [vmem:[%s9785_s25 + $0x208] sm:$0xff] %vm3250_vm3, %v6141_v27  ;;  %v5660_v55 = vpack.c.bf16 %v5621_v26, %v5620_v58  ;;  %v5846_v1 = vadd.f32 %v7229_v0, %v10378_v44  ;;  %v5837_v59 = vpop.f32.mrb[133].mxu0 }
 0x5e7   : > { %v5838_v9 = vadd.f32 %v10378_v44, %v5837_v59  ;;  %v7230_v25 = vpop.f32.mrb[134].mxu0 }
 0x5e8   : > { %v6082_v21 = vmax.f32 %v5846_v1, 0.0  ;;  %v5849_v13 = vadd.f32 %v7230_v25, %v10378_v44  ;;  %v5840_v15 = vpop.f32.mrb[135].mxu0  ;;  %7271 = vmatprep.mubr.msk.bf16.mxu0 %vm2736_vm1, %v5660_v55 }
 0x5e9   : > { %v6080_v49 = vmax.f32 %v5838_v9, 0.0  ;;  %v5841_v6 = vadd.f32 %v10378_v44, %v5840_v15  ;;  %7272 = vmatmul.mubr.msk.bf16.gmra.mrb[176].mxu0 %vm2736_vm1, %v5661_v11 }
 0x5ea   : > { %v6146_v14 = vsel %vm339_vm2, %v5846_v1, %v6082_v21  ;;  %v6083_v60 = vmax.f32 %v5849_v13, 0.0 }
 0x5eb   : > { %6567 = vst.msk [vmem:[%s9785_s25 + $0x230] sm:$0xff] %vm3250_vm3, %v6146_v14  ;;  %v6144_v18 = vsel %vm339_vm2, %v5838_v9, %v6080_v49  ;;  %v6081_v20 = vmax.f32 %v5841_v6, 0.0 }
 0x5ec   : > { %6565 = vst.msk [vmem:[%s9785_s25 + $0x220] sm:$0xff] %vm3250_vm3, %v6144_v18  ;;  %v6147_v42 = vsel %vm339_vm2, %v5849_v13, %v6083_v60 }
 0x5ed   : > { %6568 = vst.msk [vmem:[%s9785_s25 + $0x238] sm:$0xff] %vm3250_vm3, %v6147_v42  ;;  %v6145_v7 = vsel %vm339_vm2, %v5841_v6, %v6081_v20  ;;  %v7233_v32 = vpop.f32.mrb[136].mxu0 }
 0x5ee   : > { %6566 = vst.msk [vmem:[%s9785_s25 + $0x228] sm:$0xff] %vm3250_vm3, %v6145_v7  ;;  %v5862_v38 = vadd.f32 %v7233_v32, %v10378_v44  ;;  %v5853_v17 = vpop.f32.mrb[137].mxu0 }
 0x5ef   : > { %v5854_v5 = vadd.f32 %v10378_v44, %v5853_v17  ;;  %v7234_v8 = vpop.f32.mrb[138].mxu0 }
 0x5f0   : > { %v6086_v52 = vmax.f32 %v5862_v38, 0.0  ;;  %v5865_v33 = vadd.f32 %v7234_v8, %v10378_v44  ;;  %v5856_v12 = vpop.f32.mrb[139].mxu0 }
 0x5f1   : > { %v6084_v2 = vmax.f32 %v5854_v5, 0.0  ;;  %v5857_v30 = vadd.f32 %v10378_v44, %v5856_v12 }
 0x5f2   : > { %v6150_v51 = vsel %vm339_vm2, %v5862_v38, %v6086_v52  ;;  %v6087_v24 = vmax.f32 %v5865_v33, 0.0 }
 0x5f3   : > { %6571 = vst.msk [vmem:[%s9785_s25 + $0x250] sm:$0xff] %vm3250_vm3, %v6150_v51  ;;  %v6148_v47 = vsel %vm339_vm2, %v5854_v5, %v6084_v2  ;;  %v6085_v29 = vmax.f32 %v5857_v30, 0.0 }
 0x5f4   : > { %6569 = vst.msk [vmem:[%s9785_s25 + $0x240] sm:$0xff] %vm3250_vm3, %v6148_v47  ;;  %v6151_v54 = vsel %vm339_vm2, %v5865_v33, %v6087_v24 }
 0x5f5   : > { %6572 = vst.msk [vmem:[%s9785_s25 + $0x258] sm:$0xff] %vm3250_vm3, %v6151_v54  ;;  %v6149_v36 = vsel %vm339_vm2, %v5857_v30, %v6085_v29  ;;  %v7237_v53 = vpop.f32.mrb[140].mxu0 }
 0x5f6   : > { %6570 = vst.msk [vmem:[%s9785_s25 + $0x248] sm:$0xff] %vm3250_vm3, %v6149_v36  ;;  %v5878_v22 = vadd.f32 %v7237_v53, %v10378_v44  ;;  %v5869_v63 = vpop.f32.mrb[141].mxu0 }
 0x5f7   : > { %v5870_v41 = vadd.f32 %v10378_v44, %v5869_v63  ;;  %v7238_v43 = vpop.f32.mrb[142].mxu0 }
 0x5f8   : > { %v6090_v45 = vmax.f32 %v5878_v22, 0.0  ;;  %v5881_v34 = vadd.f32 %v7238_v43, %v10378_v44  ;;  %v5872_v35 = vpop.f32.mrb[143].mxu0 }
 0x5f9   : > { %v6088_v28 = vmax.f32 %v5870_v41, 0.0  ;;  %v5873_v19 = vadd.f32 %v10378_v44, %v5872_v35 }
 0x5fa   : > { %v6154_v61 = vsel %vm339_vm2, %v5878_v22, %v6090_v45  ;;  %v6091_v39 = vmax.f32 %v5881_v34, 0.0 }
 0x5fb   : > { %6575 = vst.msk [vmem:[%s9785_s25 + $0x270] sm:$0xff] %vm3250_vm3, %v6154_v61  ;;  %v6152_v31 = vsel %vm339_vm2, %v5870_v41, %v6088_v28  ;;  %v6089_v56 = vmax.f32 %v5873_v19, 0.0 }
 0x5fc   : > { %6573 = vst.msk [vmem:[%s9785_s25 + $0x260] sm:$0xff] %vm3250_vm3, %v6152_v31  ;;  %v6155_v37 = vsel %vm339_vm2, %v5881_v34, %v6091_v39 }
 0x5fd   : > { %6576 = vst.msk [vmem:[%s9785_s25 + $0x278] sm:$0xff] %vm3250_vm3, %v6155_v37  ;;  %v6153_v3 = vsel %vm339_vm2, %v5873_v19, %v6089_v56  ;;  %v7241_v50 = vpop.f32.mrb[144].mxu0 }
 0x5fe   : > { %6574 = vst.msk [vmem:[%s9785_s25 + $0x268] sm:$0xff] %vm3250_vm3, %v6153_v3  ;;  %v5894_v4 = vadd.f32 %v7241_v50, %v10378_v44  ;;  %v5885_v57 = vpop.f32.mrb[145].mxu0 }
 0x5ff   : > { %v5886_v10 = vadd.f32 %v10378_v44, %v5885_v57  ;;  %v7242_v62 = vpop.f32.mrb[146].mxu0 }
 0x600   : > { %v6094_v23 = vmax.f32 %v5894_v4, 0.0  ;;  %v5897_v48 = vadd.f32 %v7242_v62, %v10378_v44  ;;  %v5888_v58 = vpop.f32.mrb[147].mxu0 }
 0x601   : > { %v6092_v16 = vmax.f32 %v5886_v10, 0.0  ;;  %v5889_v26 = vadd.f32 %v10378_v44, %v5888_v58 }
 0x602   : > { %v6158_v11 = vsel %vm339_vm2, %v5894_v4, %v6094_v23  ;;  %v6095_v27 = vmax.f32 %v5897_v48, 0.0 }
 0x603   : > { %6579 = vst.msk [vmem:[%s9785_s25 + $0x290] sm:$0xff] %vm3250_vm3, %v6158_v11  ;;  %v6156_v0 = vsel %vm339_vm2, %v5886_v10, %v6092_v16  ;;  %v6093_v55 = vmax.f32 %v5889_v26, 0.0  ;;  %v7209_v1 = vpop.f32.mrb[180].mxu1 }
 0x604   : > { %6577 = vst.msk [vmem:[%s9785_s25 + $0x280] sm:$0xff] %vm3250_vm3, %v6156_v0  ;;  %v6159_v59 = vsel %vm339_vm2, %v5897_v48, %v6095_v27  ;;  %v5534_v9 = vadd.f32 %v7209_v1, %v10262_v46  ;;  %v5525_v25 = vpop.f32.mrb[181].mxu1 }
 0x605   : > { %6580 = vst.msk [vmem:[%s9785_s25 + $0x298] sm:$0xff] %vm3250_vm3, %v6159_v59  ;;  %v6157_v21 = vsel %vm339_vm2, %v5889_v26, %v6093_v55  ;;  %v5526_v13 = vadd.f32 %v10262_v46, %v5525_v25  ;;  %v7210_v15 = vpop.f32.mrb[182].mxu1  ;;  %v7245_v49 = vpop.f32.mrb[148].mxu0 }
 0x606   : > { %6578 = vst.msk [vmem:[%s9785_s25 + $0x288] sm:$0xff] %vm3250_vm3, %v6157_v21  ;;  %v5537_v6 = vadd.f32 %v7210_v15, %v10262_v46  ;;  %v5910_v14 = vadd.f32 %v7245_v49, %v10378_v44  ;;  %v5528_v60 = vpop.f32.mrb[183].mxu1  ;;  %v5901_v18 = vpop.f32.mrb[149].mxu0  ;;  %v5626_v32 = vmax.f32 %v5534_v9, 0.0 }
 0x607   : > { %v5529_v20 = vadd.f32 %v10262_v46, %v5528_v60  ;;  %v5902_v42 = vadd.f32 %v10378_v44, %v5901_v18  ;;  %v7246_v7 = vpop.f32.mrb[150].mxu0  ;;  %v5624_v52 = vmax.f32 %v5526_v13, 0.0 }
 0x608   : > { %v5627_v38 = vmax.f32 %v5537_v6, 0.0  ;;  %v6098_v17 = vmax.f32 %v5910_v14, 0.0  ;;  %v5913_v5 = vadd.f32 %v7246_v7, %v10378_v44  ;;  %v5904_v8 = vpop.f32.mrb[151].mxu0 }
 0x609   : > { %v5625_v33 = vmax.f32 %v5529_v20, 0.0  ;;  %v6096_v12 = vmax.f32 %v5902_v42, 0.0  ;;  %v5905_v2 = vadd.f32 %v10378_v44, %v5904_v8 }
 0x60a   : > { %v5663_v30 = vpack.c.bf16 %v5627_v38, %v5626_v32  ;;  %v6162_v51 = vsel %vm339_vm2, %v5910_v14, %v6098_v17  ;;  %v6099_v24 = vmax.f32 %v5913_v5, 0.0 }
 0x60b   : > { %6583 = vst.msk [vmem:[%s9785_s25 + $0x2b0] sm:$0xff] %vm3250_vm3, %v6162_v51  ;;  %v5662_v47 = vpack.c.bf16 %v5625_v33, %v5624_v52  ;;  %v6160_v29 = vsel %vm339_vm2, %v5902_v42, %v6096_v12  ;;  %v6097_v54 = vmax.f32 %v5905_v2, 0.0 }
 0x60c   : > { %6581 = vst.msk [vmem:[%s9785_s25 + $0x2a0] sm:$0xff] %vm3250_vm3, %v6160_v29  ;;  %v6163_v36 = vsel %vm339_vm2, %v5913_v5, %v6099_v24 }
 0x60d   : > { %6584 = vst.msk [vmem:[%s9785_s25 + $0x2b8] sm:$0xff] %vm3250_vm3, %v6163_v36  ;;  %v6161_v53 = vsel %vm339_vm2, %v5905_v2, %v6097_v54  ;;  %v7249_v22 = vpop.f32.mrb[152].mxu0  ;;  %7275 = vmatprep.mubr.msk.bf16.mxu0 %vm2736_vm1, %v5662_v47 }
 0x60e   : > { %6582 = vst.msk [vmem:[%s9785_s25 + $0x2a8] sm:$0xff] %vm3250_vm3, %v6161_v53  ;;  %v5926_v63 = vadd.f32 %v7249_v22, %v10378_v44  ;;  %v5917_v41 = vpop.f32.mrb[153].mxu0  ;;  %7276 = vmatmul.mubr.msk.bf16.gmra.mrb[180].mxu0 %vm2736_vm1, %v5663_v30 }
 0x60f   : > { %v5918_v43 = vadd.f32 %v10378_v44, %v5917_v41  ;;  %v7250_v45 = vpop.f32.mrb[154].mxu0 }
 0x610   : > { %v6102_v34 = vmax.f32 %v5926_v63, 0.0  ;;  %v5929_v35 = vadd.f32 %v7250_v45, %v10378_v44  ;;  %v5920_v28 = vpop.f32.mrb[155].mxu0 }
 0x611   : > { %v6100_v19 = vmax.f32 %v5918_v43, 0.0  ;;  %v5921_v61 = vadd.f32 %v10378_v44, %v5920_v28 }
 0x612   : > { %v6166_v39 = vsel %vm339_vm2, %v5926_v63, %v6102_v34  ;;  %v6103_v31 = vmax.f32 %v5929_v35, 0.0 }
 0x613   : > { %6587 = vst.msk [vmem:[%s9785_s25 + $0x2d0] sm:$0xff] %vm3250_vm3, %v6166_v39  ;;  %v6164_v56 = vsel %vm339_vm2, %v5918_v43, %v6100_v19  ;;  %v6101_v37 = vmax.f32 %v5921_v61, 0.0 }
 0x614   : > { %6585 = vst.msk [vmem:[%s9785_s25 + $0x2c0] sm:$0xff] %vm3250_vm3, %v6164_v56  ;;  %v6167_v3 = vsel %vm339_vm2, %v5929_v35, %v6103_v31 }
 0x615   : > { %6588 = vst.msk [vmem:[%s9785_s25 + $0x2d8] sm:$0xff] %vm3250_vm3, %v6167_v3  ;;  %v6165_v50 = vsel %vm339_vm2, %v5921_v61, %v6101_v37  ;;  %v7253_v4 = vpop.f32.mrb[156].mxu0 }
 0x616   : > { %6586 = vst.msk [vmem:[%s9785_s25 + $0x2c8] sm:$0xff] %vm3250_vm3, %v6165_v50  ;;  %v5942_v57 = vadd.f32 %v7253_v4, %v10378_v44  ;;  %v5933_v10 = vpop.f32.mrb[157].mxu0 }
 0x617   : > { %v5934_v62 = vadd.f32 %v10378_v44, %v5933_v10  ;;  %v7254_v23 = vpop.f32.mrb[158].mxu0 }
 0x618   : > { %v6106_v48 = vmax.f32 %v5942_v57, 0.0  ;;  %v5945_v58 = vadd.f32 %v7254_v23, %v10378_v44  ;;  %v5936_v16 = vpop.f32.mrb[159].mxu0 }
 0x619   : > { %v6104_v26 = vmax.f32 %v5934_v62, 0.0  ;;  %v5937_v11 = vadd.f32 %v10378_v44, %v5936_v16 }
 0x61a   : > { %v6170_v27 = vsel %vm339_vm2, %v5942_v57, %v6106_v48  ;;  %v6107_v0 = vmax.f32 %v5945_v58, 0.0 }
 0x61b   : > { %6591 = vst.msk [vmem:[%s9785_s25 + $0x2f0] sm:$0xff] %vm3250_vm3, %v6170_v27  ;;  %v6168_v55 = vsel %vm339_vm2, %v5934_v62, %v6104_v26  ;;  %v6105_v1 = vmax.f32 %v5937_v11, 0.0 }
 0x61c   : > { %6589 = vst.msk [vmem:[%s9785_s25 + $0x2e0] sm:$0xff] %vm3250_vm3, %v6168_v55  ;;  %v6171_v59 = vsel %vm339_vm2, %v5945_v58, %v6107_v0 }
 0x61d   : > { %6592 = vst.msk [vmem:[%s9785_s25 + $0x2f8] sm:$0xff] %vm3250_vm3, %v6171_v59  ;;  %v6169_v9 = vsel %vm339_vm2, %v5937_v11, %v6105_v1 }
 0x61e   : > { %6590 = vst.msk [vmem:[%s9785_s25 + $0x2e8] sm:$0xff] %vm3250_vm3, %v6169_v9 }
 0x624   : > { %v7213_v25 = vpop.f32.mrb[184].mxu1 }
 0x625   : > { %v5550_v21 = vadd.f32 %v7213_v25, %v10262_v46  ;;  %v5541_v13 = vpop.f32.mrb[185].mxu1 }
 0x626   : > { %v5542_v15 = vadd.f32 %v10262_v46, %v5541_v13  ;;  %v7214_v49 = vpop.f32.mrb[186].mxu1 }
 0x627   : > { %v5553_v6 = vadd.f32 %v7214_v49, %v10262_v46  ;;  %v5544_v14 = vpop.f32.mrb[187].mxu1  ;;  %v5630_v18 = vmax.f32 %v5550_v21, 0.0 }
 0x628   : > { %v5545_v60 = vadd.f32 %v10262_v46, %v5544_v14  ;;  %v5628_v42 = vmax.f32 %v5542_v15, 0.0 }
 0x629   : > { %v5631_v20 = vmax.f32 %v5553_v6, 0.0 }
 0x62a   : > { %v5629_v7 = vmax.f32 %v5545_v60, 0.0 }
 0x62b   : > { %v5665_v32 = vpack.c.bf16 %v5631_v20, %v5630_v18 }
 0x62c   : > { %v5664_v38 = vpack.c.bf16 %v5629_v7, %v5628_v42 }
 0x62e   : > { %7279 = vmatprep.mubr.msk.bf16.mxu0 %vm2736_vm1, %v5664_v38 }
 0x62f   : > { %7280 = vmatmul.mubr.msk.bf16.gmra.mrb[184].mxu0 %vm2736_vm1, %v5665_v32 }
 0x631   : > { %v7257_v17 = vpop.f32.mrb[160].mxu0 }
 0x632   : > { %v5958_v5 = vadd.f32 %v7257_v17, %v10378_v44  ;;  %v5949_v8 = vpop.f32.mrb[161].mxu0 }
 0x633   : > { %v5950_v52 = vadd.f32 %v10378_v44, %v5949_v8  ;;  %v7258_v33 = vpop.f32.mrb[162].mxu0 }
 0x634   : > { %v6110_v12 = vmax.f32 %v5958_v5, 0.0  ;;  %v5961_v2 = vadd.f32 %v7258_v33, %v10378_v44  ;;  %v5952_v30 = vpop.f32.mrb[163].mxu0 }
 0x635   : > { %v6108_v51 = vmax.f32 %v5950_v52, 0.0  ;;  %v5953_v24 = vadd.f32 %v10378_v44, %v5952_v30 }
 0x636   : > { %v6174_v47 = vsel %vm339_vm2, %v5958_v5, %v6110_v12  ;;  %v6111_v29 = vmax.f32 %v5961_v2, 0.0 }
 0x637   : > { %6595 = vst.msk [vmem:[%s9785_s25 + $0x310] sm:$0xff] %vm3250_vm3, %v6174_v47  ;;  %v6172_v54 = vsel %vm339_vm2, %v5950_v52, %v6108_v51  ;;  %v6109_v36 = vmax.f32 %v5953_v24, 0.0 }
 0x638   : > { %6593 = vst.msk [vmem:[%s9785_s25 + $0x300] sm:$0xff] %vm3250_vm3, %v6172_v54  ;;  %v6175_v53 = vsel %vm339_vm2, %v5961_v2, %v6111_v29 }
 0x639   : > { %6596 = vst.msk [vmem:[%s9785_s25 + $0x318] sm:$0xff] %vm3250_vm3, %v6175_v53  ;;  %v6173_v22 = vsel %vm339_vm2, %v5953_v24, %v6109_v36 }
 0x63a   : > { %6594 = vst.msk [vmem:[%s9785_s25 + $0x308] sm:$0xff] %vm3250_vm3, %v6173_v22 }
 0x649   : > { %v7217_v63 = vpop.f32.mrb[188].mxu1 }
 0x64a   : > { %v5566_v41 = vadd.f32 %v7217_v63, %v10262_v46  ;;  %v5557_v43 = vpop.f32.mrb[189].mxu1 }
 0x64b   : > { %v5558_v45 = vadd.f32 %v10262_v46, %v5557_v43  ;;  %v7218_v34 = vpop.f32.mrb[190].mxu1 }
 0x64c   : > { %v5569_v35 = vadd.f32 %v7218_v34, %v10262_v46  ;;  %v5560_v28 = vpop.f32.mrb[191].mxu1  ;;  %v5634_v61 = vmax.f32 %v5566_v41, 0.0 }
 0x64d   : > { %v5561_v19 = vadd.f32 %v10262_v46, %v5560_v28  ;;  %v5632_v31 = vmax.f32 %v5558_v45, 0.0 }
 0x64e   : > { %v5635_v39 = vmax.f32 %v5569_v35, 0.0 }
 0x64f   : > { %v5633_v56 = vmax.f32 %v5561_v19, 0.0 }
 0x650   : > { %v5667_v37 = vpack.c.bf16 %v5635_v39, %v5634_v61 }
 0x651   : > { %v5666_v3 = vpack.c.bf16 %v5633_v56, %v5632_v31 }
 0x653   : > { %7283 = vmatprep.mubr.msk.bf16.mxu1 %vm2736_vm1, %v5666_v3 }
 0x654   : > { %7284 = vmatmul.mubr.msk.bf16.vlgmr.msra.gmra.mrb[192].mxu1 %vm2736_vm1, %v5667_v37 }
 0x655   : > { %v7261_v50 = vpop.f32.mrb[164].mxu0 }
 0x656   : > { %v5974_v4 = vadd.f32 %v7261_v50, %v10378_v44  ;;  %v5965_v57 = vpop.f32.mrb[165].mxu0 }
 0x657   : > { %v5966_v10 = vadd.f32 %v10378_v44, %v5965_v57  ;;  %v7262_v46 = vpop.f32.mrb[166].mxu0 }
 0x658   : > { %v6114_v62 = vmax.f32 %v5974_v4, 0.0  ;;  %v5977_v23 = vadd.f32 %v7262_v46, %v10378_v44  ;;  %v5968_v48 = vpop.f32.mrb[167].mxu0 }
 0x659   : > { %v6112_v58 = vmax.f32 %v5966_v10, 0.0  ;;  %v5969_v16 = vadd.f32 %v10378_v44, %v5968_v48 }
 0x65a   : > { %v6178_v26 = vsel %vm339_vm2, %v5974_v4, %v6114_v62  ;;  %v6115_v11 = vmax.f32 %v5977_v23, 0.0 }
 0x65b   : > { %6599 = vst.msk [vmem:[%s9785_s25 + $0x330] sm:$0xff] %vm3250_vm3, %v6178_v26  ;;  %v6176_v27 = vsel %vm339_vm2, %v5966_v10, %v6112_v58  ;;  %v6113_v0 = vmax.f32 %v5969_v16, 0.0 }
 0x65c   : > { %6597 = vst.msk [vmem:[%s9785_s25 + $0x320] sm:$0xff] %vm3250_vm3, %v6176_v27  ;;  %v6179_v55 = vsel %vm339_vm2, %v5977_v23, %v6115_v11 }
 0x65d   : > { %6600 = vst.msk [vmem:[%s9785_s25 + $0x338] sm:$0xff] %vm3250_vm3, %v6179_v55  ;;  %v6177_v1 = vsel %vm339_vm2, %v5969_v16, %v6113_v0 }
 0x65e   : > { %6598 = vst.msk [vmem:[%s9785_s25 + $0x328] sm:$0xff] %vm3250_vm3, %v6177_v1 }
 0x676   : > { %v7265_v59 = vpop.f32.mrb[168].mxu0 }
 0x677   : > { %v5990_v9 = vadd.f32 %v7265_v59, %v10378_v44  ;;  %v5981_v25 = vpop.f32.mrb[169].mxu0 }
 0x678   : > { %v5982_v21 = vadd.f32 %v10378_v44, %v5981_v25  ;;  %v7266_v13 = vpop.f32.mrb[170].mxu0 }
 0x679   : > { %v6118_v15 = vmax.f32 %v5990_v9, 0.0  ;;  %v5993_v49 = vadd.f32 %v7266_v13, %v10378_v44  ;;  %v5984_v6 = vpop.f32.mrb[171].mxu0 }
 0x67a   : > { %v6116_v14 = vmax.f32 %v5982_v21, 0.0  ;;  %v5985_v60 = vadd.f32 %v10378_v44, %v5984_v6 }
 0x67b   : > { %v6182_v18 = vsel %vm339_vm2, %v5990_v9, %v6118_v15  ;;  %v6119_v20 = vmax.f32 %v5993_v49, 0.0 }
 0x67c   : > { %6603 = vst.msk [vmem:[%s9785_s25 + $0x350] sm:$0xff] %vm3250_vm3, %v6182_v18  ;;  %v6180_v42 = vsel %vm339_vm2, %v5982_v21, %v6116_v14  ;;  %v6117_v7 = vmax.f32 %v5985_v60, 0.0 }
 0x67d   : > { %6601 = vst.msk [vmem:[%s9785_s25 + $0x340] sm:$0xff] %vm3250_vm3, %v6180_v42  ;;  %v6183_v32 = vsel %vm339_vm2, %v5993_v49, %v6119_v20 }
 0x67e   : > { %6604 = vst.msk [vmem:[%s9785_s25 + $0x358] sm:$0xff] %vm3250_vm3, %v6183_v32  ;;  %v6181_v38 = vsel %vm339_vm2, %v5985_v60, %v6117_v7 }
 0x67f   : > { %6602 = vst.msk [vmem:[%s9785_s25 + $0x348] sm:$0xff] %vm3250_vm3, %v6181_v38 }
 0x69b   : > { %v7269_v17 = vpop.f32.mrb[172].mxu0 }
 0x69c   : > { %v6006_v5 = vadd.f32 %v7269_v17, %v10378_v44  ;;  %v5997_v8 = vpop.f32.mrb[173].mxu0 }
 0x69d   : > { %v5998_v52 = vadd.f32 %v10378_v44, %v5997_v8  ;;  %v7270_v33 = vpop.f32.mrb[174].mxu0 }
 0x69e   : > { %v6122_v12 = vmax.f32 %v6006_v5, 0.0  ;;  %v6009_v2 = vadd.f32 %v7270_v33, %v10378_v44  ;;  %v6000_v30 = vpop.f32.mrb[175].mxu0 }
 0x69f   : > { %v6120_v51 = vmax.f32 %v5998_v52, 0.0  ;;  %v6001_v24 = vadd.f32 %v10378_v44, %v6000_v30 }
 0x6a0   : > { %v6186_v47 = vsel %vm339_vm2, %v6006_v5, %v6122_v12  ;;  %v6123_v29 = vmax.f32 %v6009_v2, 0.0 }
 0x6a1   : > { %6607 = vst.msk [vmem:[%s9785_s25 + $0x370] sm:$0xff] %vm3250_vm3, %v6186_v47  ;;  %v6184_v54 = vsel %vm339_vm2, %v5998_v52, %v6120_v51  ;;  %v6121_v36 = vmax.f32 %v6001_v24, 0.0 }
 0x6a2   : > { %6605 = vst.msk [vmem:[%s9785_s25 + $0x360] sm:$0xff] %vm3250_vm3, %v6184_v54  ;;  %v6187_v53 = vsel %vm339_vm2, %v6009_v2, %v6123_v29 }
 0x6a3   : > { %6608 = vst.msk [vmem:[%s9785_s25 + $0x378] sm:$0xff] %vm3250_vm3, %v6187_v53  ;;  %v6185_v22 = vsel %vm339_vm2, %v6001_v24, %v6121_v36 }
 0x6a4   : > { %6606 = vst.msk [vmem:[%s9785_s25 + $0x368] sm:$0xff] %vm3250_vm3, %v6185_v22 }
 0x6bc   : > { %v7273_v63 = vpop.f32.mrb[176].mxu0 }
 0x6bd   : > { %v6022_v41 = vadd.f32 %v7273_v63, %v10378_v44  ;;  %v6013_v43 = vpop.f32.mrb[177].mxu0 }
 0x6be   : > { %v6014_v45 = vadd.f32 %v10378_v44, %v6013_v43  ;;  %v7274_v34 = vpop.f32.mrb[178].mxu0 }
 0x6bf   : > { %v6126_v35 = vmax.f32 %v6022_v41, 0.0  ;;  %v6025_v28 = vadd.f32 %v7274_v34, %v10378_v44  ;;  %v6016_v19 = vpop.f32.mrb[179].mxu0 }
 0x6c0   : > { %v6124_v61 = vmax.f32 %v6014_v45, 0.0  ;;  %v6017_v39 = vadd.f32 %v10378_v44, %v6016_v19 }
 0x6c1   : > { %v6190_v31 = vsel %vm339_vm2, %v6022_v41, %v6126_v35  ;;  %v6127_v56 = vmax.f32 %v6025_v28, 0.0 }
 0x6c2   : > { %6611 = vst.msk [vmem:[%s9785_s25 + $0x390] sm:$0xff] %vm3250_vm3, %v6190_v31  ;;  %v6188_v37 = vsel %vm339_vm2, %v6014_v45, %v6124_v61  ;;  %v6125_v3 = vmax.f32 %v6017_v39, 0.0 }
 0x6c3   : > { %6609 = vst.msk [vmem:[%s9785_s25 + $0x380] sm:$0xff] %vm3250_vm3, %v6188_v37  ;;  %v6191_v50 = vsel %vm339_vm2, %v6025_v28, %v6127_v56 }
 0x6c4   : > { %6612 = vst.msk [vmem:[%s9785_s25 + $0x398] sm:$0xff] %vm3250_vm3, %v6191_v50  ;;  %v6189_v4 = vsel %vm339_vm2, %v6017_v39, %v6125_v3 }
 0x6c5   : > { %6610 = vst.msk [vmem:[%s9785_s25 + $0x388] sm:$0xff] %vm3250_vm3, %v6189_v4 }
 0x6e1   : > { %v7277_v57 = vpop.f32.mrb[180].mxu0 }
 0x6e2   : > { %v6038_v10 = vadd.f32 %v7277_v57, %v10378_v44  ;;  %v6029_v46 = vpop.f32.mrb[181].mxu0 }
 0x6e3   : > { %v6030_v62 = vadd.f32 %v10378_v44, %v6029_v46  ;;  %v7278_v23 = vpop.f32.mrb[182].mxu0 }
 0x6e4   : > { %v6130_v48 = vmax.f32 %v6038_v10, 0.0  ;;  %v6041_v58 = vadd.f32 %v7278_v23, %v10378_v44  ;;  %v6032_v16 = vpop.f32.mrb[183].mxu0 }
 0x6e5   : > { %v6128_v26 = vmax.f32 %v6030_v62, 0.0  ;;  %v6033_v11 = vadd.f32 %v10378_v44, %v6032_v16 }
 0x6e6   : > { %v6194_v27 = vsel %vm339_vm2, %v6038_v10, %v6130_v48  ;;  %v6131_v0 = vmax.f32 %v6041_v58, 0.0 }
 0x6e7   : > { %6615 = vst.msk [vmem:[%s9785_s25 + $0x3b0] sm:$0xff] %vm3250_vm3, %v6194_v27  ;;  %v6192_v55 = vsel %vm339_vm2, %v6030_v62, %v6128_v26  ;;  %v6129_v1 = vmax.f32 %v6033_v11, 0.0 }
 0x6e8   : > { %6613 = vst.msk [vmem:[%s9785_s25 + $0x3a0] sm:$0xff] %vm3250_vm3, %v6192_v55  ;;  %v6195_v59 = vsel %vm339_vm2, %v6041_v58, %v6131_v0 }
 0x6e9   : > { %6616 = vst.msk [vmem:[%s9785_s25 + $0x3b8] sm:$0xff] %vm3250_vm3, %v6195_v59  ;;  %v6193_v9 = vsel %vm339_vm2, %v6033_v11, %v6129_v1 }
 0x6ea   : > { %6614 = vst.msk [vmem:[%s9785_s25 + $0x3a8] sm:$0xff] %vm3250_vm3, %v6193_v9 }
 0x702   : > { %v7281_v25 = vpop.f32.mrb[184].mxu0 }
 0x703   : > { %v6054_v21 = vadd.f32 %v7281_v25, %v10378_v44  ;;  %v6045_v13 = vpop.f32.mrb[185].mxu0 }
 0x704   : > { %v6046_v15 = vadd.f32 %v10378_v44, %v6045_v13  ;;  %v7282_v49 = vpop.f32.mrb[186].mxu0 }
 0x705   : > { %v6134_v6 = vmax.f32 %v6054_v21, 0.0  ;;  %v6057_v14 = vadd.f32 %v7282_v49, %v10378_v44  ;;  %v6048_v60 = vpop.f32.mrb[187].mxu0 }
 0x706   : > { %v6132_v18 = vmax.f32 %v6046_v15, 0.0  ;;  %v6049_v20 = vadd.f32 %v10378_v44, %v6048_v60 }
 0x707   : > { %v6198_v42 = vsel %vm339_vm2, %v6054_v21, %v6134_v6  ;;  %v6135_v7 = vmax.f32 %v6057_v14, 0.0 }
 0x708   : > { %6619 = vst.msk [vmem:[%s9785_s25 + $0x3d0] sm:$0xff] %vm3250_vm3, %v6198_v42  ;;  %v6196_v32 = vsel %vm339_vm2, %v6046_v15, %v6132_v18  ;;  %v6133_v38 = vmax.f32 %v6049_v20, 0.0 }
 0x709   : > { %6617 = vst.msk [vmem:[%s9785_s25 + $0x3c0] sm:$0xff] %vm3250_vm3, %v6196_v32  ;;  %v6199_v17 = vsel %vm339_vm2, %v6057_v14, %v6135_v7 }
 0x70a   : > { %6620 = vst.msk [vmem:[%s9785_s25 + $0x3d8] sm:$0xff] %vm3250_vm3, %v6199_v17  ;;  %v6197_v5 = vsel %vm339_vm2, %v6049_v20, %v6133_v38 }
 0x70b   : > { %6618 = vst.msk [vmem:[%s9785_s25 + $0x3c8] sm:$0xff] %vm3250_vm3, %v6197_v5 }
 0x727   : > { %v7285_v8 = vpop.f32.mrb[192].mxu1 }
 0x728   : > { %v6070_v52 = vadd.f32 %v7285_v8, %v10378_v44  ;;  %v6061_v33 = vpop.f32.mrb[193].mxu1 }
 0x729   : > { %v6062_v12 = vadd.f32 %v10378_v44, %v6061_v33  ;;  %v7286_v2 = vpop.f32.mrb[194].mxu1 }
 0x72a   : > { %v6138_v30 = vmax.f32 %v6070_v52, 0.0  ;;  %v6073_v51 = vadd.f32 %v7286_v2, %v10378_v44  ;;  %v6064_v24 = vpop.f32.mrb[195].mxu1 }
 0x72b   : > { %v6136_v47 = vmax.f32 %v6062_v12, 0.0  ;;  %v6065_v29 = vadd.f32 %v10378_v44, %v6064_v24 }
 0x72c   : > { %v6202_v54 = vsel %vm339_vm2, %v6070_v52, %v6138_v30  ;;  %v6139_v36 = vmax.f32 %v6073_v51, 0.0 }
 0x72d   : > { %6623 = vst.msk [vmem:[%s9785_s25 + $0x3f0] sm:$0xff] %vm3250_vm3, %v6202_v54  ;;  %v6200_v53 = vsel %vm339_vm2, %v6062_v12, %v6136_v47  ;;  %v6137_v22 = vmax.f32 %v6065_v29, 0.0 }
 0x72e   : > { %6621 = vst.msk [vmem:[%s9785_s25 + $0x3e0] sm:$0xff] %vm3250_vm3, %v6200_v53  ;;  %v6203_v63 = vsel %vm339_vm2, %v6073_v51, %v6139_v36 }
 0x72f   : > { %6624 = vst.msk [vmem:[%s9785_s25 + $0x3f8] sm:$0xff] %vm3250_vm3, %v6203_v63  ;;  %v6201_v44 = vsel %vm339_vm2, %v6065_v29, %v6137_v22 }
 0x730   : > { %6622 = vst.msk [vmem:[%s9785_s25 + $0x3e8] sm:$0xff] %vm3250_vm3, %v6201_v44 }
 0x731 PF: > { %s19_s30 = sadd.s32 1, %s7521_s30  }
 0x732   : > { %p16_p4 = scmp.ge.s32.totalorder %s19_s30, 4  }
 0x734   :  { %18 = sbr.rel (!%p16_p4) target bundleno = 1 (0x1), region = 88 }

</bundles_post_ra>
